<compile_context>
chip_gen: v7x
topology: tpu7x:2x2x1
jax: 0.10.0
libtpu: 0.0.40
codegen_flags: <defaults>
</compile_context>

<pallas_src>
import functools

import jax
import jax.numpy as jnp
import numpy as np
from jax.experimental import pallas as pl
from jax.experimental.pallas import tpu as pltpu

IN_DIM = 700
OUT_DIM = 768


def _seq2seq_attn_kernel(ctx_ref, w_ref, q_ref, b_ref, out_ref, *, s_valid):
    # ctx_ref: (bb, Sp, K) f32   w_ref: (K, N) f32
    # q_ref:   (bb, 1, N)  f32   b_ref: (1, 1, N) f32   out_ref: (bb, 1, N) f32
    bb, sp, k = ctx_ref.shape
    n = w_ref.shape[1]

    # f32 -> bf16 casts on the VPU (hide under the MXU matmul); keeps HBM
    # traffic at one f32 read of ctx with no separate host-side pad/cast pass.
    ctx_bf = ctx_ref[...].astype(jnp.bfloat16)
    w_bf = w_ref[...].astype(jnp.bfloat16)

    # One big MXU matmul over all bb*Sp rows of this batch block (f32 acc).
    # Sp is a multiple of 8, so both reshapes are layout-preserving views.
    nc = jnp.dot(ctx_bf.reshape(bb * sp, k), w_bf,
                 preferred_element_type=jnp.float32)
    nc3 = nc.reshape(bb, sp, n)                                 # (bb, Sp, N) f32

    # scores[b, s] = <nc3[b, s, :], q[b, :]>  -- VPU mul + lane reduce.
    # The bias contribution <bias, q[b]> is constant over s, so it cancels in
    # the softmax and is omitted here.
    q = q_ref[...]                                              # (bb, 1, N)
    scores = jnp.sum(nc3 * q, axis=-1, keepdims=True)           # (bb, Sp, 1)

    # Mask sequence-padding rows (only present when S % 8 != 0).
    if sp != s_valid:
        sid = jax.lax.broadcasted_iota(jnp.int32, (bb, sp, 1), 1)
        scores = jnp.where(sid < s_valid, scores, -jnp.inf)

    # Softmax over the sequence axis (torch dim=1).  Exact divide: the
    # approximate reciprocal (~8-bit) previously injected ~4e-3 per-row error.
    m = jnp.max(scores, axis=1, keepdims=True)                  # (bb, 1, 1)
    e = jnp.exp(scores - m)
    attn = e / jnp.sum(e, axis=1, keepdims=True)                # (bb, Sp, 1)

    # out[b, :] = sum_s attn[b, s] * nc3[b, s, :]  -- VPU mul + sublane reduce.
    out = jnp.sum(attn * nc3, axis=1, keepdims=True)            # (bb, 1, N)

    # Bias added exactly once (attention weights sum to 1).
    out_ref[...] = (out + b_ref[...]).astype(out_ref.dtype)


def seq2seq_attention(context, query, weight, bias, *, block_batch=None):
    """context: (S, B, 700) f32; query: (B, 768) f32;
       weight: (700, 768) f32; bias: (768,) f32.  Returns (B, 768) f32."""
    S, B, in_dim = context.shape
    out_dim = weight.shape[1]

    # Exactly torch's context.view(S*B, -1) ... .view(B, S, 768): a pure
    # row-major reshape (no transpose, no data movement).
    ctx_r = context.reshape(S * B, in_dim).reshape(B, S, in_dim)

    # Pad S to a multiple of 8 only when needed so in-kernel reshapes that
    # merge/split the (bb, S) sublane dims are relayout-free.
    s_pad = ((S + 7) // 8) * 8
    if s_pad != S:
        ctx_r = jnp.pad(ctx_r, ((0, 0), (0, s_pad - S), (0, 0)))

    if block_batch is None:
        # ~1024 MXU rows per grid step amortizes per-step pipeline overhead
        # while keeping the f32 ctx block + f32 intermediates well inside the
        # 48 MiB scoped-VMEM budget on every TPU generation.
        block_batch = max(1, min(B, 1024 // s_pad))
        # TODO(synk): on v7x (2 TensorCores) prefer an even, >=4-step grid for
        # large B; on single-core v5e/v6e never split a batch that fits a tile.
    bb = block_batch
    grid = (pl.cdiv(B, bb),)          # last block may be partial (masked)

    q_r = query.reshape(B, 1, out_dim)      # free reshapes, no prep kernels
    b_r = bias.reshape(1, 1, out_dim)

    kernel = functools.partial(_seq2seq_attn_kernel, s_valid=S)

    out = pl.pallas_call(
        kernel,
        out_shape=jax.ShapeDtypeStruct((B, 1, out_dim), jnp.float32),
        grid=grid,
        in_specs=[
            pl.BlockSpec((bb, s_pad, in_dim), lambda i: (i, 0, 0)),
            pl.BlockSpec((in_dim, out_dim), lambda i: (0, 0)),
            pl.BlockSpec((bb, 1, out_dim), lambda i: (i, 0, 0)),
            pl.BlockSpec((1, 1, out_dim), lambda i: (0, 0, 0)),
        ],
        out_specs=pl.BlockSpec((bb, 1, out_dim), lambda i: (i, 0, 0)),
        compiler_params=pltpu.CompilerParams(
            dimension_semantics=("parallel",),
            vmem_limit_bytes=48 * 1024 * 1024),
    )(ctx_r, weight, q_r, b_r)
    return out.reshape(B, out_dim)


def _reference(context, query, weight, bias):
    """Pure-JAX reference with the same bf16 input quantization the kernel
       (and the TPU MXU) applies to context/weight; f32 math elsewhere."""
    S, B, in_dim = context.shape
    out_dim = weight.shape[1]
    hi = jax.lax.Precision.HIGHEST
    ctx = context.astype(jnp.bfloat16).astype(jnp.float32)
    w = weight.astype(jnp.bfloat16).astype(jnp.float32)
    nc = (jnp.dot(ctx.reshape(S * B, in_dim), w, precision=hi)
          + bias).reshape(B, S, out_dim)
    scores = jnp.einsum("bsd,bd->bs", nc, query, precision=hi)
    attn = jax.nn.softmax(scores, axis=1)
    return jnp.einsum("bs,bsd->bd", attn, nc, precision=hi)


if __name__ == "__main__":
    key = jax.random.PRNGKey(0)
    k_ctx, k_q, k_w, k_b = jax.random.split(key, 4)

    # Deterministic synthetic parameters (nn.Linear(700, 768) shapes).
    bound = 1.0 / np.sqrt(IN_DIM)
    weight = jax.random.uniform(k_w, (IN_DIM, OUT_DIM), jnp.float32, -bound, bound)
    bias = jax.random.uniform(k_b, (OUT_DIM,), jnp.float32, -bound, bound)

    attn_fn = jax.jit(seq2seq_attention, static_argnames=("block_batch",))

    # 1) Single grid step, S already a multiple of 8.
    S, B = 16, 8
    context = jax.random.normal(k_ctx, (S, B, IN_DIM), jnp.float32)
    query = jax.random.normal(k_q, (B, OUT_DIM), jnp.float32)
    out = jax.block_until_ready(attn_fn(context, query, weight, bias))
    ref = jax.block_until_ready(_reference(context, query, weight, bias))
    np.testing.assert_allclose(np.asarray(out), np.asarray(ref),
                               rtol=1e-3, atol=1e-3)

    # 2) Multi-step grid with a partial (masked) last batch block.
    S2, B2 = 8, 5
    context2 = jax.random.normal(jax.random.fold_in(k_ctx, 1),
                                 (S2, B2, IN_DIM), jnp.float32)
    query2 = jax.random.normal(jax.random.fold_in(k_q, 1),
                               (B2, OUT_DIM), jnp.float32)
    out2 = jax.block_until_ready(
        attn_fn(context2, query2, weight, bias, block_batch=2))
    ref2 = jax.block_until_ready(_reference(context2, query2, weight, bias))
    np.testing.assert_allclose(np.asarray(out2), np.asarray(ref2),
                               rtol=1e-3, atol=1e-3)

    # 3) S not a multiple of 8: exercises the seq-padding + -inf mask path.
    S3, B3 = 11, 4
    context3 = jax.random.normal(jax.random.fold_in(k_ctx, 2),
                                 (S3, B3, IN_DIM), jnp.float32)
    query3 = jax.random.normal(jax.random.fold_in(k_q, 2),
                               (B3, OUT_DIM), jnp.float32)
    out3 = jax.block_until_ready(attn_fn(context3, query3, weight, bias))
    ref3 = jax.block_until_ready(_reference(context3, query3, weight, bias))
    np.testing.assert_allclose(np.asarray(out3), np.asarray(ref3),
                               rtol=1e-3, atol=1e-3)

    print("KERNEL_OK")
</pallas_src>

<mosaic_0001>
module attributes {stable_mosaic.version = 11 : i64} {
  func.func @_seq2seq_attn_kernel(%arg0: i32, %arg1: memref<8x16x700xf32, #tpu.memory_space<vmem>>, %arg2: memref<700x768xf32, #tpu.memory_space<vmem>>, %arg3: memref<8x1x768xf32, #tpu.memory_space<vmem>>, %arg4: memref<1x1x768xf32, #tpu.memory_space<vmem>>, %arg5: memref<8x1x768xf32, #tpu.memory_space<vmem>>) attributes {dimension_semantics = [#tpu.dimension_semantics<parallel>], iteration_bounds = array<i64: 1>, scalar_prefetch = 0 : i64, scratch_operands = 0 : i64, tpu.core_type = #tpu.core_type<tc>, window_params = [{transform_indices = @transform_0, window_bounds = array<i64: 8, 16, 700>}, {pipeline_mode = #tpu.pipeline_mode<synchronous>, transform_indices = @transform_1, window_bounds = array<i64: 700, 768>}, {transform_indices = @transform_2, window_bounds = array<i64: 8, 1, 768>}, {pipeline_mode = #tpu.pipeline_mode<synchronous>, transform_indices = @transform_3, window_bounds = array<i64: 1, 1, 768>}, {transform_indices = @transform_4, window_bounds = array<i64: 8, 1, 768>}]} {
    %c0 = arith.constant 0 : index
    %c0_0 = arith.constant 0 : index
    %c0_1 = arith.constant 0 : index
    %0 = vector.load %arg1[%c0, %c0_0, %c0_1] : memref<8x16x700xf32, #tpu.memory_space<vmem>>, vector<8x16x700xf32>
    %1 = arith.truncf %0 : vector<8x16x700xf32> to vector<8x16x700xbf16>
    %c0_2 = arith.constant 0 : index
    %c0_3 = arith.constant 0 : index
    %2 = vector.load %arg2[%c0_2, %c0_3] : memref<700x768xf32, #tpu.memory_space<vmem>>, vector<700x768xf32>
    %3 = arith.truncf %2 : vector<700x768xf32> to vector<700x768xbf16>
    %4 = vector.shape_cast %1 : vector<8x16x700xbf16> to vector<128x700xbf16>
    %cst = arith.constant dense<0.000000e+00> : vector<128x768xf32>
    %5 = tpu.matmul %4, %3, %cst {dimension_numbers = #tpu.dot_dimension_numbers<[1], [0], [0], [1], [0, 0, 1, 1], [], []>} : vector<128x700xbf16>, vector<700x768xbf16>, vector<128x768xf32> -> vector<128x768xf32>
    %6 = vector.shape_cast %5 : vector<128x768xf32> to vector<8x16x768xf32>
    %c0_4 = arith.constant 0 : index
    %c0_5 = arith.constant 0 : index
    %c0_6 = arith.constant 0 : index
    %7 = vector.load %arg3[%c0_4, %c0_5, %c0_6] : memref<8x1x768xf32, #tpu.memory_space<vmem>>, vector<8x1x768xf32>
    %8 = vector.broadcast %7 : vector<8x1x768xf32> to vector<8x16x768xf32>
    %9 = arith.mulf %6, %8 : vector<8x16x768xf32>
    %cst_7 = arith.constant dense<0.000000e+00> : vector<8x16xf32>
    %10 = vector.multi_reduction <add>, %9, %cst_7 [2] : vector<8x16x768xf32> to vector<8x16xf32>
    %11 = vector.shape_cast %10 : vector<8x16xf32> to vector<8x16x1xf32>
    %cst_8 = arith.constant dense<0xFF800000> : vector<8x1xf32>
    %12 = vector.multi_reduction <maximumf>, %11, %cst_8 [1] : vector<8x16x1xf32> to vector<8x1xf32>
    %13 = vector.shape_cast %12 : vector<8x1xf32> to vector<8x1x1xf32>
    %14 = vector.broadcast %13 : vector<8x1x1xf32> to vector<8x16x1xf32>
    %15 = arith.subf %11, %14 : vector<8x16x1xf32>
    %16 = math.exp %15 : vector<8x16x1xf32>
    %cst_9 = arith.constant dense<0.000000e+00> : vector<8x1xf32>
    %17 = vector.multi_reduction <add>, %16, %cst_9 [1] : vector<8x16x1xf32> to vector<8x1xf32>
    %18 = vector.shape_cast %17 : vector<8x1xf32> to vector<8x1x1xf32>
    %19 = vector.broadcast %18 : vector<8x1x1xf32> to vector<8x16x1xf32>
    %20 = arith.divf %16, %19 : vector<8x16x1xf32>
    %21 = vector.broadcast %20 : vector<8x16x1xf32> to vector<8x16x768xf32>
    %22 = arith.mulf %21, %6 : vector<8x16x768xf32>
    %cst_10 = arith.constant dense<0.000000e+00> : vector<8x768xf32>
    %23 = vector.multi_reduction <add>, %22, %cst_10 [1] : vector<8x16x768xf32> to vector<8x768xf32>
    %24 = vector.shape_cast %23 : vector<8x768xf32> to vector<8x1x768xf32>
    %c0_11 = arith.constant 0 : index
    %c0_12 = arith.constant 0 : index
    %c0_13 = arith.constant 0 : index
    %25 = vector.load %arg4[%c0_11, %c0_12, %c0_13] : memref<1x1x768xf32, #tpu.memory_space<vmem>>, vector<1x1x768xf32>
    %26 = vector.broadcast %25 : vector<1x1x768xf32> to vector<8x1x768xf32>
    %27 = arith.addf %24, %26 : vector<8x1x768xf32>
    %c0_14 = arith.constant 0 : index
    %c0_15 = arith.constant 0 : index
    %c0_16 = arith.constant 0 : index
    %28 = vector.load %arg5[%c0_14, %c0_15, %c0_16] : memref<8x1x768xf32, #tpu.memory_space<vmem>>, vector<8x1x768xf32>
    tpu.vector_store %arg5[%c0_14, %c0_15, %c0_16], %27 {strides = array<i32>} : memref<8x1x768xf32, #tpu.memory_space<vmem>>, vector<8x1x768xf32>,
    return
  }
  func.func @transform_0(%arg0: i32) -> (i32, i32, i32) {
    %c0_i32 = arith.constant 0 : i32
    %c0_i32_0 = arith.constant 0 : i32
    %c0_i32_1 = arith.constant 0 : i32
    return %arg0, %c0_i32, %c0_i32_0 : i32, i32, i32
  }
  func.func @transform_1(%arg0: i32) -> (i32, i32) {
    %c0_i32 = arith.constant 0 : i32
    %c0_i32_0 = arith.constant 0 : i32
    %c0_i32_1 = arith.constant 0 : i32
    return %c0_i32, %c0_i32_0 : i32, i32
  }
  func.func @transform_2(%arg0: i32) -> (i32, i32, i32) {
    %c0_i32 = arith.constant 0 : i32
    %c0_i32_0 = arith.constant 0 : i32
    %c0_i32_1 = arith.constant 0 : i32
    return %arg0, %c0_i32, %c0_i32_0 : i32, i32, i32
  }
  func.func @transform_3(%arg0: i32) -> (i32, i32, i32) {
    %c0_i32 = arith.constant 0 : i32
    %c0_i32_0 = arith.constant 0 : i32
    %c0_i32_1 = arith.constant 0 : i32
    %c0_i32_2 = arith.constant 0 : i32
    return %c0_i32, %c0_i32_0, %c0_i32_1 : i32, i32, i32
  }
  func.func @transform_4(%arg0: i32) -> (i32, i32, i32) {
    %c0_i32 = arith.constant 0 : i32
    %c0_i32_0 = arith.constant 0 : i32
    %c0_i32_1 = arith.constant 0 : i32
    return %arg0, %c0_i32, %c0_i32_0 : i32, i32, i32
  }
}

</mosaic_0001>

<bundles_post_ra>
// kernel: seq2seq_attention.1
= control target key start
LH: loop header
LB: loop body
LE: loop exit
PB: predicated region body
PF: predicated region fallthrough
CT: control target
= control target key end

     0   :  { %9 = vsyncpa [#allocation3], 0  ;;  %s5295_s0 = inlined_call_operand.hbm [shape: f32[8,16,700], index: 0, kind: input, shape index: {}]   ;;  %s5296_s1 = inlined_call_operand.hbm [shape: f32[700,768], index: 1, kind: input, shape index: {}]   ;;  %s5297_s2 = inlined_call_operand.vmem [shape: f32[8,1,768], index: 2, kind: input, shape index: {}]   ;;  %s5298_s3 = inlined_call_operand.vmem [shape: f32[1,1,768], index: 3, kind: input, shape index: {}]   ;;  %s5299_s4 = inlined_call_operand.vmem [shape: f32[8,1,768], index: 4, kind: output, shape index: {}]  }
   0x1   :  { %10 = vsyncpa [#allocation5], 0  ;;  %s3941_s15 = smov [#allocation2]   ;;  %s3893_s19 = scalar_lea.hbm %s5295_s0, 12288 }
   0x2   :  { %s16_s16 = sshll.u32 %s3941_s15, 4  ;;  %p3894_p0 = scmp.ne.s32.totalorder %s5295_s0, %s3893_s19  ;;  %s17_s16 = int_to_ptr.vmem [resolvable:$true] %s16_s16 }
   0x3   :  { %p3897_p1 = scmp.lt.u32.totalorder %s3893_s19, %s5295_s0 }
   0x5   :  { %p3899_p2 = pnand %p3897_p1, %p3894_p0 }
   0x7   :  { %3902 = shalt.err (!%p3899_p2)
}
   0x8   :  { %s3903_s24 = scalar_lea.vmem %s17_s16, 12288  ;;  %p3908_p4 = scmp.lt.s32.totalorder %s17_s16, %s17_s16 }
   0x9   :  { %p3904_p3 = scmp.ne.s32.totalorder %s17_s16, %s3903_s24  ;;  %p3909_p5 = scmp.lt.s32.totalorder %s3903_s24, %s3903_s24 }
   0xb   :  { %p3910_p6 = por %p3909_p5, %p3908_p4 }
   0xd   :  { %p3911_p7 = pnand %p3910_p6, %p3904_p3 }
   0xf   :  { %3914 = shalt.err (!%p3911_p7)
}
  0x10   :  { %s3942_s25 = smov 768   ;;  %s3943_s26 = smov 48  }
  0x11   :  { %22 = dma.hbm_to_vmem [thread:$0]  %s5295_s0, 12288, %s17_s16, [#allocation3], %s3942_s25, %s3942_s25, %s3943_s26  }
  0x12   :  { %s3944_s29 = smov [#allocation4]   ;;  %s3915_s7 = scalar_lea.hbm %s5296_s1, 67584 }
  0x13   :  { %s28_s30 = sshll.u32 %s3944_s29, 4  ;;  %p3916_p8 = scmp.ne.s32.totalorder %s5296_s1, %s3915_s7  ;;  %s29_s30 = int_to_ptr.vmem [resolvable:$true] %s28_s30 }
  0x14   :  { %p3919_p9 = scmp.lt.u32.totalorder %s3915_s7, %s5296_s1 }
  0x16   :  { %p3921_p10 = pnand %p3919_p9, %p3916_p8 }
  0x18   :  { %3924 = shalt.err (!%p3921_p10)
}
  0x19   :  { %s3925_s12 = scalar_lea.vmem %s29_s30, 67584  ;;  %p3930_p12 = scmp.lt.s32.totalorder %s29_s30, %s29_s30 }
  0x1a   :  { %p3926_p11 = scmp.ne.s32.totalorder %s29_s30, %s3925_s12  ;;  %p3931_p13 = scmp.lt.s32.totalorder %s3925_s12, %s3925_s12 }
  0x1c   :  { %p3932_p0 = por %p3931_p13, %p3930_p12 }
  0x1e   :  { %p3933_p1 = pnand %p3932_p0, %p3926_p11 }
  0x20   :  { %3936 = shalt.err (!%p3933_p1)
}
  0x21   :  { %34 = dma.hbm_to_vmem [thread:$0]  %s5296_s1, 67584, %s29_s30, [#allocation5], %s3942_s25, %s3942_s25, %s3943_s26  }
  0x22   :  { %3937 = dma.done.wait [#allocation3], 12288  }
  0x23   :  { %3938 = vsyncadd [#allocation3], 4294955008 }
  0x24   :  { %3939 = dma.done.wait [#allocation5], 67584  }
  0x25   :  { %3940 = vsyncadd [#allocation5], 4294899712  ;;  %v191_v0 = vld [vmem:[#allocation4 + $0x8] sm:$0xff]  ;;  %v197_v1 = vld [vmem:[#allocation4 + $0x38] sm:$0xff]  ;;  %vm1007_vm0 = vcmask 1045504   ;;  %vm982_vm1 = vcmask 490496  }
  0x26   :  { %v383_v2 = vld [vmem:[#allocation4 + $0x608] sm:$0xff]  ;;  %v719_v3 = vpack.c.bf16 %v197_v1, %v191_v0  ;;  %v389_v4 = vld [vmem:[#allocation4 + $0x638] sm:$0xff]  ;;  %v190_v5 = vld [vmem:[#allocation4] sm:$0xff] }
  0x27   :  { %v196_v6 = vld [vmem:[#allocation4 + $0x30] sm:$0xff]  ;;  %v815_v7 = vpack.c.bf16 %v389_v4, %v383_v2  ;;  %v382_v9 = vld [vmem:[#allocation4 + $0x600] sm:$0xff]  ;;  %v203_v11 = vld [vmem:[#allocation4 + $0x68] sm:$0xff] }
  0x28   :  { %v718_v8 = vpack.c.bf16 %v196_v6, %v190_v5  ;;  %v388_v10 = vld [vmem:[#allocation4 + $0x630] sm:$0xff]  ;;  %1026 = vmatprep.subr.bf16.mxu1 %v719_v3  ;;  %v209_v13 = vld [vmem:[#allocation4 + $0x98] sm:$0xff]  ;;  %v395_v14 = vld [vmem:[#allocation4 + $0x668] sm:$0xff] }
  0x29   :  { %v814_v12 = vpack.c.bf16 %v388_v10, %v382_v9  ;;  %v401_v15 = vld [vmem:[#allocation4 + $0x698] sm:$0xff]  ;;  %1139 = vmatprep.subr.bf16.mxu0 %v815_v7  ;;  %v725_v16 = vpack.c.bf16 %v209_v13, %v203_v11  ;;  %v202_v18 = vld [vmem:[#allocation4 + $0x60] sm:$0xff]  ;;  %v208_v19 = vld [vmem:[#allocation4 + $0x90] sm:$0xff] }
  0x2a   :  { %1027 = vmatpush1.bf16.msra.mxu1 %v718_v8  ;;  %v821_v17 = vpack.c.bf16 %v401_v15, %v395_v14  ;;  %v394_v20 = vld [vmem:[#allocation4 + $0x660] sm:$0xff]  ;;  %v724_v21 = vpack.c.bf16 %v208_v19, %v202_v18  ;;  %v400_v22 = vld [vmem:[#allocation4 + $0x690] sm:$0xff]  ;;  %v215_v23 = vld [vmem:[#allocation4 + $0xc8] sm:$0xff] }
  0x2b   :  { %1140 = vmatpush1.bf16.msra.mxu0 %v814_v12  ;;  %v221_v24 = vld [vmem:[#allocation4 + $0xf8] sm:$0xff]  ;;  %1028 = vmatprep.subr.bf16.mxu1 %v725_v16  ;;  %v820_v25 = vpack.c.bf16 %v400_v22, %v394_v20  ;;  %v407_v27 = vld [vmem:[#allocation4 + $0x6c8] sm:$0xff]  ;;  %v214_v29 = vld [vmem:[#allocation4 + $0xc0] sm:$0xff] }
  0x2c   :  { %1141 = vmatprep.subr.bf16.mxu0 %v821_v17  ;;  %v731_v26 = vpack.c.bf16 %v221_v24, %v215_v23  ;;  %v413_v28 = vld [vmem:[#allocation4 + $0x6f8] sm:$0xff]  ;;  %v220_v31 = vld [vmem:[#allocation4 + $0xf0] sm:$0xff]  ;;  %v406_v32 = vld [vmem:[#allocation4 + $0x6c0] sm:$0xff] }
  0x2d   :  { %v827_v30 = vpack.c.bf16 %v413_v28, %v407_v27  ;;  %v412_v33 = vld [vmem:[#allocation4 + $0x6f0] sm:$0xff]  ;;  %v730_v34 = vpack.c.bf16 %v220_v31, %v214_v29  ;;  %v227_v35 = vld [vmem:[#allocation4 + $0x128] sm:$0xff]  ;;  %v233_v36 = vld [vmem:[#allocation4 + $0x158] sm:$0xff] }
  0x2e   :  { %1029 = vmatpush1.bf16.msra.mxu1 %v724_v21  ;;  %v419_v37 = vld [vmem:[#allocation4 + $0x728] sm:$0xff]  ;;  %v826_v38 = vpack.c.bf16 %v412_v33, %v406_v32  ;;  %v737_v39 = vpack.c.bf16 %v233_v36, %v227_v35  ;;  %v425_v40 = vld [vmem:[#allocation4 + $0x758] sm:$0xff]  ;;  %v226_v41 = vld [vmem:[#allocation4 + $0x120] sm:$0xff] }
  0x2f   :  { %1142 = vmatpush1.bf16.msra.mxu0 %v820_v25  ;;  %1030 = vmatprep.subr.bf16.mxu1 %v731_v26  ;;  %v232_v42 = vld [vmem:[#allocation4 + $0x150] sm:$0xff]  ;;  %v833_v43 = vpack.c.bf16 %v425_v40, %v419_v37  ;;  %v418_v44 = vld [vmem:[#allocation4 + $0x720] sm:$0xff]  ;;  %v239_v46 = vld [vmem:[#allocation4 + $0x188] sm:$0xff] }
  0x30   :  { %1143 = vmatprep.subr.bf16.mxu0 %v827_v30  ;;  %v424_v45 = vld [vmem:[#allocation4 + $0x750] sm:$0xff]  ;;  %v245_v47 = vld [vmem:[#allocation4 + $0x1b8] sm:$0xff]  ;;  %v431_v48 = vld [vmem:[#allocation4 + $0x788] sm:$0xff]  ;;  %v736_v50 = vpack.c.bf16 %v232_v42, %v226_v41 }
  0x31   :  { %v437_v49 = vld [vmem:[#allocation4 + $0x7b8] sm:$0xff]  ;;  %v832_v51 = vpack.c.bf16 %v424_v45, %v418_v44  ;;  %v743_v52 = vpack.c.bf16 %v245_v47, %v239_v46  ;;  %v238_v53 = vld [vmem:[#allocation4 + $0x180] sm:$0xff]  ;;  %v244_v54 = vld [vmem:[#allocation4 + $0x1b0] sm:$0xff] }
  0x32   :  { %1031 = vmatpush1.bf16.msra.mxu1 %v730_v34  ;;  %v430_v55 = vld [vmem:[#allocation4 + $0x780] sm:$0xff]  ;;  %v839_v56 = vpack.c.bf16 %v437_v49, %v431_v48  ;;  %v436_v57 = vld [vmem:[#allocation4 + $0x7b0] sm:$0xff]  ;;  %v251_v58 = vld [vmem:[#allocation4 + $0x1e8] sm:$0xff]  ;;  %v742_v62 = vpack.c.bf16 %v244_v54, %v238_v53 }
  0x33   :  { %1144 = vmatpush1.bf16.msra.mxu0 %v826_v38  ;;  %1032 = vmatprep.subr.bf16.mxu1 %v737_v39  ;;  %v257_v59 = vld [vmem:[#allocation4 + $0x218] sm:$0xff]  ;;  %v443_v60 = vld [vmem:[#allocation4 + $0x7e8] sm:$0xff]  ;;  %v838_v63 = vpack.c.bf16 %v436_v57, %v430_v55  ;;  %v250_v1 = vld [vmem:[#allocation4 + $0x1e0] sm:$0xff] }
  0x34   :  { %1145 = vmatprep.subr.bf16.mxu0 %v833_v43  ;;  %v449_v61 = vld [vmem:[#allocation4 + $0x818] sm:$0xff]  ;;  %v749_v0 = vpack.c.bf16 %v257_v59, %v251_v58  ;;  %v256_v2 = vld [vmem:[#allocation4 + $0x210] sm:$0xff]  ;;  %v442_v3 = vld [vmem:[#allocation4 + $0x7e0] sm:$0xff] }
  0x35   :  { %v845_v4 = vpack.c.bf16 %v449_v61, %v443_v60  ;;  %v448_v5 = vld [vmem:[#allocation4 + $0x810] sm:$0xff]  ;;  %v263_v6 = vld [vmem:[#allocation4 + $0x248] sm:$0xff]  ;;  %v269_v7 = vld [vmem:[#allocation4 + $0x278] sm:$0xff]  ;;  %v748_v10 = vpack.c.bf16 %v256_v2, %v250_v1 }
  0x36   :  { %1033 = vmatpush1.bf16.msra.mxu1 %v736_v50  ;;  %v455_v8 = vld [vmem:[#allocation4 + $0x848] sm:$0xff]  ;;  %v461_v9 = vld [vmem:[#allocation4 + $0x878] sm:$0xff]  ;;  %v844_v11 = vpack.c.bf16 %v448_v5, %v442_v3  ;;  %v755_v12 = vpack.c.bf16 %v269_v7, %v263_v6  ;;  %v262_v13 = vld [vmem:[#allocation4 + $0x240] sm:$0xff] }
  0x37   :  { %1146 = vmatpush1.bf16.msra.mxu0 %v832_v51  ;;  %1034 = vmatprep.subr.bf16.mxu1 %v743_v52  ;;  %v268_v14 = vld [vmem:[#allocation4 + $0x270] sm:$0xff]  ;;  %v454_v15 = vld [vmem:[#allocation4 + $0x840] sm:$0xff]  ;;  %v851_v16 = vpack.c.bf16 %v461_v9, %v455_v8  ;;  %v275_v18 = vld [vmem:[#allocation4 + $0x2a8] sm:$0xff] }
  0x38   :  { %1147 = vmatprep.subr.bf16.mxu0 %v839_v56  ;;  %v460_v17 = vld [vmem:[#allocation4 + $0x870] sm:$0xff]  ;;  %v281_v19 = vld [vmem:[#allocation4 + $0x2d8] sm:$0xff]  ;;  %v467_v20 = vld [vmem:[#allocation4 + $0x8a8] sm:$0xff]  ;;  %v754_v22 = vpack.c.bf16 %v268_v14, %v262_v13 }
  0x39   :  { %v473_v21 = vld [vmem:[#allocation4 + $0x8d8] sm:$0xff]  ;;  %v850_v23 = vpack.c.bf16 %v460_v17, %v454_v15  ;;  %v761_v24 = vpack.c.bf16 %v281_v19, %v275_v18  ;;  %v274_v25 = vld [vmem:[#allocation4 + $0x2a0] sm:$0xff]  ;;  %v280_v26 = vld [vmem:[#allocation4 + $0x2d0] sm:$0xff] }
  0x3a   :  { %1035 = vmatpush1.bf16.msra.mxu1 %v742_v62  ;;  %v466_v27 = vld [vmem:[#allocation4 + $0x8a0] sm:$0xff]  ;;  %v857_v28 = vpack.c.bf16 %v473_v21, %v467_v20  ;;  %v472_v29 = vld [vmem:[#allocation4 + $0x8d0] sm:$0xff]  ;;  %v287_v30 = vld [vmem:[#allocation4 + $0x308] sm:$0xff]  ;;  %v760_v34 = vpack.c.bf16 %v280_v26, %v274_v25 }
  0x3b   :  { %1148 = vmatpush1.bf16.msra.mxu0 %v838_v63  ;;  %1036 = vmatprep.subr.bf16.mxu1 %v749_v0  ;;  %v293_v31 = vld [vmem:[#allocation4 + $0x338] sm:$0xff]  ;;  %v479_v32 = vld [vmem:[#allocation4 + $0x908] sm:$0xff]  ;;  %v856_v35 = vpack.c.bf16 %v472_v29, %v466_v27  ;;  %v286_v37 = vld [vmem:[#allocation4 + $0x300] sm:$0xff] }
  0x3c   :  { %1149 = vmatprep.subr.bf16.mxu0 %v845_v4  ;;  %v485_v33 = vld [vmem:[#allocation4 + $0x938] sm:$0xff]  ;;  %v767_v36 = vpack.c.bf16 %v293_v31, %v287_v30  ;;  %v292_v38 = vld [vmem:[#allocation4 + $0x330] sm:$0xff]  ;;  %v478_v39 = vld [vmem:[#allocation4 + $0x900] sm:$0xff] }
  0x3d   :  { %v863_v40 = vpack.c.bf16 %v485_v33, %v479_v32  ;;  %v484_v41 = vld [vmem:[#allocation4 + $0x930] sm:$0xff]  ;;  %v299_v42 = vld [vmem:[#allocation4 + $0x368] sm:$0xff]  ;;  %v305_v43 = vld [vmem:[#allocation4 + $0x398] sm:$0xff]  ;;  %v766_v46 = vpack.c.bf16 %v292_v38, %v286_v37 }
  0x3e   :  { %1037 = vmatpush1.bf16.msra.mxu1 %v748_v10  ;;  %v491_v44 = vld [vmem:[#allocation4 + $0x968] sm:$0xff]  ;;  %v497_v45 = vld [vmem:[#allocation4 + $0x998] sm:$0xff]  ;;  %v862_v47 = vpack.c.bf16 %v484_v41, %v478_v39  ;;  %v773_v48 = vpack.c.bf16 %v305_v43, %v299_v42  ;;  %v298_v49 = vld [vmem:[#allocation4 + $0x360] sm:$0xff] }
  0x3f   :  { %1150 = vmatpush1.bf16.msra.mxu0 %v844_v11  ;;  %1038 = vmatprep.subr.bf16.mxu1 %v755_v12  ;;  %v304_v50 = vld [vmem:[#allocation4 + $0x390] sm:$0xff]  ;;  %v490_v51 = vld [vmem:[#allocation4 + $0x960] sm:$0xff]  ;;  %v869_v52 = vpack.c.bf16 %v497_v45, %v491_v44  ;;  %v311_v54 = vld [vmem:[#allocation4 + $0x3c8] sm:$0xff] }
  0x40   :  { %1151 = vmatprep.subr.bf16.mxu0 %v851_v16  ;;  %v496_v53 = vld [vmem:[#allocation4 + $0x990] sm:$0xff]  ;;  %v317_v55 = vld [vmem:[#allocation4 + $0x3f8] sm:$0xff]  ;;  %v503_v56 = vld [vmem:[#allocation4 + $0x9c8] sm:$0xff]  ;;  %v772_v58 = vpack.c.bf16 %v304_v50, %v298_v49 }
  0x41   :  { %v509_v57 = vld [vmem:[#allocation4 + $0x9f8] sm:$0xff]  ;;  %v868_v59 = vpack.c.bf16 %v496_v53, %v490_v51  ;;  %v779_v60 = vpack.c.bf16 %v317_v55, %v311_v54  ;;  %v310_v61 = vld [vmem:[#allocation4 + $0x3c0] sm:$0xff]  ;;  %v316_v62 = vld [vmem:[#allocation4 + $0x3f0] sm:$0xff] }
  0x42   :  { %1039 = vmatpush1.bf16.msra.mxu1 %v754_v22  ;;  %v502_v63 = vld [vmem:[#allocation4 + $0x9c0] sm:$0xff]  ;;  %v875_v0 = vpack.c.bf16 %v509_v57, %v503_v56  ;;  %v508_v1 = vld [vmem:[#allocation4 + $0x9f0] sm:$0xff]  ;;  %v323_v2 = vld [vmem:[#allocation4 + $0x428] sm:$0xff]  ;;  %v778_v6 = vpack.c.bf16 %v316_v62, %v310_v61 }
  0x43   :  { %1152 = vmatpush1.bf16.msra.mxu0 %v850_v23  ;;  %1040 = vmatprep.subr.bf16.mxu1 %v761_v24  ;;  %v329_v3 = vld [vmem:[#allocation4 + $0x458] sm:$0xff]  ;;  %v515_v4 = vld [vmem:[#allocation4 + $0xa28] sm:$0xff]  ;;  %v322_v7 = vld [vmem:[#allocation4 + $0x420] sm:$0xff]  ;;  %v874_v10 = vpack.c.bf16 %v508_v1, %v502_v63 }
  0x44   :  { %1153 = vmatprep.subr.bf16.mxu0 %v857_v28  ;;  %v521_v5 = vld [vmem:[#allocation4 + $0xa58] sm:$0xff]  ;;  %v328_v8 = vld [vmem:[#allocation4 + $0x450] sm:$0xff]  ;;  %v514_v9 = vld [vmem:[#allocation4 + $0xa20] sm:$0xff]  ;;  %v785_v11 = vpack.c.bf16 %v329_v3, %v323_v2 }
  0x45   :  { %v520_v12 = vld [vmem:[#allocation4 + $0xa50] sm:$0xff]  ;;  %v335_v13 = vld [vmem:[#allocation4 + $0x488] sm:$0xff]  ;;  %v341_v14 = vld [vmem:[#allocation4 + $0x4b8] sm:$0xff]  ;;  %v881_v15 = vpack.c.bf16 %v521_v5, %v515_v4  ;;  %v784_v22 = vpack.c.bf16 %v328_v8, %v322_v7 }
  0x46   :  { %1041 = vmatpush1.bf16.msra.mxu1 %v760_v34  ;;  %v527_v16 = vld [vmem:[#allocation4 + $0xa88] sm:$0xff]  ;;  %v533_v17 = vld [vmem:[#allocation4 + $0xab8] sm:$0xff]  ;;  %v880_v25 = vpack.c.bf16 %v520_v12, %v514_v9  ;;  %v791_v26 = vpack.c.bf16 %v341_v14, %v335_v13  ;;  %v334_v27 = vld [vmem:[#allocation4 + $0x480] sm:$0xff] }
  0x47   :  { %1154 = vmatpush1.bf16.msra.mxu0 %v856_v35  ;;  %1042 = vmatprep.subr.bf16.mxu1 %v767_v36  ;;  %v47_v18 = vld [vmem:[#allocation2 + $0x8] sm:$0xff]  ;;  %v53_v19 = vld [vmem:[#allocation2 + $0x38] sm:$0xff]  ;;  %v340_v28 = vld [vmem:[#allocation4 + $0x4b0] sm:$0xff]  ;;  %v887_v30 = vpack.c.bf16 %v533_v17, %v527_v16 }
  0x48   :  { %1155 = vmatprep.subr.bf16.mxu0 %v863_v40  ;;  %v49_v20 = vld [vmem:[#allocation2 + $0x18] sm:$0xff]  ;;  %v55_v21 = vld [vmem:[#allocation2 + $0x48] sm:$0xff]  ;;  %v3995_v23 = vpack.c.bf16 %v53_v19, %v47_v18  ;;  %v526_v29 = vld [vmem:[#allocation4 + $0xa80] sm:$0xff]  ;;  %v790_v36 = vpack.c.bf16 %v340_v28, %v334_v27 }
  0x49   :  { %v3997_v24 = vpack.c.bf16 %v55_v21, %v49_v20  ;;  %v532_v31 = vld [vmem:[#allocation4 + $0xab0] sm:$0xff]  ;;  %v347_v32 = vld [vmem:[#allocation4 + $0x4e8] sm:$0xff]  ;;  %v353_v33 = vld [vmem:[#allocation4 + $0x518] sm:$0xff] }
  0x4a   :  { %1043 = vmatpush1.bf16.msra.mxu1 %v766_v46  ;;  %1058 = vmatprep.mubr.bf16.mxu1 %v3995_v23  ;;  %v539_v34 = vld [vmem:[#allocation4 + $0xae8] sm:$0xff]  ;;  %v545_v35 = vld [vmem:[#allocation4 + $0xb18] sm:$0xff]  ;;  %v886_v37 = vpack.c.bf16 %v532_v31, %v526_v29  ;;  %v797_v38 = vpack.c.bf16 %v353_v33, %v347_v32  ;;  %v346_v39 = vld [vmem:[#allocation4 + $0x4e0] sm:$0xff] }
  0x4b   :  { %1156 = vmatpush1.bf16.msra.mxu0 %v862_v47  ;;  %1044 = vmatprep.subr.bf16.mxu1 %v773_v48  ;;  %v352_v40 = vld [vmem:[#allocation4 + $0x510] sm:$0xff]  ;;  %v538_v41 = vld [vmem:[#allocation4 + $0xae0] sm:$0xff]  ;;  %v893_v42 = vpack.c.bf16 %v545_v35, %v539_v34  ;;  %v359_v44 = vld [vmem:[#allocation4 + $0x548] sm:$0xff] }
  0x4c   :  { %1157 = vmatprep.subr.bf16.mxu0 %v869_v52  ;;  %1171 = vmatprep.mubr.bf16.mxu0 %v3997_v24  ;;  %v544_v43 = vld [vmem:[#allocation4 + $0xb10] sm:$0xff]  ;;  %v365_v45 = vld [vmem:[#allocation4 + $0x578] sm:$0xff]  ;;  %v551_v46 = vld [vmem:[#allocation4 + $0xb48] sm:$0xff]  ;;  %v796_v48 = vpack.c.bf16 %v352_v40, %v346_v39 }
  0x4d   :  { %v557_v47 = vld [vmem:[#allocation4 + $0xb78] sm:$0xff]  ;;  %v892_v49 = vpack.c.bf16 %v544_v43, %v538_v41  ;;  %v803_v50 = vpack.c.bf16 %v365_v45, %v359_v44  ;;  %v358_v51 = vld [vmem:[#allocation4 + $0x540] sm:$0xff]  ;;  %v364_v52 = vld [vmem:[#allocation4 + $0x570] sm:$0xff] }
  0x4e   :  { %1045 = vmatpush1.bf16.msra.mxu1 %v772_v58  ;;  %v550_v53 = vld [vmem:[#allocation4 + $0xb40] sm:$0xff]  ;;  %v899_v54 = vpack.c.bf16 %v557_v47, %v551_v46  ;;  %v556_v55 = vld [vmem:[#allocation4 + $0xb70] sm:$0xff]  ;;  %v371_v56 = vld [vmem:[#allocation4 + $0x5a8] sm:$0xff] }
  0x4f   :  { %1158 = vmatpush1.bf16.msra.mxu0 %v868_v59  ;;  %1046 = vmatprep.subr.bf16.mxu1 %v779_v60  ;;  %v377_v57 = vld [vmem:[#allocation4 + $0x5d8] sm:$0xff]  ;;  %v563_v58 = vld [vmem:[#allocation4 + $0xba8] sm:$0xff]  ;;  %v802_v60 = vpack.c.bf16 %v364_v52, %v358_v51  ;;  %v370_v61 = vld [vmem:[#allocation4 + $0x5a0] sm:$0xff]  ;;  %v898_v62 = vpack.c.bf16 %v556_v55, %v550_v53 }
  0x50   :  { %1159 = vmatprep.subr.bf16.mxu0 %v875_v0  ;;  %v569_v59 = vld [vmem:[#allocation4 + $0xbd8] sm:$0xff]  ;;  %v809_v63 = vpack.c.bf16 %v377_v57, %v371_v56  ;;  %v376_v0 = vld [vmem:[#allocation4 + $0x5d0] sm:$0xff]  ;;  %v562_v1 = vld [vmem:[#allocation4 + $0xba0] sm:$0xff] }
  0x51   :  { %v568_v2 = vld [vmem:[#allocation4 + $0xbd0] sm:$0xff]  ;;  %v905_v3 = vpack.c.bf16 %v569_v59, %v563_v58  ;;  %v46_v4 = vld [vmem:[#allocation2] sm:$0xff]  ;;  %v193_v5 = vld [vmem:[#allocation4 + $0x18] sm:$0xff] }
  0x52   :  { %1047 = vmatpush1.bf16.msra.mxu1 %v778_v6  ;;  %v199_v6 = vld [vmem:[#allocation4 + $0x48] sm:$0xff]  ;;  %v52_v7 = vld [vmem:[#allocation2 + $0x30] sm:$0xff]  ;;  %v581_v9 = vld [vmem:[#allocation4 + $0xc38] sm:$0xff]  ;;  %v904_v14 = vpack.c.bf16 %v568_v2, %v562_v1 }
  0x53   :  { %1160 = vmatpush1.bf16.msra.mxu0 %v874_v10  ;;  %1048 = vmatprep.subr.bf16.mxu1 %v785_v11  ;;  %v575_v8 = vld [vmem:[#allocation4 + $0xc08] sm:$0xff]  ;;  %v808_v10 = vpack.c.bf16 %v376_v0, %v370_v61  ;;  %v48_v11 = vld [vmem:[#allocation2 + $0x10] sm:$0xff]  ;;  %v54_v12 = vld [vmem:[#allocation2 + $0x40] sm:$0xff] }
  0x54   :  { %1161 = vmatprep.subr.bf16.mxu0 %v881_v15  ;;  %v574_v13 = vld [vmem:[#allocation4 + $0xc00] sm:$0xff]  ;;  %v721_v15 = vpack.c.bf16 %v199_v6, %v193_v5  ;;  %v580_v16 = vld [vmem:[#allocation4 + $0xc30] sm:$0xff]  ;;  %v911_v19 = vpack.c.bf16 %v581_v9, %v575_v8  ;;  %v205_v20 = vld [vmem:[#allocation4 + $0x78] sm:$0xff]  ;;  %v4003_v29 = vpack.c.bf16 %v54_v12, %v48_v11 }
  0x55   :  { %v192_v17 = vld [vmem:[#allocation4 + $0x10] sm:$0xff]  ;;  %v198_v18 = vld [vmem:[#allocation4 + $0x40] sm:$0xff]  ;;  %v211_v21 = vld [vmem:[#allocation4 + $0xa8] sm:$0xff]  ;;  %v910_v34 = vpack.c.bf16 %v580_v16, %v574_v13 }
  0x56   :  { %1049 = vmatpush1.bf16.msra.mxu1 %v784_v22  ;;  %v587_v22 = vld [vmem:[#allocation4 + $0xc68] sm:$0xff]  ;;  %v65_v28 = vld [vmem:[#allocation2 + $0x98] sm:$0xff]  ;;  %v204_v31 = vld [vmem:[#allocation4 + $0x70] sm:$0xff]  ;;  %v727_v35 = vpack.c.bf16 %v211_v21, %v205_v20 }
  0x57   :  { %1162 = vmatpush1.bf16.msra.mxu0 %v880_v25  ;;  %1050 = vmatprep.subr.bf16.mxu1 %v791_v26  ;;  %v4001_v25 = vpack.c.bf16 %v52_v7, %v46_v4  ;;  %v593_v26 = vld [vmem:[#allocation4 + $0xc98] sm:$0xff]  ;;  %v59_v27 = vld [vmem:[#allocation2 + $0x68] sm:$0xff]  ;;  %v58_v41 = vld [vmem:[#allocation2 + $0x60] sm:$0xff] }
  0x58   :  { %1163 = vmatprep.subr.bf16.mxu0 %v887_v30  ;;  %v720_v30 = vpack.c.bf16 %v198_v18, %v192_v17  ;;  %v61_v32 = vld [vmem:[#allocation2 + $0x78] sm:$0xff]  ;;  %v67_v33 = vld [vmem:[#allocation2 + $0xa8] sm:$0xff]  ;;  %v917_v39 = vpack.c.bf16 %v593_v26, %v587_v22  ;;  %v4005_v40 = vpack.c.bf16 %v65_v28, %v59_v27  ;;  %v64_v45 = vld [vmem:[#allocation2 + $0x90] sm:$0xff] }
  0x59   :  { %v223_v43 = vld [vmem:[#allocation4 + $0x108] sm:$0xff]  ;;  %v4008_v44 = vpack.c.bf16 %v67_v33, %v61_v32  ;;  %v605_v47 = vld [vmem:[#allocation4 + $0xcf8] sm:$0xff]  ;;  %v216_v51 = vld [vmem:[#allocation4 + $0xd0] sm:$0xff]  ;;  %v4013_v61 = vpack.c.bf16 %v64_v45, %v58_v41 }
  0x5a   :  { %1051 = vmatpush1.bf16.msra.mxu1 %v790_v36  ;;  %v210_v36 = vld [vmem:[#allocation4 + $0xa0] sm:$0xff]  ;;  %v599_v46 = vld [vmem:[#allocation4 + $0xcc8] sm:$0xff]  ;;  %v604_v56 = vld [vmem:[#allocation4 + $0xcf0] sm:$0xff] }
  0x5b   :  { %1164 = vmatpush1.bf16.msra.mxu0 %v886_v37  ;;  %1052 = vmatprep.subr.bf16.mxu1 %v797_v38  ;;  %v586_v37 = vld [vmem:[#allocation4 + $0xc60] sm:$0xff]  ;;  %v592_v38 = vld [vmem:[#allocation4 + $0xc90] sm:$0xff]  ;;  %v923_v57 = vpack.c.bf16 %v605_v47, %v599_v46  ;;  %v229_v58 = vld [vmem:[#allocation4 + $0x138] sm:$0xff] }
  0x5c   :  { %1165 = vmatprep.subr.bf16.mxu0 %v893_v42  ;;  %v217_v42 = vld [vmem:[#allocation4 + $0xd8] sm:$0xff]  ;;  %v916_v52 = vpack.c.bf16 %v592_v38, %v586_v37  ;;  %v598_v55 = vld [vmem:[#allocation4 + $0xcc0] sm:$0xff]  ;;  %v235_v59 = vld [vmem:[#allocation4 + $0x168] sm:$0xff] }
  0x5d   :  { %v733_v53 = vpack.c.bf16 %v223_v43, %v217_v42  ;;  %v79_v0 = vld [vmem:[#allocation2 + $0x108] sm:$0xff]  ;;  %v617_v4 = vld [vmem:[#allocation4 + $0xd58] sm:$0xff]  ;;  %v922_v5 = vpack.c.bf16 %v604_v56, %v598_v55  ;;  %v739_v6 = vpack.c.bf16 %v235_v59, %v229_v58  ;;  %v228_v7 = vld [vmem:[#allocation4 + $0x130] sm:$0xff] }
  0x5e   :  { %1053 = vmatpush1.bf16.msra.mxu1 %v796_v48  ;;  %v726_v48 = vpack.c.bf16 %v210_v36, %v204_v31  ;;  %v234_v8 = vld [vmem:[#allocation4 + $0x160] sm:$0xff]  ;;  %v241_v9 = vld [vmem:[#allocation4 + $0x198] sm:$0xff]  ;;  %v247_v13 = vld [vmem:[#allocation4 + $0x1c8] sm:$0xff] }
  0x5f   :  { %1166 = vmatpush1.bf16.msra.mxu0 %v892_v49  ;;  %1054 = vmatprep.subr.bf16.mxu1 %v803_v50  ;;  %v60_v49 = vld [vmem:[#allocation2 + $0x70] sm:$0xff]  ;;  %v66_v50 = vld [vmem:[#allocation2 + $0xa0] sm:$0xff]  ;;  %v623_v18 = vld [vmem:[#allocation4 + $0xd88] sm:$0xff]  ;;  %v738_v20 = vpack.c.bf16 %v234_v8, %v228_v7  ;;  %v745_v27 = vpack.c.bf16 %v247_v13, %v241_v9 }
  0x60   :  { %1167 = vmatprep.subr.bf16.mxu0 %v899_v54  ;;  %v222_v54 = vld [vmem:[#allocation4 + $0x100] sm:$0xff]  ;;  %v4015_v1 = vpack.c.bf16 %v66_v50, %v60_v49  ;;  %v76_v16 = vld [vmem:[#allocation2 + $0xf0] sm:$0xff]  ;;  %v253_v31 = vld [vmem:[#allocation4 + $0x1f8] sm:$0xff] }
  0x61   :  { %v732_v2 = vpack.c.bf16 %v222_v54, %v216_v51  ;;  %v70_v12 = vld [vmem:[#allocation2 + $0xc0] sm:$0xff]  ;;  %v72_v21 = vld [vmem:[#allocation2 + $0xd0] sm:$0xff]  ;;  %v259_v32 = vld [vmem:[#allocation4 + $0x228] sm:$0xff] }
  0x62   :  { %1055 = vmatpush1.bf16.msra.mxu1 %v802_v60  ;;  %v71_v60 = vld [vmem:[#allocation2 + $0xc8] sm:$0xff]  ;;  %v78_v22 = vld [vmem:[#allocation2 + $0x100] sm:$0xff]  ;;  %v240_v26 = vld [vmem:[#allocation4 + $0x190] sm:$0xff]  ;;  %v4025_v37 = vpack.c.bf16 %v76_v16, %v70_v12  ;;  %v751_v47 = vpack.c.bf16 %v259_v32, %v253_v31 }
  0x63   :  { %1168 = vmatpush1.bf16.msra.mxu0 %v898_v62  ;;  %1056 = vmatprep.subr.bf16.mxu1 %v809_v63  ;;  %v77_v62 = vld [vmem:[#allocation2 + $0xf8] sm:$0xff]  ;;  %v91_v38 = vld [vmem:[#allocation2 + $0x168] sm:$0xff]  ;;  %v628_v41 = vld [vmem:[#allocation4 + $0xdb0] sm:$0xff]  ;;  %v4027_v42 = vpack.c.bf16 %v78_v22, %v72_v21 }
  0x64   :  { %1169 = vmatprep.subr.bf16.mxu0 %v905_v3  ;;  %v73_v63 = vld [vmem:[#allocation2 + $0xd8] sm:$0xff]  ;;  %v611_v3 = vld [vmem:[#allocation4 + $0xd28] sm:$0xff]  ;;  %v258_v49 = vld [vmem:[#allocation4 + $0x220] sm:$0xff] }
  0x65   :  { %v4019_v11 = vpack.c.bf16 %v79_v0, %v73_v63  ;;  %v929_v17 = vpack.c.bf16 %v617_v4, %v611_v3  ;;  %v85_v36 = vld [vmem:[#allocation2 + $0x138] sm:$0xff]  ;;  %v635_v45 = vld [vmem:[#allocation4 + $0xde8] sm:$0xff]  ;;  %v88_v54 = vld [vmem:[#allocation2 + $0x150] sm:$0xff] }
  0x66   :  { %1057 = vmatpush1.bf16.msra.mxu1 %v808_v10  ;;  %v4017_v10 = vpack.c.bf16 %v77_v62, %v71_v60  ;;  %v641_v46 = vld [vmem:[#allocation4 + $0xe18] sm:$0xff]  ;;  %v4031_v51 = vpack.c.bf16 %v91_v38, %v85_v36  ;;  %v271_v56 = vld [vmem:[#allocation4 + $0x288] sm:$0xff]  ;;  %v90_v58 = vld [vmem:[#allocation2 + $0x160] sm:$0xff] }
  0x67   :  { %1170 = vmatpush1.bf16.msra.mxu0 %v904_v14  ;;  %1365 = vmatprep.subr.bf16.mxu1 %v721_v15  ;;  %v610_v14 = vld [vmem:[#allocation4 + $0xd20] sm:$0xff]  ;;  %v616_v15 = vld [vmem:[#allocation4 + $0xd50] sm:$0xff]  ;;  %v265_v55 = vld [vmem:[#allocation4 + $0x258] sm:$0xff]  ;;  %v941_v59 = vpack.c.bf16 %v641_v46, %v635_v45 }
  0x68   :  { %1252 = vmatprep.subr.bf16.mxu0 %v911_v19  ;;  %v629_v19 = vld [vmem:[#allocation4 + $0xdb8] sm:$0xff]  ;;  %v928_v28 = vpack.c.bf16 %v616_v15, %v610_v14  ;;  %v634_v60 = vld [vmem:[#allocation4 + $0xde0] sm:$0xff]  ;;  %v640_v62 = vld [vmem:[#allocation4 + $0xe10] sm:$0xff]  ;;  %v757_v4 = vpack.c.bf16 %v271_v56, %v265_v55 }
  0x69   :  { %1059 = vmatmul.mubr.bf16.vlgmr.msra.gmra.mrb[0].mxu1 %v4001_v25  ;;  %v935_v33 = vpack.c.bf16 %v629_v19, %v623_v18  ;;  %v264_v0 = vld [vmem:[#allocation4 + $0x250] sm:$0xff]  ;;  %v653_v3 = vld [vmem:[#allocation4 + $0xe78] sm:$0xff]  ;;  %v283_v7 = vld [vmem:[#allocation4 + $0x2e8] sm:$0xff]  ;;  %v940_v8 = vpack.c.bf16 %v640_v62, %v634_v60 }
  0x6a   :  { %1172 = vmatmul.mubr.bf16.vlgmr.msra.gmra.mrb[0].mxu0 %v4003_v29  ;;  %1366 = vmatpush1.bf16.msra.mxu1 %v720_v30  ;;  %v246_v30 = vld [vmem:[#allocation4 + $0x1c0] sm:$0xff]  ;;  %v95_v9 = vld [vmem:[#allocation2 + $0x188] sm:$0xff]  ;;  %v101_v12 = vld [vmem:[#allocation2 + $0x1b8] sm:$0xff] }
  0x6b   :  { %1253 = vmatpush1.bf16.msra.mxu0 %v910_v34  ;;  %1367 = vmatprep.subr.bf16.mxu1 %v727_v35  ;;  %v83_v34 = vld [vmem:[#allocation2 + $0x128] sm:$0xff]  ;;  %v89_v35 = vld [vmem:[#allocation2 + $0x158] sm:$0xff]  ;;  %v744_v43 = vpack.c.bf16 %v246_v30, %v240_v26  ;;  %v652_v18 = vld [vmem:[#allocation4 + $0xe70] sm:$0xff]  ;;  %v4041_v30 = vpack.c.bf16 %v101_v12, %v95_v9 }
  0x6c   :  { %1254 = vmatprep.subr.bf16.mxu0 %v917_v39  ;;  %1068 = vmatprep.mubr.bf16.mxu1 %v4005_v40  ;;  %v622_v39 = vld [vmem:[#allocation4 + $0xd80] sm:$0xff]  ;;  %v4029_v50 = vpack.c.bf16 %v89_v35, %v83_v34  ;;  %v97_v13 = vld [vmem:[#allocation2 + $0x198] sm:$0xff]  ;;  %v103_v15 = vld [vmem:[#allocation2 + $0x1c8] sm:$0xff] }
  0x6d   :  { %1181 = vmatprep.mubr.bf16.mxu0 %v4008_v44  ;;  %v659_v21 = vld [vmem:[#allocation4 + $0xea8] sm:$0xff]  ;;  %v665_v22 = vld [vmem:[#allocation4 + $0xed8] sm:$0xff]  ;;  %v4043_v31 = vpack.c.bf16 %v103_v15, %v97_v13  ;;  %v94_v32 = vld [vmem:[#allocation2 + $0x180] sm:$0xff] }
  0x6e   :  { %1368 = vmatpush1.bf16.msra.mxu1 %v726_v48  ;;  %v252_v48 = vld [vmem:[#allocation4 + $0x1f0] sm:$0xff]  ;;  %v289_v34 = vld [vmem:[#allocation4 + $0x318] sm:$0xff]  ;;  %v295_v35 = vld [vmem:[#allocation4 + $0x348] sm:$0xff] }
  0x6f   :  { %1255 = vmatpush1.bf16.msra.mxu0 %v916_v52  ;;  %1369 = vmatprep.subr.bf16.mxu1 %v733_v53  ;;  %v934_v52 = vpack.c.bf16 %v628_v41, %v622_v39  ;;  %v82_v53 = vld [vmem:[#allocation2 + $0x120] sm:$0xff]  ;;  %v750_v63 = vpack.c.bf16 %v258_v49, %v252_v48  ;;  %v96_v38 = vld [vmem:[#allocation2 + $0x190] sm:$0xff]  ;;  %v953_v41 = vpack.c.bf16 %v665_v22, %v659_v21  ;;  %v671_v48 = vld [vmem:[#allocation4 + $0xf08] sm:$0xff] }
  0x70   :  { %1256 = vmatprep.subr.bf16.mxu0 %v923_v57  ;;  %v84_v57 = vld [vmem:[#allocation2 + $0x130] sm:$0xff]  ;;  %v4037_v14 = vpack.c.bf16 %v88_v54, %v82_v53  ;;  %v102_v39 = vld [vmem:[#allocation2 + $0x1c0] sm:$0xff]  ;;  %v677_v49 = vld [vmem:[#allocation4 + $0xf38] sm:$0xff] }
  0x71   :  { %1069 = vmatmul.mubr.bf16.gmra.mrb[4].mxu1 %v4013_v61  ;;  %v4039_v19 = vpack.c.bf16 %v90_v58, %v84_v57  ;;  %v664_v45 = vld [vmem:[#allocation4 + $0xed0] sm:$0xff]  ;;  %v294_v53 = vld [vmem:[#allocation4 + $0x340] sm:$0xff]  ;;  %v301_v54 = vld [vmem:[#allocation4 + $0x378] sm:$0xff] }
  0x72   :  { %1182 = vmatmul.mubr.bf16.gmra.mrb[4].mxu0 %v4015_v1  ;;  %1370 = vmatpush1.bf16.msra.mxu1 %v732_v2  ;;  %v647_v2 = vld [vmem:[#allocation4 + $0xe48] sm:$0xff]  ;;  %v113_v57 = vld [vmem:[#allocation2 + $0x218] sm:$0xff]  ;;  %v306_v9 = vld [vmem:[#allocation4 + $0x3a0] sm:$0xff] }
  0x73   :  { %1257 = vmatpush1.bf16.msra.mxu0 %v922_v5  ;;  %1371 = vmatprep.subr.bf16.mxu1 %v739_v6  ;;  %v270_v5 = vld [vmem:[#allocation4 + $0x280] sm:$0xff]  ;;  %v277_v6 = vld [vmem:[#allocation4 + $0x2b8] sm:$0xff]  ;;  %v947_v16 = vpack.c.bf16 %v653_v3, %v647_v2  ;;  %v307_v55 = vld [vmem:[#allocation4 + $0x3a8] sm:$0xff]  ;;  %v4051_v3 = vpack.c.bf16 %v102_v39, %v96_v38 }
  0x74   :  { %1078 = vmatprep.mubr.bf16.mxu1 %v4017_v10  ;;  %1191 = vmatprep.mubr.bf16.mxu0 %v4019_v11  ;;  %v763_v26 = vpack.c.bf16 %v283_v7, %v277_v6  ;;  %v107_v56 = vld [vmem:[#allocation2 + $0x1e8] sm:$0xff]  ;;  %v109_v58 = vld [vmem:[#allocation2 + $0x1f8] sm:$0xff]  ;;  %v676_v2 = vld [vmem:[#allocation4 + $0xf30] sm:$0xff]  ;;  %v775_v7 = vpack.c.bf16 %v307_v55, %v301_v54 }
  0x75   :  { %1258 = vmatprep.subr.bf16.mxu0 %v929_v17  ;;  %v646_v17 = vld [vmem:[#allocation4 + $0xe40] sm:$0xff]  ;;  %v115_v62 = vld [vmem:[#allocation2 + $0x228] sm:$0xff]  ;;  %v689_v6 = vld [vmem:[#allocation4 + $0xf98] sm:$0xff]  ;;  %v4053_v12 = vpack.c.bf16 %v113_v57, %v107_v56 }
  0x76   :  { %1372 = vmatpush1.bf16.msra.mxu1 %v738_v20  ;;  %v756_v20 = vpack.c.bf16 %v270_v5, %v264_v0  ;;  %v946_v36 = vpack.c.bf16 %v652_v18, %v646_v17  ;;  %v670_v0 = vld [vmem:[#allocation4 + $0xf00] sm:$0xff]  ;;  %v683_v5 = vld [vmem:[#allocation4 + $0xf68] sm:$0xff]  ;;  %v4055_v13 = vpack.c.bf16 %v115_v62, %v109_v58  ;;  %v313_v17 = vld [vmem:[#allocation4 + $0x3d8] sm:$0xff] }
  0x77   :  { %1373 = vmatprep.subr.bf16.mxu1 %v745_v27  ;;  %1259 = vmatpush1.bf16.msra.mxu0 %v928_v28  ;;  %v276_v27 = vld [vmem:[#allocation4 + $0x2b0] sm:$0xff]  ;;  %v282_v28 = vld [vmem:[#allocation4 + $0x2e0] sm:$0xff]  ;;  %v319_v18 = vld [vmem:[#allocation4 + $0x408] sm:$0xff] }
  0x78   :  { %1260 = vmatprep.subr.bf16.mxu0 %v935_v33  ;;  %v100_v33 = vld [vmem:[#allocation2 + $0x1b0] sm:$0xff]  ;;  %v762_v46 = vpack.c.bf16 %v282_v28, %v276_v27  ;;  %v106_v15 = vld [vmem:[#allocation2 + $0x1e0] sm:$0xff]  ;;  %v965_v27 = vpack.c.bf16 %v689_v6, %v683_v5  ;;  %v781_v38 = vpack.c.bf16 %v319_v18, %v313_v17  ;;  %v325_v39 = vld [vmem:[#allocation4 + $0x438] sm:$0xff] }
  0x79   :  { %1079 = vmatmul.mubr.bf16.gmra.mrb[8].mxu1 %v4025_v37  ;;  %v4049_v60 = vpack.c.bf16 %v100_v33, %v94_v32  ;;  %v108_v21 = vld [vmem:[#allocation2 + $0x1f0] sm:$0xff]  ;;  %v114_v22 = vld [vmem:[#allocation2 + $0x220] sm:$0xff]  ;;  %v707_v55 = vld [vmem:[#allocation4 + $0x1028] sm:$0xff] }
  0x7a   :  { %1192 = vmatmul.mubr.bf16.gmra.mrb[8].mxu0 %v4027_v42  ;;  %1374 = vmatpush1.bf16.msra.mxu1 %v744_v43  ;;  %v658_v43 = vld [vmem:[#allocation4 + $0xea0] sm:$0xff]  ;;  %v688_v32 = vld [vmem:[#allocation4 + $0xf90] sm:$0xff]  ;;  %v4063_v56 = vpack.c.bf16 %v114_v22, %v108_v21  ;;  %v713_v58 = vld [vmem:[#allocation4 + $0x1058] sm:$0xf] }
  0x7b   :  { %1375 = vmatprep.subr.bf16.mxu1 %v751_v47  ;;  %1088 = vmatprep.mubr.bf16.mxu1 %v4029_v50  ;;  %v288_v47 = vld [vmem:[#allocation4 + $0x310] sm:$0xff]  ;;  %v682_v28 = vld [vmem:[#allocation4 + $0xf60] sm:$0xff]  ;;  %v337_v6 = vld [vmem:[#allocation4 + $0x498] sm:$0xff]  ;;  %v977_v17 = vpack.c.bf16 %v713_v58, %v707_v55 }
  0x7c   :  { %1201 = vmatprep.mubr.bf16.mxu0 %v4031_v51  ;;  %1261 = vmatpush1.bf16.msra.mxu0 %v934_v52  ;;  %v769_v52 = vpack.c.bf16 %v295_v35, %v289_v34  ;;  %v318_v34 = vld [vmem:[#allocation4 + $0x400] sm:$0xff]  ;;  %v695_v35 = vld [vmem:[#allocation4 + $0xfc8] sm:$0xff]  ;;  %v700_v54 = vld [vmem:[#allocation4 + $0xff0] sm:$0xff] }
  0x7d   :  { %1262 = vmatprep.subr.bf16.mxu0 %v941_v59  ;;  %v952_v59 = vpack.c.bf16 %v664_v45, %v658_v43  ;;  %v119_v43 = vld [vmem:[#allocation2 + $0x248] sm:$0xff]  ;;  %v125_v45 = vld [vmem:[#allocation2 + $0x278] sm:$0xff]  ;;  %v712_v62 = vld [vmem:[#allocation4 + $0x1050] sm:$0xf] }
  0x7e   :  { %1376 = vmatpush1.bf16.msra.mxu1 %v750_v63  ;;  %v959_v63 = vpack.c.bf16 %v677_v49, %v671_v48  ;;  %v964_v48 = vpack.c.bf16 %v688_v32, %v682_v28  ;;  %v126_v21 = vld [vmem:[#allocation2 + $0x280] sm:$0xff]  ;;  %v195_v22 = vld [vmem:[#allocation4 + $0x28] sm:$0xff]  ;;  %v336_v28 = vld [vmem:[#allocation4 + $0x490] sm:$0xff] }
  0x7f   :  { %1377 = vmatprep.subr.bf16.mxu1 %v757_v4  ;;  %v768_v4 = vpack.c.bf16 %v294_v53, %v288_v47  ;;  %v127_v47 = vld [vmem:[#allocation2 + $0x288] sm:$0xff]  ;;  %v694_v53 = vld [vmem:[#allocation4 + $0xfc0] sm:$0xff] }
  0x80   :  { %1263 = vmatpush1.bf16.msra.mxu0 %v940_v8  ;;  %v300_v8 = vld [vmem:[#allocation4 + $0x370] sm:$0xff]  ;;  %v342_v32 = vld [vmem:[#allocation4 + $0x4c0] sm:$0xff]  ;;  %v367_v58 = vld [vmem:[#allocation4 + $0x588] sm:$0xff] }
  0x81   :  { %1089 = vmatmul.mubr.bf16.gmra.mrb[12].mxu1 %v4037_v14  ;;  %1264 = vmatprep.subr.bf16.mxu0 %v947_v16  ;;  %v112_v16 = vld [vmem:[#allocation2 + $0x210] sm:$0xff]  ;;  %v774_v33 = vpack.c.bf16 %v306_v9, %v300_v8  ;;  %v970_v8 = vpack.c.bf16 %v700_v54, %v694_v53  ;;  %v118_v9 = vld [vmem:[#allocation2 + $0x240] sm:$0xff] }
  0x82   :  { %1202 = vmatmul.mubr.bf16.gmra.mrb[12].mxu0 %v4039_v19  ;;  %1378 = vmatpush1.bf16.msra.mxu1 %v756_v20  ;;  %v958_v20 = vpack.c.bf16 %v676_v2, %v670_v0  ;;  %v4061_v49 = vpack.c.bf16 %v112_v16, %v106_v15  ;;  %v324_v0 = vld [vmem:[#allocation4 + $0x430] sm:$0xff]  ;;  %v330_v2 = vld [vmem:[#allocation4 + $0x460] sm:$0xff] }
  0x83   :  { %1379 = vmatprep.subr.bf16.mxu1 %v763_v26  ;;  %1098 = vmatprep.mubr.bf16.mxu1 %v4041_v30  ;;  %v312_v26 = vld [vmem:[#allocation4 + $0x3d0] sm:$0xff]  ;;  %v354_v53 = vld [vmem:[#allocation4 + $0x520] sm:$0xff] }
  0x84   :  { %1211 = vmatprep.mubr.bf16.mxu0 %v4043_v31  ;;  %1265 = vmatpush1.bf16.msra.mxu0 %v946_v36  ;;  %v701_v36 = vld [vmem:[#allocation4 + $0xff8] sm:$0xff]  ;;  %v780_v57 = vpack.c.bf16 %v318_v34, %v312_v26  ;;  %v124_v15 = vld [vmem:[#allocation2 + $0x270] sm:$0xff]  ;;  %v355_v34 = vld [vmem:[#allocation4 + $0x528] sm:$0xff] }
  0x85   :  { %1266 = vmatprep.subr.bf16.mxu0 %v953_v41  ;;  %v331_v41 = vld [vmem:[#allocation4 + $0x468] sm:$0xff]  ;;  %v120_v16 = vld [vmem:[#allocation2 + $0x250] sm:$0xff]  ;;  %v201_v26 = vld [vmem:[#allocation4 + $0x58] sm:$0xff] }
  0x86   :  { %1380 = vmatpush1.bf16.msra.mxu1 %v762_v46  ;;  %v121_v46 = vld [vmem:[#allocation2 + $0x258] sm:$0xff] }
  0x87   :  { %1381 = vmatprep.subr.bf16.mxu1 %v769_v52  ;;  %v971_v52 = vpack.c.bf16 %v701_v36, %v695_v35  ;;  %v4067_v5 = vpack.c.bf16 %v127_v47, %v121_v46  ;;  %v131_v35 = vld [vmem:[#allocation2 + $0x2a8] sm:$0xff]  ;;  %v137_v36 = vld [vmem:[#allocation2 + $0x2d8] sm:$0xff]  ;;  %v4077_v46 = vpack.c.bf16 %v126_v21, %v120_v16  ;;  %v792_v47 = vpack.c.bf16 %v342_v32, %v336_v28 }
  0x88   :  { %1267 = vmatpush1.bf16.msra.mxu0 %v952_v59  ;;  %v706_v59 = vld [vmem:[#allocation4 + $0x1020] sm:$0xff]  ;;  %v4079_v54 = vpack.c.bf16 %v137_v36, %v131_v35  ;;  %v51_v16 = vld [vmem:[#allocation2 + $0x28] sm:$0xff]  ;;  %v385_v32 = vld [vmem:[#allocation4 + $0x618] sm:$0xff] }
  0x89   :  { %1099 = vmatmul.mubr.bf16.gmra.mrb[16].mxu1 %v4049_v60  ;;  %1268 = vmatprep.subr.bf16.mxu0 %v959_v63  ;;  %v787_v63 = vpack.c.bf16 %v331_v41, %v325_v39  ;;  %v976_v18 = vpack.c.bf16 %v712_v62, %v706_v59  ;;  %v133_v39 = vld [vmem:[#allocation2 + $0x2b8] sm:$0xff]  ;;  %v139_v41 = vld [vmem:[#allocation2 + $0x2e8] sm:$0xff]  ;;  %v130_v59 = vld [vmem:[#allocation2 + $0x2a0] sm:$0xff] }
  0x8a   :  { %1212 = vmatmul.mubr.bf16.gmra.mrb[16].mxu0 %v4051_v3  ;;  %1382 = vmatpush1.bf16.msra.mxu1 %v768_v4  ;;  %v4065_v4 = vpack.c.bf16 %v125_v45, %v119_v43  ;;  %v723_v45 = vpack.c.bf16 %v201_v26, %v195_v22  ;;  %v4081_v55 = vpack.c.bf16 %v139_v41, %v133_v39  ;;  %v372_v26 = vld [vmem:[#allocation4 + $0x5b0] sm:$0xff]  ;;  %v50_v35 = vld [vmem:[#allocation2 + $0x20] sm:$0xff] }
  0x8b   :  { %1383 = vmatprep.subr.bf16.mxu1 %v775_v7  ;;  %1108 = vmatprep.mubr.bf16.mxu1 %v4053_v12  ;;  %v343_v7 = vld [vmem:[#allocation4 + $0x4c8] sm:$0xff]  ;;  %v1009_v43 = vsel %vm1007_vm0, %v976_v18, 0  ;;  %v56_v36 = vld [vmem:[#allocation2 + $0x50] sm:$0xff] }
  0x8c   :  { %1221 = vmatprep.mubr.bf16.mxu0 %v4055_v13  ;;  %1269 = vmatpush1.bf16.msra.mxu0 %v958_v20  ;;  %v786_v20 = vpack.c.bf16 %v330_v2, %v324_v0  ;;  %v132_v0 = vld [vmem:[#allocation2 + $0x2b0] sm:$0xff]  ;;  %v138_v2 = vld [vmem:[#allocation2 + $0x2e0] sm:$0xff] }
  0x8d   :  { %1270 = vmatprep.subr.bf16.mxu0 %v965_v27  ;;  %v793_v27 = vpack.c.bf16 %v343_v7, %v337_v6  ;;  %v360_v7 = vld [vmem:[#allocation4 + $0x550] sm:$0xff] }
  0x8e   :  { %1384 = vmatpush1.bf16.msra.mxu1 %v774_v33  ;;  %v349_v33 = vld [vmem:[#allocation4 + $0x4f8] sm:$0xff]  ;;  %v384_v39 = vld [vmem:[#allocation4 + $0x610] sm:$0xff] }
  0x8f   :  { %1385 = vmatprep.subr.bf16.mxu1 %v781_v38  ;;  %v4073_v38 = vpack.c.bf16 %v124_v15, %v118_v9  ;;  %v373_v9 = vld [vmem:[#allocation4 + $0x5b8] sm:$0xff]  ;;  %v379_v15 = vld [vmem:[#allocation4 + $0x5e8] sm:$0xff] }
  0x90   :  { %1271 = vmatpush1.bf16.msra.mxu0 %v964_v48  ;;  %v799_v48 = vpack.c.bf16 %v355_v34, %v349_v33  ;;  %v811_v22 = vpack.c.bf16 %v379_v15, %v373_v9  ;;  %v391_v33 = vld [vmem:[#allocation4 + $0x648] sm:$0xff]  ;;  %v212_v15 = vld [vmem:[#allocation4 + $0xb0] sm:$0xff] }
  0x91   :  { %1109 = vmatmul.mubr.bf16.gmra.mrb[20].mxu1 %v4061_v49  ;;  %1272 = vmatprep.subr.bf16.mxu0 %v971_v52  ;;  %v348_v52 = vld [vmem:[#allocation4 + $0x4f0] sm:$0xff]  ;;  %v817_v41 = vpack.c.bf16 %v391_v33, %v385_v32  ;;  %v62_v32 = vld [vmem:[#allocation2 + $0x80] sm:$0xff] }
  0x92   :  { %1222 = vmatmul.mubr.bf16.gmra.mrb[20].mxu0 %v4063_v56  ;;  %1386 = vmatpush1.bf16.msra.mxu1 %v780_v57  ;;  %v361_v57 = vld [vmem:[#allocation4 + $0x558] sm:$0xff]  ;;  %v798_v62 = vpack.c.bf16 %v354_v53, %v348_v52  ;;  %v403_v52 = vld [vmem:[#allocation4 + $0x6a8] sm:$0xff]  ;;  %v68_v33 = vld [vmem:[#allocation2 + $0xb0] sm:$0xff] }
  0x93   :  { %1387 = vmatprep.subr.bf16.mxu1 %v787_v63  ;;  %1118 = vmatprep.mubr.bf16.mxu1 %v4065_v4  ;;  %v136_v63 = vld [vmem:[#allocation2 + $0x2d0] sm:$0xff]  ;;  %v805_v6 = vpack.c.bf16 %v367_v58, %v361_v57  ;;  %v207_v53 = vld [vmem:[#allocation4 + $0x88] sm:$0xff]  ;;  %v213_v57 = vld [vmem:[#allocation4 + $0xb8] sm:$0xff] }
  0x94   :  { %1231 = vmatprep.mubr.bf16.mxu0 %v4067_v5  ;;  %1273 = vmatpush1.bf16.msra.mxu0 %v970_v8  ;;  %v366_v8 = vld [vmem:[#allocation4 + $0x580] sm:$0xff]  ;;  %v4087_v18 = vpack.c.bf16 %v136_v63, %v130_v59  ;;  %v63_v58 = vld [vmem:[#allocation2 + $0x88] sm:$0xff]  ;;  %v69_v59 = vld [vmem:[#allocation2 + $0xb8] sm:$0xff]  ;;  %v729_v9 = vpack.c.bf16 %v213_v57, %v207_v53 }
  0x95   :  { %3597 = vmatprep.subr.msk.bf16.mxu0 %vm1007_vm0, %v977_v17  ;;  %v57_v17 = vld [vmem:[#allocation2 + $0x58] sm:$0xff]  ;;  %v804_v21 = vpack.c.bf16 %v366_v8, %v360_v7  ;;  %v402_v7 = vld [vmem:[#allocation4 + $0x6a0] sm:$0xff]  ;;  %v75_v57 = vld [vmem:[#allocation2 + $0xe8] sm:$0xff] }
  0x96   :  { %1388 = vmatpush1.bf16.msra.mxu1 %v786_v20  ;;  %v4089_v20 = vpack.c.bf16 %v138_v2, %v132_v0  ;;  %v4091_v28 = vpack.c.bf16 %v57_v17, %v51_v16  ;;  %v206_v8 = vld [vmem:[#allocation4 + $0x80] sm:$0xff]  ;;  %v4100_v16 = vpack.c.bf16 %v69_v59, %v63_v58  ;;  %v409_v17 = vld [vmem:[#allocation4 + $0x6d8] sm:$0xff]  ;;  %v4107_v59 = vpack.c.bf16 %v68_v33, %v62_v32 }
  0x97   :  { %1389 = vmatprep.subr.bf16.mxu1 %v793_v27  ;;  %v378_v27 = vld [vmem:[#allocation4 + $0x5e0] sm:$0xff]  ;;  %v237_v53 = vld [vmem:[#allocation4 + $0x178] sm:$0xff] }
  0x98   :  { %1275 = vmatpush1.bf16.msra.mxu0 %v1009_v43  ;;  %v810_v34 = vpack.c.bf16 %v378_v27, %v372_v26  ;;  %v390_v43 = vld [vmem:[#allocation4 + $0x640] sm:$0xff]  ;;  %v225_v26 = vld [vmem:[#allocation4 + $0x118] sm:$0xff] }
  0x99   :  { %1119 = vmatmul.mubr.bf16.gmra.mrb[24].mxu1 %v4073_v38  ;;  %1704 = vmatprep.subr.bf16.mxu0 %v723_v45  ;;  %v194_v45 = vld [vmem:[#allocation4 + $0x20] sm:$0xff]  ;;  %v816_v63 = vpack.c.bf16 %v390_v43, %v384_v39  ;;  %v224_v43 = vld [vmem:[#allocation4 + $0x110] sm:$0xff]  ;;  %v81_v58 = vld [vmem:[#allocation2 + $0x118] sm:$0xff] }
  0x9a   :  { %1232 = vmatmul.mubr.bf16.gmra.mrb[24].mxu0 %v4077_v46  ;;  %1390 = vmatpush1.bf16.msra.mxu1 %v792_v47  ;;  %v200_v47 = vld [vmem:[#allocation4 + $0x50] sm:$0xff]  ;;  %v414_v39 = vld [vmem:[#allocation4 + $0x700] sm:$0xff] }
  0x9b   :  { %1391 = vmatprep.subr.bf16.mxu1 %v799_v48  ;;  %1128 = vmatprep.mubr.bf16.mxu1 %v4079_v54  ;;  %v397_v48 = vld [vmem:[#allocation4 + $0x678] sm:$0xff]  ;;  %v722_v0 = vpack.c.bf16 %v200_v47, %v194_v45  ;;  %v74_v33 = vld [vmem:[#allocation2 + $0xe0] sm:$0xff] }
  0x9c   :  { %1241 = vmatprep.mubr.bf16.mxu0 %v4081_v55  ;;  %v823_v2 = vpack.c.bf16 %v403_v52, %v397_v48  ;;  %v421_v47 = vld [vmem:[#allocation4 + $0x738] sm:$0xff]  ;;  %v427_v48 = vld [vmem:[#allocation4 + $0x768] sm:$0xff] }
  0x9d   :  { %v231_v52 = vld [vmem:[#allocation4 + $0x148] sm:$0xff] }
  0x9e   :  { %1392 = vmatpush1.bf16.msra.mxu1 %v798_v62  ;;  %v4098_v62 = vpack.c.bf16 %v56_v36, %v50_v35  ;;  %v728_v35 = vpack.c.bf16 %v212_v15, %v206_v8  ;;  %v230_v8 = vld [vmem:[#allocation4 + $0x140] sm:$0xff]  ;;  %v236_v15 = vld [vmem:[#allocation4 + $0x170] sm:$0xff] }
  0x9f   :  { %1393 = vmatprep.subr.bf16.mxu1 %v805_v6  ;;  %v396_v6 = vld [vmem:[#allocation4 + $0x670] sm:$0xff] }
  0xa0   :  { %v822_v27 = vpack.c.bf16 %v402_v7, %v396_v6  ;;  %v420_v6 = vld [vmem:[#allocation4 + $0x730] sm:$0xff]  ;;  %v426_v7 = vld [vmem:[#allocation4 + $0x760] sm:$0xff] }
  0xa1   :  { %1129 = vmatmul.mubr.bf16.gmra.mrb[28].mxu1 %v4087_v18  ;;  %v834_v32 = vpack.c.bf16 %v426_v7, %v420_v6 }
  0xa2   :  { %1242 = vmatmul.mubr.bf16.gmra.mrb[28].mxu0 %v4089_v20  ;;  %1394 = vmatpush1.bf16.msra.mxu1 %v804_v21  ;;  %v415_v21 = vld [vmem:[#allocation4 + $0x708] sm:$0xff] }
  0xa3   :  { %1395 = vmatprep.subr.bf16.mxu1 %v811_v22  ;;  %3598 = vmatprep.mubr.msk.bf16.mxu0 %vm982_vm1, %v4091_v28  ;;  %v219_v22 = vld [vmem:[#allocation4 + $0xe8] sm:$0xff]  ;;  %v829_v36 = vpack.c.bf16 %v415_v21, %v409_v17  ;;  %v4109_v17 = vpack.c.bf16 %v81_v58, %v75_v57  ;;  %v433_v21 = vld [vmem:[#allocation4 + $0x798] sm:$0xff] }
  0xa4   :  { %1397 = vmatprep.mubr.bf16.mxu1 %v3995_v23  ;;  %v735_v45 = vpack.c.bf16 %v225_v26, %v219_v22  ;;  %v439_v22 = vld [vmem:[#allocation4 + $0x7c8] sm:$0xff]  ;;  %v261_v57 = vld [vmem:[#allocation4 + $0x238] sm:$0xff] }
  0xa5   :  { %5411 = vst [vmem:[#allocation8_spill] sm:$0xff] %v4109_v17  ;;  %v243_v26 = vld [vmem:[#allocation4 + $0x1a8] sm:$0xff] }
  0xa6   :  { %1396 = vmatpush1.bf16.msra.mxu1 %v810_v34  ;;  %v408_v34 = vld [vmem:[#allocation4 + $0x6d0] sm:$0xff]  ;;  %v87_v58 = vld [vmem:[#allocation2 + $0x148] sm:$0xff] }
  0xa7   :  { %1478 = vmatprep.subr.bf16.mxu1 %v817_v41  ;;  %v218_v41 = vld [vmem:[#allocation4 + $0xe0] sm:$0xff] }
  0xa9   :  { %1398 = vmatmul.mubr.bf16.vlgmr.msra.gmra.mrb[32].mxu1 %v4001_v25 }
  0xaa   :  { %1285 = vmatmul.mubr.bf16.vlgmr.msra.gmra.mrb[0].mxu0 %v4098_v62  ;;  %1479 = vmatpush1.bf16.msra.mxu1 %v816_v63  ;;  %v828_v63 = vpack.c.bf16 %v414_v39, %v408_v34  ;;  %v80_v34 = vld [vmem:[#allocation2 + $0x110] sm:$0xff]  ;;  %v841_v39 = vpack.c.bf16 %v439_v22, %v433_v21 }
  0xab   :  { %1705 = vmatpush1.bf16.msra.mxu0 %v722_v0  ;;  %1480 = vmatprep.subr.bf16.mxu1 %v823_v2  ;;  %v734_v0 = vpack.c.bf16 %v224_v43, %v218_v41  ;;  %v835_v2 = vpack.c.bf16 %v427_v48, %v421_v47  ;;  %v438_v41 = vld [vmem:[#allocation4 + $0x7c0] sm:$0xff]  ;;  %v445_v48 = vld [vmem:[#allocation4 + $0x7f8] sm:$0xff]  ;;  %v260_v22 = vld [vmem:[#allocation4 + $0x230] sm:$0xff] }
  0xac   :  { %1706 = vmatprep.subr.bf16.mxu0 %v729_v9  ;;  %3599 = vmatprep.mubr.msk.bf16.mxu0 %vm982_vm1, %v4100_v16  ;;  %v741_v9 = vpack.c.bf16 %v237_v53, %v231_v52  ;;  %v242_v43 = vld [vmem:[#allocation4 + $0x1a0] sm:$0xff]  ;;  %v451_v52 = vld [vmem:[#allocation4 + $0x828] sm:$0xff] }
  0xad   :  { %1407 = vmatprep.mubr.bf16.mxu1 %v4005_v40  ;;  %v255_v53 = vld [vmem:[#allocation4 + $0x208] sm:$0xff]  ;;  %v847_v7 = vpack.c.bf16 %v451_v52, %v445_v48  ;;  %v272_v48 = vld [vmem:[#allocation4 + $0x290] sm:$0xff] }
  0xae   :  { %1481 = vmatpush1.bf16.msra.mxu1 %v822_v27  ;;  %v249_v27 = vld [vmem:[#allocation4 + $0x1d8] sm:$0xff]  ;;  %v753_v21 = vpack.c.bf16 %v261_v57, %v255_v53  ;;  %v475_v57 = vld [vmem:[#allocation4 + $0x8e8] sm:$0xff] }
  0xaf   :  { %1707 = vmatpush1.bf16.msra.mxu0 %v728_v35  ;;  %1482 = vmatprep.subr.bf16.mxu1 %v829_v36  ;;  %v432_v35 = vld [vmem:[#allocation4 + $0x790] sm:$0xff]  ;;  %v740_v36 = vpack.c.bf16 %v236_v15, %v230_v8  ;;  %v747_v47 = vpack.c.bf16 %v249_v27, %v243_v26  ;;  %v254_v15 = vld [vmem:[#allocation4 + $0x200] sm:$0xff]  ;;  %v457_v27 = vld [vmem:[#allocation4 + $0x858] sm:$0xff] }
  0xb0   :  { %1708 = vmatprep.subr.bf16.mxu0 %v735_v45  ;;  %v248_v45 = vld [vmem:[#allocation4 + $0x1d0] sm:$0xff]  ;;  %v469_v53 = vld [vmem:[#allocation4 + $0x8b8] sm:$0xff] }
  0xb1   :  { %1408 = vmatmul.mubr.bf16.gmra.mrb[36].mxu1 %v4013_v61  ;;  %v746_v6 = vpack.c.bf16 %v248_v45, %v242_v43  ;;  %v444_v8 = vld [vmem:[#allocation4 + $0x7f0] sm:$0xff]  ;;  %v462_v45 = vld [vmem:[#allocation4 + $0x880] sm:$0xff] }
  0xb2   :  { %1295 = vmatmul.mubr.bf16.gmra.mrb[4].mxu0 %v4107_v59  ;;  %1483 = vmatpush1.bf16.msra.mxu1 %v828_v63  ;;  %v93_v63 = vld [vmem:[#allocation2 + $0x178] sm:$0xff] }
  0xb3   :  { %1709 = vmatpush1.bf16.msra.mxu0 %v734_v0  ;;  %1484 = vmatprep.subr.bf16.mxu1 %v835_v2  ;;  %v4116_v0 = vpack.c.bf16 %v80_v34, %v74_v33  ;;  %v840_v2 = vpack.c.bf16 %v438_v41, %v432_v35  ;;  %v4118_v26 = vpack.c.bf16 %v93_v63, %v87_v58  ;;  %v273_v33 = vld [vmem:[#allocation4 + $0x298] sm:$0xff]  ;;  %v86_v35 = vld [vmem:[#allocation2 + $0x140] sm:$0xff]  ;;  %v279_v58 = vld [vmem:[#allocation4 + $0x2c8] sm:$0xff] }
  0xb4   :  { %1710 = vmatprep.subr.bf16.mxu0 %v741_v9  ;;  %3600 = vmatprep.mubr.msk.bf16.mxu0 %vm982_vm1, %v4109_v17  ;;  %v450_v9 = vld [vmem:[#allocation4 + $0x820] sm:$0xff]  ;;  %v463_v17 = vld [vmem:[#allocation4 + $0x888] sm:$0xff]  ;;  %v752_v41 = vpack.c.bf16 %v260_v22, %v254_v15  ;;  %v285_v63 = vld [vmem:[#allocation4 + $0x2f8] sm:$0xff] }
  0xb5   :  { %1417 = vmatprep.mubr.bf16.mxu1 %v4017_v10  ;;  %5412 = vst [vmem:[#allocation9_spill] sm:$0xff] %v4116_v0  ;;  %5413 = vst [vmem:[#allocation10_spill] sm:$0xff] %v4118_v26  ;;  %v846_v34 = vpack.c.bf16 %v450_v9, %v444_v8  ;;  %v853_v43 = vpack.c.bf16 %v463_v17, %v457_v27  ;;  %v105_v8 = vld [vmem:[#allocation2 + $0x1d8] sm:$0xff]  ;;  %v859_v9 = vpack.c.bf16 %v475_v57, %v469_v53  ;;  %v468_v15 = vld [vmem:[#allocation4 + $0x8b0] sm:$0xff] }
  0xb6   :  { %1485 = vmatpush1.bf16.msra.mxu1 %v834_v32  ;;  %v267_v32 = vld [vmem:[#allocation4 + $0x268] sm:$0xff]  ;;  %v278_v22 = vld [vmem:[#allocation4 + $0x2c0] sm:$0xff]  ;;  %v765_v27 = vpack.c.bf16 %v285_v63, %v279_v58  ;;  %v296_v53 = vld [vmem:[#allocation4 + $0x350] sm:$0xff] }
  0xb7   :  { %1711 = vmatpush1.bf16.msra.mxu0 %v740_v36  ;;  %1486 = vmatprep.subr.bf16.mxu1 %v841_v39  ;;  %v92_v36 = vld [vmem:[#allocation2 + $0x170] sm:$0xff]  ;;  %v759_v52 = vpack.c.bf16 %v273_v33, %v267_v32  ;;  %v493_v58 = vld [vmem:[#allocation4 + $0x978] sm:$0xff]  ;;  %v499_v63 = vld [vmem:[#allocation4 + $0x9a8] sm:$0xff] }
  0xb8   :  { %1712 = vmatprep.subr.bf16.mxu0 %v747_v47  ;;  %v456_v39 = vld [vmem:[#allocation4 + $0x850] sm:$0xff]  ;;  %v266_v47 = vld [vmem:[#allocation4 + $0x260] sm:$0xff] }
  0xb9   :  { %1418 = vmatmul.mubr.bf16.gmra.mrb[40].mxu1 %v4025_v37  ;;  %v852_v17 = vpack.c.bf16 %v462_v45, %v456_v39  ;;  %v284_v32 = vld [vmem:[#allocation4 + $0x2f0] sm:$0xff]  ;;  %v98_v39 = vld [vmem:[#allocation2 + $0x1a0] sm:$0xff] }
  0xba   :  { %1305 = vmatmul.mubr.bf16.gmra.mrb[8].mxu0 %v4116_v0  ;;  %1487 = vmatpush1.bf16.msra.mxu1 %v840_v2  ;;  %v99_v2 = vld [vmem:[#allocation2 + $0x1a8] sm:$0xff]  ;;  %v764_v45 = vpack.c.bf16 %v284_v32, %v278_v22  ;;  %v498_v22 = vld [vmem:[#allocation4 + $0x9a0] sm:$0xff] }
  0xbb   :  { %1713 = vmatpush1.bf16.msra.mxu0 %v746_v6  ;;  %1488 = vmatprep.subr.bf16.mxu1 %v847_v7  ;;  %v4125_v6 = vpack.c.bf16 %v92_v36, %v86_v35  ;;  %v758_v7 = vpack.c.bf16 %v272_v48, %v266_v47  ;;  %v4127_v33 = vpack.c.bf16 %v105_v8, %v99_v2  ;;  %v487_v0 = vld [vmem:[#allocation4 + $0x948] sm:$0xff]  ;;  %v297_v35 = vld [vmem:[#allocation4 + $0x358] sm:$0xff]  ;;  %v486_v48 = vld [vmem:[#allocation4 + $0x940] sm:$0xff] }
  0xbc   :  { %1714 = vmatprep.subr.bf16.mxu0 %v753_v21  ;;  %3601 = vmatprep.mubr.msk.bf16.mxu0 %vm982_vm1, %v4118_v26  ;;  %v474_v21 = vld [vmem:[#allocation4 + $0x8e0] sm:$0xff]  ;;  %v481_v26 = vld [vmem:[#allocation4 + $0x918] sm:$0xff]  ;;  %v303_v2 = vld [vmem:[#allocation4 + $0x388] sm:$0xff] }
  0xbd   :  { %1427 = vmatprep.mubr.bf16.mxu1 %v4029_v50  ;;  %5414 = vst [vmem:[#allocation11_spill] sm:$0xff] %v4125_v6  ;;  %5415 = vst [vmem:[#allocation12_spill] sm:$0xff] %v4127_v33  ;;  %v858_v36 = vpack.c.bf16 %v474_v21, %v468_v15  ;;  %v865_v47 = vpack.c.bf16 %v487_v0, %v481_v26  ;;  %v309_v8 = vld [vmem:[#allocation4 + $0x3b8] sm:$0xff]  ;;  %v492_v21 = vld [vmem:[#allocation4 + $0x970] sm:$0xff] }
  0xbe   :  { %1489 = vmatpush1.bf16.msra.mxu1 %v846_v34  ;;  %v291_v34 = vld [vmem:[#allocation4 + $0x328] sm:$0xff]  ;;  %v117_v15 = vld [vmem:[#allocation2 + $0x238] sm:$0xff]  ;;  %v777_v32 = vpack.c.bf16 %v309_v8, %v303_v2 }
  0xbf   :  { %1715 = vmatpush1.bf16.msra.mxu0 %v752_v41  ;;  %1490 = vmatprep.subr.bf16.mxu1 %v853_v43  ;;  %v104_v41 = vld [vmem:[#allocation2 + $0x1d0] sm:$0xff]  ;;  %v771_v57 = vpack.c.bf16 %v297_v35, %v291_v34  ;;  %v517_v2 = vld [vmem:[#allocation4 + $0xa38] sm:$0xff]  ;;  %v523_v8 = vld [vmem:[#allocation4 + $0xa68] sm:$0xff] }
  0xc0   :  { %1716 = vmatprep.subr.bf16.mxu0 %v759_v52  ;;  %v480_v43 = vld [vmem:[#allocation4 + $0x910] sm:$0xff]  ;;  %v290_v52 = vld [vmem:[#allocation4 + $0x320] sm:$0xff] }
  0xc1   :  { %1428 = vmatmul.mubr.bf16.gmra.mrb[44].mxu1 %v4037_v14  ;;  %v864_v0 = vpack.c.bf16 %v486_v48, %v480_v43  ;;  %v770_v26 = vpack.c.bf16 %v296_v53, %v290_v52  ;;  %v308_v34 = vld [vmem:[#allocation4 + $0x3b0] sm:$0xff]  ;;  %v110_v43 = vld [vmem:[#allocation2 + $0x200] sm:$0xff] }
  0xc2   :  { %1315 = vmatmul.mubr.bf16.gmra.mrb[12].mxu0 %v4125_v6  ;;  %1491 = vmatpush1.bf16.msra.mxu1 %v852_v17  ;;  %v111_v17 = vld [vmem:[#allocation2 + $0x208] sm:$0xff]  ;;  %v510_v53 = vld [vmem:[#allocation4 + $0xa00] sm:$0xff] }
  0xc3   :  { %1717 = vmatpush1.bf16.msra.mxu0 %v758_v7  ;;  %1492 = vmatprep.subr.bf16.mxu1 %v859_v9  ;;  %v4134_v7 = vpack.c.bf16 %v104_v41, %v98_v39  ;;  %v871_v9 = vpack.c.bf16 %v499_v63, %v493_v58  ;;  %v4136_v35 = vpack.c.bf16 %v117_v15, %v111_v17  ;;  %v511_v6 = vld [vmem:[#allocation4 + $0xa08] sm:$0xff]  ;;  %v321_v39 = vld [vmem:[#allocation4 + $0x418] sm:$0xff]  ;;  %v320_v58 = vld [vmem:[#allocation4 + $0x410] sm:$0xff] }
  0xc4   :  { %1718 = vmatprep.subr.bf16.mxu0 %v765_v27  ;;  %3602 = vmatprep.mubr.msk.bf16.mxu0 %vm982_vm1, %v4127_v33  ;;  %v302_v27 = vld [vmem:[#allocation4 + $0x380] sm:$0xff]  ;;  %v505_v33 = vld [vmem:[#allocation4 + $0x9d8] sm:$0xff]  ;;  %v870_v41 = vpack.c.bf16 %v498_v22, %v492_v21  ;;  %v327_v17 = vld [vmem:[#allocation4 + $0x448] sm:$0xff] }
  0xc5   :  { %1437 = vmatprep.mubr.bf16.mxu1 %v4041_v30  ;;  %5416 = vst [vmem:[#allocation13_spill] sm:$0xff] %v4134_v7  ;;  %5417 = vst [vmem:[#allocation14_spill] sm:$0xff] %v4136_v35  ;;  %v776_v48 = vpack.c.bf16 %v308_v34, %v302_v27  ;;  %v877_v52 = vpack.c.bf16 %v511_v6, %v505_v33  ;;  %v333_v15 = vld [vmem:[#allocation4 + $0x478] sm:$0xff]  ;;  %v516_v22 = vld [vmem:[#allocation4 + $0xa30] sm:$0xff] }
  0xc6   :  { %1493 = vmatpush1.bf16.msra.mxu1 %v858_v36  ;;  %v315_v36 = vld [vmem:[#allocation4 + $0x3e8] sm:$0xff]  ;;  %v129_v21 = vld [vmem:[#allocation2 + $0x298] sm:$0xff]  ;;  %v522_v27 = vld [vmem:[#allocation4 + $0xa60] sm:$0xff]  ;;  %v789_v34 = vpack.c.bf16 %v333_v15, %v327_v17 }
  0xc7   :  { %1719 = vmatpush1.bf16.msra.mxu0 %v764_v45  ;;  %1494 = vmatprep.subr.bf16.mxu1 %v865_v47  ;;  %v116_v45 = vld [vmem:[#allocation2 + $0x230] sm:$0xff]  ;;  %v783_v63 = vpack.c.bf16 %v321_v39, %v315_v36  ;;  %v541_v17 = vld [vmem:[#allocation4 + $0xaf8] sm:$0xff]  ;;  %v547_v15 = vld [vmem:[#allocation4 + $0xb28] sm:$0xff] }
  0xc8   :  { %1720 = vmatprep.subr.bf16.mxu0 %v771_v57  ;;  %v504_v47 = vld [vmem:[#allocation4 + $0x9d0] sm:$0xff]  ;;  %v314_v57 = vld [vmem:[#allocation4 + $0x3e0] sm:$0xff] }
  0xc9   :  { %1438 = vmatmul.mubr.bf16.gmra.mrb[48].mxu1 %v4049_v60  ;;  %v876_v6 = vpack.c.bf16 %v510_v53, %v504_v47  ;;  %v782_v33 = vpack.c.bf16 %v320_v58, %v314_v57  ;;  %v332_v36 = vld [vmem:[#allocation4 + $0x470] sm:$0xff]  ;;  %v122_v47 = vld [vmem:[#allocation2 + $0x260] sm:$0xff] }
  0xca   :  { %1325 = vmatmul.mubr.bf16.gmra.mrb[16].mxu0 %v4134_v7  ;;  %1495 = vmatpush1.bf16.msra.mxu1 %v864_v0  ;;  %v123_v0 = vld [vmem:[#allocation2 + $0x268] sm:$0xff]  ;;  %v534_v58 = vld [vmem:[#allocation4 + $0xac0] sm:$0xff] }
  0xcb   :  { %1721 = vmatpush1.bf16.msra.mxu0 %v770_v26  ;;  %1496 = vmatprep.subr.bf16.mxu1 %v871_v9  ;;  %v4143_v26 = vpack.c.bf16 %v116_v45, %v110_v43  ;;  %v883_v9 = vpack.c.bf16 %v523_v8, %v517_v2  ;;  %v4145_v39 = vpack.c.bf16 %v129_v21, %v123_v0  ;;  %v535_v7 = vld [vmem:[#allocation4 + $0xac8] sm:$0xff]  ;;  %v345_v43 = vld [vmem:[#allocation4 + $0x4d8] sm:$0xff]  ;;  %v344_v2 = vld [vmem:[#allocation4 + $0x4d0] sm:$0xff] }
  0xcc   :  { %1722 = vmatprep.subr.bf16.mxu0 %v777_v32  ;;  %3603 = vmatprep.mubr.msk.bf16.mxu0 %vm982_vm1, %v4136_v35  ;;  %v326_v32 = vld [vmem:[#allocation4 + $0x440] sm:$0xff]  ;;  %v529_v35 = vld [vmem:[#allocation4 + $0xa98] sm:$0xff]  ;;  %v882_v45 = vpack.c.bf16 %v522_v27, %v516_v22  ;;  %v351_v0 = vld [vmem:[#allocation4 + $0x508] sm:$0xff] }
  0xcd   :  { %1447 = vmatprep.mubr.bf16.mxu1 %v4053_v12  ;;  %5418 = vst [vmem:[#allocation15_spill] sm:$0xff] %v4143_v26  ;;  %5419 = vst [vmem:[#allocation16_spill] sm:$0xff] %v4145_v39  ;;  %v788_v53 = vpack.c.bf16 %v332_v36, %v326_v32  ;;  %v889_v57 = vpack.c.bf16 %v535_v7, %v529_v35  ;;  %v357_v21 = vld [vmem:[#allocation4 + $0x538] sm:$0xff]  ;;  %v540_v27 = vld [vmem:[#allocation4 + $0xaf0] sm:$0xff] }
  0xce   :  { %1497 = vmatpush1.bf16.msra.mxu1 %v870_v41  ;;  %v339_v41 = vld [vmem:[#allocation4 + $0x4a8] sm:$0xff]  ;;  %v141_v22 = vld [vmem:[#allocation2 + $0x2f8] sm:$0xff]  ;;  %v546_v32 = vld [vmem:[#allocation4 + $0xb20] sm:$0xff]  ;;  %v801_v36 = vpack.c.bf16 %v357_v21, %v351_v0 }
  0xcf   :  { %1723 = vmatpush1.bf16.msra.mxu0 %v776_v48  ;;  %1498 = vmatprep.subr.bf16.mxu1 %v877_v52  ;;  %v128_v48 = vld [vmem:[#allocation2 + $0x290] sm:$0xff]  ;;  %v795_v8 = vpack.c.bf16 %v345_v43, %v339_v41  ;;  %v565_v0 = vld [vmem:[#allocation4 + $0xbb8] sm:$0xff]  ;;  %v571_v21 = vld [vmem:[#allocation4 + $0xbe8] sm:$0xff] }
  0xd0   :  { %1724 = vmatprep.subr.bf16.mxu0 %v783_v63  ;;  %v528_v52 = vld [vmem:[#allocation4 + $0xa90] sm:$0xff]  ;;  %v338_v63 = vld [vmem:[#allocation4 + $0x4a0] sm:$0xff] }
  0xd1   :  { %1448 = vmatmul.mubr.bf16.gmra.mrb[52].mxu1 %v4061_v49  ;;  %v888_v7 = vpack.c.bf16 %v534_v58, %v528_v52  ;;  %v794_v35 = vpack.c.bf16 %v344_v2, %v338_v63  ;;  %v356_v41 = vld [vmem:[#allocation4 + $0x530] sm:$0xff]  ;;  %v134_v52 = vld [vmem:[#allocation2 + $0x2c0] sm:$0xff] }
  0xd2   :  { %1335 = vmatmul.mubr.bf16.gmra.mrb[20].mxu0 %v4143_v26  ;;  %1499 = vmatpush1.bf16.msra.mxu1 %v876_v6  ;;  %v135_v6 = vld [vmem:[#allocation2 + $0x2c8] sm:$0xff]  ;;  %v552_v63 = vld [vmem:[#allocation4 + $0xb50] sm:$0xff]  ;;  %v558_v2 = vld [vmem:[#allocation4 + $0xb80] sm:$0xff] }
  0xd3   :  { %1725 = vmatpush1.bf16.msra.mxu0 %v782_v33  ;;  %1500 = vmatprep.subr.bf16.mxu1 %v883_v9  ;;  %v4152_v33 = vpack.c.bf16 %v128_v48, %v122_v47  ;;  %v895_v9 = vpack.c.bf16 %v547_v15, %v541_v17  ;;  %v4154_v43 = vpack.c.bf16 %v141_v22, %v135_v6  ;;  %v559_v26 = vld [vmem:[#allocation4 + $0xb88] sm:$0xff]  ;;  %v369_v47 = vld [vmem:[#allocation4 + $0x598] sm:$0xff]  ;;  %v368_v15 = vld [vmem:[#allocation4 + $0x590] sm:$0xff] }
  0xd4   :  { %1726 = vmatprep.subr.bf16.mxu0 %v789_v34  ;;  %3604 = vmatprep.mubr.msk.bf16.mxu0 %vm982_vm1, %v4145_v39  ;;  %v350_v34 = vld [vmem:[#allocation4 + $0x500] sm:$0xff]  ;;  %v553_v39 = vld [vmem:[#allocation4 + $0xb58] sm:$0xff]  ;;  %v894_v48 = vpack.c.bf16 %v546_v32, %v540_v27  ;;  %v375_v6 = vld [vmem:[#allocation4 + $0x5c8] sm:$0xff] }
  0xd5   :  { %1457 = vmatprep.mubr.bf16.mxu1 %v4065_v4  ;;  %5420 = vst [vmem:[#allocation17_spill] sm:$0xff] %v4154_v43  ;;  %v901_v58 = vpack.c.bf16 %v559_v26, %v553_v39  ;;  %v381_v22 = vld [vmem:[#allocation4 + $0x5f8] sm:$0xff]  ;;  %v907_v39 = vpack.c.bf16 %v571_v21, %v565_v0  ;;  %v570_v27 = vld [vmem:[#allocation4 + $0xbe0] sm:$0xff]  ;;  %v399_v0 = vld [vmem:[#allocation4 + $0x688] sm:$0xff] }
  0xd6   :  { %1501 = vmatpush1.bf16.msra.mxu1 %v882_v45  ;;  %v363_v45 = vld [vmem:[#allocation4 + $0x568] sm:$0xff]  ;;  %v374_v32 = vld [vmem:[#allocation4 + $0x5c0] sm:$0xff]  ;;  %v405_v21 = vld [vmem:[#allocation4 + $0x6b8] sm:$0xff] }
  0xd7   :  { %1727 = vmatpush1.bf16.msra.mxu0 %v788_v53  ;;  %1502 = vmatprep.subr.bf16.mxu1 %v889_v57  ;;  %v140_v53 = vld [vmem:[#allocation2 + $0x2f0] sm:$0xff]  ;;  %v800_v57 = vpack.c.bf16 %v356_v41, %v350_v34  ;;  %v807_v17 = vpack.c.bf16 %v369_v47, %v363_v45  ;;  %v813_v34 = vpack.c.bf16 %v381_v22, %v375_v6  ;;  %v577_v41 = vld [vmem:[#allocation4 + $0xc18] sm:$0xff]  ;;  %v583_v45 = vld [vmem:[#allocation4 + $0xc48] sm:$0xff] }
  0xd8   :  { %1728 = vmatprep.subr.bf16.mxu0 %v795_v8  ;;  %v362_v8 = vld [vmem:[#allocation4 + $0x560] sm:$0xff]  ;;  %v387_v47 = vld [vmem:[#allocation4 + $0x628] sm:$0xff] }
  0xd9   :  { %1458 = vmatmul.mubr.bf16.gmra.mrb[56].mxu1 %v4073_v38  ;;  %v806_v26 = vpack.c.bf16 %v368_v15, %v362_v8  ;;  %v392_v8 = vld [vmem:[#allocation4 + $0x650] sm:$0xff]  ;;  %v595_v15 = vld [vmem:[#allocation4 + $0xca8] sm:$0xff] }
  0xda   :  { %1345 = vmatmul.mubr.bf16.gmra.mrb[24].mxu0 %v4152_v33  ;;  %1503 = vmatpush1.bf16.msra.mxu1 %v888_v7  ;;  %v4161_v7 = vpack.c.bf16 %v140_v53, %v134_v52  ;;  %v913_v53 = vpack.c.bf16 %v583_v45, %v577_v41 }
  0xdb   :  { %1729 = vmatpush1.bf16.msra.mxu0 %v794_v35  ;;  %1504 = vmatprep.subr.bf16.mxu1 %v895_v9  ;;  %v900_v35 = vpack.c.bf16 %v558_v2, %v552_v63  ;;  %v564_v9 = vld [vmem:[#allocation4 + $0xbb0] sm:$0xff]  ;;  %v386_v63 = vld [vmem:[#allocation4 + $0x620] sm:$0xff] }
  0xdc   :  { %1730 = vmatprep.subr.bf16.mxu0 %v801_v36  ;;  %3605 = vmatprep.mubr.msk.bf16.mxu0 %vm982_vm1, %v4154_v43  ;;  %v380_v36 = vld [vmem:[#allocation4 + $0x5f0] sm:$0xff]  ;;  %v393_v43 = vld [vmem:[#allocation4 + $0x658] sm:$0xff]  ;;  %v818_v22 = vpack.c.bf16 %v392_v8, %v386_v63  ;;  %v423_v63 = vld [vmem:[#allocation4 + $0x748] sm:$0xff] }
  0xdd   :  { %1467 = vmatprep.mubr.bf16.mxu1 %v4079_v54  ;;  %v812_v52 = vpack.c.bf16 %v380_v36, %v374_v32  ;;  %v819_v2 = vpack.c.bf16 %v393_v43, %v387_v47  ;;  %v404_v32 = vld [vmem:[#allocation4 + $0x6b0] sm:$0xff]  ;;  %v601_v43 = vld [vmem:[#allocation4 + $0xcd8] sm:$0xff]  ;;  %v411_v36 = vld [vmem:[#allocation4 + $0x6e8] sm:$0xff] }
  0xde   :  { %1505 = vmatpush1.bf16.msra.mxu1 %v894_v48  ;;  %v906_v48 = vpack.c.bf16 %v570_v27, %v564_v9  ;;  %v594_v9 = vld [vmem:[#allocation4 + $0xca0] sm:$0xff]  ;;  %v825_v27 = vpack.c.bf16 %v405_v21, %v399_v0  ;;  %v613_v8 = vld [vmem:[#allocation4 + $0xd38] sm:$0xff]  ;;  %v612_v21 = vld [vmem:[#allocation4 + $0xd30] sm:$0xff] }
  0xdf   :  { %1731 = vmatpush1.bf16.msra.mxu0 %v800_v57  ;;  %1506 = vmatprep.subr.bf16.mxu1 %v901_v58  ;;  %v576_v57 = vld [vmem:[#allocation4 + $0xc10] sm:$0xff]  ;;  %v582_v58 = vld [vmem:[#allocation4 + $0xc40] sm:$0xff] }
  0xe0   :  { %1732 = vmatprep.subr.bf16.mxu0 %v807_v17  ;;  %v589_v17 = vld [vmem:[#allocation4 + $0xc78] sm:$0xff]  ;;  %v912_v6 = vpack.c.bf16 %v582_v58, %v576_v57  ;;  %v410_v57 = vld [vmem:[#allocation4 + $0x6e0] sm:$0xff]  ;;  %v416_v58 = vld [vmem:[#allocation4 + $0x710] sm:$0xff] }
  0xe1   :  { %1468 = vmatmul.mubr.bf16.gmra.mrb[60].mxu1 %v4087_v18  ;;  %v422_v0 = vld [vmem:[#allocation4 + $0x740] sm:$0xff] }
  0xe2   :  { %1355 = vmatmul.mubr.bf16.gmra.mrb[28].mxu0 %v4161_v7  ;;  %1507 = vmatpush1.bf16.msra.mxu1 %v900_v35  ;;  %v398_v35 = vld [vmem:[#allocation4 + $0x680] sm:$0xff] }
  0xe3   :  { %1733 = vmatpush1.bf16.msra.mxu0 %v806_v26  ;;  %1508 = vmatprep.subr.bf16.mxu1 %v907_v39  ;;  %v919_v26 = vpack.c.bf16 %v595_v15, %v589_v17  ;;  %v588_v39 = vld [vmem:[#allocation4 + $0xc70] sm:$0xff]  ;;  %v824_v45 = vpack.c.bf16 %v404_v32, %v398_v35  ;;  %v619_v17 = vld [vmem:[#allocation4 + $0xd68] sm:$0xff]  ;;  %v830_v15 = vpack.c.bf16 %v416_v58, %v410_v57  ;;  %v446_v58 = vld [vmem:[#allocation4 + $0x800] sm:$0xff] }
  0xe4   :  { %1734 = vmatprep.subr.bf16.mxu0 %v813_v34  ;;  %1510 = vmatprep.mubr.bf16.mxu1 %v3997_v24  ;;  %v607_v34 = vld [vmem:[#allocation4 + $0xd08] sm:$0xff]  ;;  %v918_v41 = vpack.c.bf16 %v594_v9, %v588_v39  ;;  %v428_v35 = vld [vmem:[#allocation4 + $0x770] sm:$0xff] }
  0xe5   :  { %1736 = vmatprep.mubr.bf16.mxu0 %v3995_v23  ;;  %v417_v23 = vld [vmem:[#allocation4 + $0x718] sm:$0xff]  ;;  %v925_v47 = vpack.c.bf16 %v607_v34, %v601_v43  ;;  %v631_v39 = vld [vmem:[#allocation4 + $0xdc8] sm:$0xff]  ;;  %v836_v43 = vpack.c.bf16 %v428_v35, %v422_v0  ;;  %v434_v34 = vld [vmem:[#allocation4 + $0x7a0] sm:$0xff] }
  0xe6   :  { %1509 = vmatpush1.bf16.msra.mxu1 %v906_v48  ;;  %v600_v48 = vld [vmem:[#allocation4 + $0xcd0] sm:$0xff]  ;;  %v435_v9 = vld [vmem:[#allocation4 + $0x7a8] sm:$0xff] }
  0xe7   :  { %1735 = vmatpush1.bf16.msra.mxu0 %v812_v52  ;;  %1591 = vmatprep.subr.bf16.mxu1 %v913_v53  ;;  %v606_v52 = vld [vmem:[#allocation4 + $0xd00] sm:$0xff]  ;;  %v831_v53 = vpack.c.bf16 %v417_v23, %v411_v36 }
  0xe8   :  { %1817 = vmatprep.subr.bf16.mxu0 %v819_v2  ;;  %v429_v2 = vld [vmem:[#allocation4 + $0x778] sm:$0xff] }
  0xe9   :  { %1511 = vmatmul.mubr.bf16.vlgmr.msra.gmra.mrb[32].mxu1 %v4003_v29 }
  0xea   :  { %1737 = vmatmul.mubr.bf16.vlgmr.msra.gmra.mrb[32].mxu0 %v4001_v25  ;;  %1592 = vmatpush1.bf16.msra.mxu1 %v912_v6  ;;  %v924_v25 = vpack.c.bf16 %v606_v52, %v600_v48  ;;  %v618_v6 = vld [vmem:[#allocation4 + $0xd60] sm:$0xff]  ;;  %v447_v48 = vld [vmem:[#allocation4 + $0x808] sm:$0xff]  ;;  %v453_v52 = vld [vmem:[#allocation4 + $0x838] sm:$0xff] }
  0xeb   :  { %1818 = vmatpush1.bf16.msra.mxu0 %v818_v22  ;;  %1593 = vmatprep.subr.bf16.mxu1 %v919_v26  ;;  %v837_v22 = vpack.c.bf16 %v429_v2, %v423_v63  ;;  %v625_v26 = vld [vmem:[#allocation4 + $0xd98] sm:$0xff]  ;;  %v930_v32 = vpack.c.bf16 %v618_v6, %v612_v21  ;;  %v452_v63 = vld [vmem:[#allocation4 + $0x830] sm:$0xff]  ;;  %v655_v6 = vld [vmem:[#allocation4 + $0xe88] sm:$0xff] }
  0xec   :  { %1819 = vmatprep.subr.bf16.mxu0 %v825_v27  ;;  %1520 = vmatprep.mubr.bf16.mxu1 %v4008_v44  ;;  %v441_v27 = vld [vmem:[#allocation4 + $0x7d8] sm:$0xff]  ;;  %v937_v36 = vpack.c.bf16 %v631_v39, %v625_v26  ;;  %v458_v39 = vld [vmem:[#allocation4 + $0x860] sm:$0xff] }
  0xed   :  { %1746 = vmatprep.mubr.bf16.mxu0 %v4005_v40  ;;  %v931_v40 = vpack.c.bf16 %v619_v17, %v613_v8  ;;  %v843_v23 = vpack.c.bf16 %v441_v27, %v435_v9  ;;  %v459_v8 = vld [vmem:[#allocation4 + $0x868] sm:$0xff]  ;;  %v642_v17 = vld [vmem:[#allocation4 + $0xe20] sm:$0xff]  ;;  %v649_v21 = vld [vmem:[#allocation4 + $0xe58] sm:$0xff] }
  0xee   :  { %1594 = vmatpush1.bf16.msra.mxu1 %v918_v41  ;;  %v440_v41 = vld [vmem:[#allocation4 + $0x7d0] sm:$0xff]  ;;  %v471_v9 = vld [vmem:[#allocation4 + $0x8c8] sm:$0xff]  ;;  %v949_v27 = vpack.c.bf16 %v655_v6, %v649_v21 }
  0xef   :  { %1820 = vmatpush1.bf16.msra.mxu0 %v824_v45  ;;  %1595 = vmatprep.subr.bf16.mxu1 %v925_v47  ;;  %v624_v45 = vld [vmem:[#allocation4 + $0xd90] sm:$0xff]  ;;  %v630_v47 = vld [vmem:[#allocation4 + $0xdc0] sm:$0xff]  ;;  %v842_v57 = vpack.c.bf16 %v440_v41, %v434_v34 }
  0xf0   :  { %1821 = vmatprep.subr.bf16.mxu0 %v831_v53  ;;  %v643_v53 = vld [vmem:[#allocation4 + $0xe28] sm:$0xff]  ;;  %v936_v2 = vpack.c.bf16 %v630_v47, %v624_v45  ;;  %v654_v34 = vld [vmem:[#allocation4 + $0xe80] sm:$0xff]  ;;  %v476_v47 = vld [vmem:[#allocation4 + $0x8f0] sm:$0xff] }
  0xf1   :  { %1521 = vmatmul.mubr.bf16.gmra.mrb[36].mxu1 %v4015_v1  ;;  %v470_v45 = vld [vmem:[#allocation4 + $0x8c0] sm:$0xff]  ;;  %v672_v6 = vld [vmem:[#allocation4 + $0xf10] sm:$0xff] }
  0xf2   :  { %1747 = vmatmul.mubr.bf16.gmra.mrb[36].mxu0 %v4013_v61  ;;  %1596 = vmatpush1.bf16.msra.mxu1 %v924_v25  ;;  %v637_v61 = vld [vmem:[#allocation4 + $0xdf8] sm:$0xff]  ;;  %v849_v25 = vpack.c.bf16 %v453_v52, %v447_v48 }
  0xf3   :  { %1822 = vmatpush1.bf16.msra.mxu0 %v830_v15  ;;  %1530 = vmatprep.mubr.bf16.mxu1 %v4019_v11  ;;  %v465_v15 = vld [vmem:[#allocation4 + $0x898] sm:$0xff]  ;;  %v943_v0 = vpack.c.bf16 %v643_v53, %v637_v61  ;;  %v660_v53 = vld [vmem:[#allocation4 + $0xeb0] sm:$0xff] }
  0xf4   :  { %1823 = vmatprep.subr.bf16.mxu0 %v837_v22  ;;  %1756 = vmatprep.mubr.bf16.mxu0 %v4017_v10  ;;  %v636_v10 = vld [vmem:[#allocation4 + $0xdf0] sm:$0xff]  ;;  %v848_v22 = vpack.c.bf16 %v452_v63, %v446_v58  ;;  %v855_v26 = vpack.c.bf16 %v465_v15, %v459_v8  ;;  %v489_v52 = vld [vmem:[#allocation4 + $0x958] sm:$0xff]  ;;  %v679_v63 = vld [vmem:[#allocation4 + $0xf48] sm:$0xff] }
  0xf5   :  { %1597 = vmatprep.subr.bf16.mxu1 %v931_v40  ;;  %v942_v35 = vpack.c.bf16 %v642_v17, %v636_v10  ;;  %v464_v40 = vld [vmem:[#allocation4 + $0x890] sm:$0xff]  ;;  %v673_v58 = vld [vmem:[#allocation4 + $0xf18] sm:$0xff]  ;;  %v482_v8 = vld [vmem:[#allocation4 + $0x920] sm:$0xff] }
  0xf6   :  { %1598 = vmatpush1.bf16.msra.mxu1 %v930_v32  ;;  %v477_v32 = vld [vmem:[#allocation4 + $0x8f8] sm:$0xff]  ;;  %v488_v10 = vld [vmem:[#allocation4 + $0x950] sm:$0xff]  ;;  %v495_v17 = vld [vmem:[#allocation4 + $0x988] sm:$0xff]  ;;  %v961_v21 = vpack.c.bf16 %v679_v63, %v673_v58 }
  0xf7   :  { %1824 = vmatpush1.bf16.msra.mxu0 %v836_v43  ;;  %1599 = vmatprep.subr.bf16.mxu1 %v937_v36  ;;  %v648_v43 = vld [vmem:[#allocation4 + $0xe50] sm:$0xff]  ;;  %v661_v36 = vld [vmem:[#allocation4 + $0xeb8] sm:$0xff]  ;;  %v861_v41 = vpack.c.bf16 %v477_v32, %v471_v9  ;;  %v507_v9 = vld [vmem:[#allocation4 + $0x9e8] sm:$0xff] }
  0xf8   :  { %1825 = vmatprep.subr.bf16.mxu0 %v843_v23  ;;  %v854_v23 = vpack.c.bf16 %v464_v40, %v458_v39  ;;  %v948_v48 = vpack.c.bf16 %v654_v34, %v648_v43  ;;  %v494_v40 = vld [vmem:[#allocation4 + $0x980] sm:$0xff]  ;;  %v513_v32 = vld [vmem:[#allocation4 + $0xa18] sm:$0xff]  ;;  %v684_v34 = vld [vmem:[#allocation4 + $0xf70] sm:$0xff] }
  0xf9   :  { %1531 = vmatmul.mubr.bf16.gmra.mrb[40].mxu1 %v4027_v42  ;;  %v709_v58 = vld [vmem:[#allocation4 + $0x1038] sm:$0xff]  ;;  %v715_v63 = vld [vmem:[#allocation4 + $0x1068] sm:$0xf] }
  0xfa   :  { %1757 = vmatmul.mubr.bf16.gmra.mrb[40].mxu0 %v4025_v37  ;;  %1540 = vmatprep.mubr.bf16.mxu1 %v4031_v51  ;;  %v667_v37 = vld [vmem:[#allocation4 + $0xee8] sm:$0xff] }
  0xfb   :  { %1826 = vmatpush1.bf16.msra.mxu0 %v842_v57  ;;  %1600 = vmatpush1.bf16.msra.mxu1 %v936_v2  ;;  %v955_v61 = vpack.c.bf16 %v667_v37, %v661_v36  ;;  %v666_v57 = vld [vmem:[#allocation4 + $0xee0] sm:$0xff]  ;;  %v860_v2 = vpack.c.bf16 %v476_v47, %v470_v45  ;;  %v697_v37 = vld [vmem:[#allocation4 + $0xfd8] sm:$0xff]  ;;  %v879_v47 = vpack.c.bf16 %v513_v32, %v507_v9  ;;  %v543_v9 = vld [vmem:[#allocation4 + $0xb08] sm:$0xff] }
  0xfc   :  { %1827 = vmatprep.subr.bf16.mxu0 %v849_v25  ;;  %1766 = vmatprep.mubr.bf16.mxu0 %v4029_v50  ;;  %v483_v50 = vld [vmem:[#allocation4 + $0x928] sm:$0xff]  ;;  %v954_v15 = vpack.c.bf16 %v666_v57, %v660_v53  ;;  %v690_v36 = vld [vmem:[#allocation4 + $0xfa0] sm:$0xff]  ;;  %v696_v57 = vld [vmem:[#allocation4 + $0xfd0] sm:$0xff] }
  0xfd   :  { %1601 = vmatprep.subr.bf16.mxu1 %v943_v0  ;;  %v867_v25 = vpack.c.bf16 %v489_v52, %v483_v50  ;;  %v501_v0 = vld [vmem:[#allocation4 + $0x9b8] sm:$0xff]  ;;  %v506_v45 = vld [vmem:[#allocation4 + $0x9e0] sm:$0xff]  ;;  %v512_v50 = vld [vmem:[#allocation4 + $0xa10] sm:$0xff] }
  0xfe   :  { %v873_v39 = vpack.c.bf16 %v501_v0, %v495_v17  ;;  %v525_v52 = vld [vmem:[#allocation4 + $0xa78] sm:$0xff]  ;;  %v524_v17 = vld [vmem:[#allocation4 + $0xa70] sm:$0xff]  ;;  %v531_v0 = vld [vmem:[#allocation4 + $0xaa8] sm:$0xff] }
  0xff   :  { %1828 = vmatpush1.bf16.msra.mxu0 %v848_v22  ;;  %1602 = vmatpush1.bf16.msra.mxu1 %v942_v35  ;;  %v685_v22 = vld [vmem:[#allocation4 + $0xf78] sm:$0xff]  ;;  %v691_v35 = vld [vmem:[#allocation4 + $0xfa8] sm:$0xff] }
 0x100   :  { %1829 = vmatprep.subr.bf16.mxu0 %v855_v26  ;;  %1603 = vmatprep.subr.bf16.mxu1 %v949_v27  ;;  %v866_v26 = vpack.c.bf16 %v488_v10, %v482_v8  ;;  %v967_v43 = vpack.c.bf16 %v691_v35, %v685_v22  ;;  %v878_v8 = vpack.c.bf16 %v512_v50, %v506_v45  ;;  %v518_v10 = vld [vmem:[#allocation4 + $0xa40] sm:$0xff]  ;;  %v579_v22 = vld [vmem:[#allocation4 + $0xc28] sm:$0xff]  ;;  %v585_v35 = vld [vmem:[#allocation4 + $0xc58] sm:$0xff] }
 0x101   :  { %1541 = vmatmul.mubr.bf16.gmra.mrb[44].mxu1 %v4039_v19  ;;  %v560_v50 = vld [vmem:[#allocation4 + $0xb90] sm:$0xff] }
 0x102   :  { %1767 = vmatmul.mubr.bf16.gmra.mrb[44].mxu0 %v4037_v14  ;;  %1550 = vmatprep.mubr.bf16.mxu1 %v4043_v31  ;;  %v678_v14 = vld [vmem:[#allocation4 + $0xf40] sm:$0xff] }
 0x103   :  { %1830 = vmatpush1.bf16.msra.mxu0 %v854_v23  ;;  %1776 = vmatprep.mubr.bf16.mxu0 %v4041_v30  ;;  %v500_v30 = vld [vmem:[#allocation4 + $0x9b0] sm:$0xff]  ;;  %v960_v27 = vpack.c.bf16 %v678_v14, %v672_v6  ;;  %v703_v23 = vld [vmem:[#allocation4 + $0x1008] sm:$0xff]  ;;  %v979_v6 = vpack.c.bf16 %v715_v63, %v709_v58 }
 0x104   :  { %1831 = vmatprep.subr.bf16.mxu0 %v861_v41  ;;  %1604 = vmatpush1.bf16.msra.mxu1 %v948_v48  ;;  %v872_v41 = vpack.c.bf16 %v500_v30, %v494_v40  ;;  %v519_v48 = vld [vmem:[#allocation4 + $0xa48] sm:$0xff]  ;;  %v973_v53 = vpack.c.bf16 %v703_v23, %v697_v37  ;;  %v530_v40 = vld [vmem:[#allocation4 + $0xaa0] sm:$0xff]  ;;  %v536_v30 = vld [vmem:[#allocation4 + $0xad0] sm:$0xff] }
 0x105   :  { %1605 = vmatprep.subr.bf16.mxu1 %v955_v61  ;;  %v966_v61 = vpack.c.bf16 %v690_v36, %v684_v34  ;;  %v542_v36 = vld [vmem:[#allocation4 + $0xb00] sm:$0xff]  ;;  %v548_v37 = vld [vmem:[#allocation4 + $0xb30] sm:$0xff]  ;;  %v561_v23 = vld [vmem:[#allocation4 + $0xb98] sm:$0xff] }
 0x106   :  { %v584_v58 = vld [vmem:[#allocation4 + $0xc50] sm:$0xff]  ;;  %v591_v63 = vld [vmem:[#allocation4 + $0xc88] sm:$0xff] }
 0x107   :  { %1832 = vmatpush1.bf16.msra.mxu0 %v860_v2  ;;  %v708_v2 = vld [vmem:[#allocation4 + $0x1030] sm:$0xff] }
 0x108   :  { %1833 = vmatprep.subr.bf16.mxu0 %v867_v25  ;;  %1606 = vmatpush1.bf16.msra.mxu1 %v954_v15  ;;  %v714_v25 = vld [vmem:[#allocation4 + $0x1060] sm:$0xf] }
 0x109   :  { %1551 = vmatmul.mubr.bf16.gmra.mrb[48].mxu1 %v4051_v3  ;;  %1607 = vmatprep.subr.bf16.mxu1 %v961_v21  ;;  %v537_v21 = vld [vmem:[#allocation4 + $0xad8] sm:$0xff]  ;;  %v978_v14 = vpack.c.bf16 %v714_v25, %v708_v2 }
 0x10a   :  { %1777 = vmatmul.mubr.bf16.gmra.mrb[48].mxu0 %v4049_v60  ;;  %1560 = vmatprep.mubr.bf16.mxu1 %v4055_v13  ;;  %v702_v60 = vld [vmem:[#allocation4 + $0x1000] sm:$0xff]  ;;  %v597_v2 = vld [vmem:[#allocation4 + $0xcb8] sm:$0xff] }
 0x10b   :  { %1834 = vmatpush1.bf16.msra.mxu0 %v866_v26  ;;  %1786 = vmatprep.mubr.bf16.mxu0 %v4053_v12  ;;  %v885_v12 = vpack.c.bf16 %v525_v52, %v519_v48  ;;  %v972_v15 = vpack.c.bf16 %v702_v60, %v696_v57  ;;  %v884_v26 = vpack.c.bf16 %v524_v17, %v518_v10  ;;  %v1015_v32 = vsel %vm1007_vm0, %v978_v14, 0  ;;  %v567_v48 = vld [vmem:[#allocation4 + $0xbc8] sm:$0xff]  ;;  %v573_v52 = vld [vmem:[#allocation4 + $0xbf8] sm:$0xff]  ;;  %v566_v57 = vld [vmem:[#allocation4 + $0xbc0] sm:$0xff] }
 0x10c   :  { %1835 = vmatprep.subr.bf16.mxu0 %v873_v39  ;;  %1608 = vmatpush1.bf16.msra.mxu1 %v960_v27  ;;  %v891_v39 = vpack.c.bf16 %v537_v21, %v531_v0  ;;  %v549_v27 = vld [vmem:[#allocation4 + $0xb38] sm:$0xff]  ;;  %v572_v60 = vld [vmem:[#allocation4 + $0xbf0] sm:$0xff]  ;;  %v603_v17 = vld [vmem:[#allocation4 + $0xce8] sm:$0xff] }
 0x10d   :  { %1609 = vmatprep.subr.bf16.mxu1 %v967_v43  ;;  %v890_v43 = vpack.c.bf16 %v536_v30, %v530_v40  ;;  %v897_v34 = vpack.c.bf16 %v549_v27, %v543_v9  ;;  %v596_v10 = vld [vmem:[#allocation4 + $0xcb0] sm:$0xff]  ;;  %v602_v0 = vld [vmem:[#allocation4 + $0xce0] sm:$0xff]  ;;  %v621_v14 = vld [vmem:[#allocation4 + $0xd78] sm:$0xff] }
 0x10e   :  { %v608_v21 = vld [vmem:[#allocation4 + $0xd10] sm:$0xff]  ;;  %v633_v40 = vld [vmem:[#allocation4 + $0xdd8] sm:$0xff]  ;;  %v626_v27 = vld [vmem:[#allocation4 + $0xda0] sm:$0xff] }
 0x10f   :  { %1836 = vmatpush1.bf16.msra.mxu0 %v872_v41  ;;  %v896_v41 = vpack.c.bf16 %v548_v37, %v542_v36  ;;  %v638_v36 = vld [vmem:[#allocation4 + $0xe00] sm:$0xff]  ;;  %v644_v37 = vld [vmem:[#allocation4 + $0xe30] sm:$0xff] }
 0x110   :  { %1837 = vmatprep.subr.bf16.mxu0 %v879_v47  ;;  %1610 = vmatpush1.bf16.msra.mxu1 %v966_v61  ;;  %v554_v47 = vld [vmem:[#allocation4 + $0xb60] sm:$0xff] }
 0x111   :  { %1561 = vmatmul.mubr.bf16.gmra.mrb[52].mxu1 %v4063_v56  ;;  %1611 = vmatprep.subr.bf16.mxu1 %v973_v53  ;;  %v902_v61 = vpack.c.bf16 %v560_v50, %v554_v47  ;;  %v909_v53 = vpack.c.bf16 %v573_v52, %v567_v48  ;;  %v650_v48 = vld [vmem:[#allocation4 + $0xe60] sm:$0xff]  ;;  %v656_v52 = vld [vmem:[#allocation4 + $0xe90] sm:$0xff] }
 0x112   :  { %1787 = vmatmul.mubr.bf16.gmra.mrb[52].mxu0 %v4061_v49  ;;  %1570 = vmatprep.mubr.bf16.mxu1 %v4067_v5  ;;  %v915_v49 = vpack.c.bf16 %v585_v35, %v579_v22  ;;  %v926_v22 = vpack.c.bf16 %v608_v21, %v602_v0  ;;  %v620_v35 = vld [vmem:[#allocation4 + $0xd70] sm:$0xff]  ;;  %v687_v0 = vld [vmem:[#allocation4 + $0xf88] sm:$0xff]  ;;  %v693_v21 = vld [vmem:[#allocation4 + $0xfb8] sm:$0xff] }
 0x113   :  { %1838 = vmatpush1.bf16.msra.mxu0 %v878_v8  ;;  %1796 = vmatprep.mubr.bf16.mxu0 %v4065_v4  ;;  %v555_v4 = vld [vmem:[#allocation4 + $0xb68] sm:$0xff]  ;;  %v921_v8 = vpack.c.bf16 %v597_v2, %v591_v63  ;;  %v5424_v63 = vld [vmem:[#allocation11_spill] sm:$0xff] }
 0x114   :  { %1839 = vmatprep.subr.bf16.mxu0 %v885_v12  ;;  %1612 = vmatpush1.bf16.msra.mxu1 %v972_v15  ;;  %v903_v45 = vpack.c.bf16 %v561_v23, %v555_v4  ;;  %v590_v12 = vld [vmem:[#allocation4 + $0xc80] sm:$0xff]  ;;  %v5422_v4 = vld [vmem:[#allocation9_spill] sm:$0xff] }
 0x115   :  { %3606 = vmatprep.subr.msk.bf16.mxu1 %vm1007_vm0, %v979_v6  ;;  %v920_v15 = vpack.c.bf16 %v596_v10, %v590_v12  ;;  %v615_v6 = vld [vmem:[#allocation4 + $0xd48] sm:$0xff] }
 0x116   :  { %v651_v23 = vld [vmem:[#allocation4 + $0xe68] sm:$0xff] }
 0x117   :  { %1840 = vmatpush1.bf16.msra.mxu0 %v884_v26  ;;  %v933_v26 = vpack.c.bf16 %v621_v14, %v615_v6  ;;  %v675_v2 = vld [vmem:[#allocation4 + $0xf28] sm:$0xff]  ;;  %v969_v14 = vpack.c.bf16 %v693_v21, %v687_v0 }
 0x118   :  { %1841 = vmatprep.subr.bf16.mxu0 %v891_v39  ;;  %1614 = vmatpush1.bf16.msra.mxu1 %v1015_v32  ;;  %v627_v39 = vld [vmem:[#allocation4 + $0xda8] sm:$0xff]  ;;  %v632_v32 = vld [vmem:[#allocation4 + $0xdd0] sm:$0xff] }
 0x119   :  { %1571 = vmatmul.mubr.bf16.gmra.mrb[56].mxu1 %v4077_v46  ;;  %3624 = vmatprep.subr.bf16.mxu1 %v915_v49  ;;  %v939_v9 = vpack.c.bf16 %v633_v40, %v627_v39  ;;  %v705_v39 = vld [vmem:[#allocation4 + $0x1018] sm:$0xff]  ;;  %v5427_v40 = vld [vmem:[#allocation14_spill] sm:$0xff] }
 0x11a   :  { %1797 = vmatmul.mubr.bf16.gmra.mrb[56].mxu0 %v4073_v38  ;;  %1580 = vmatprep.mubr.bf16.mxu1 %v4081_v55  ;;  %v908_v38 = vpack.c.bf16 %v572_v60, %v566_v57  ;;  %v669_v57 = vld [vmem:[#allocation4 + $0xef8] sm:$0xff] }
 0x11b   :  { %1842 = vmatpush1.bf16.msra.mxu0 %v890_v43  ;;  %1806 = vmatprep.mubr.bf16.mxu0 %v4079_v54  ;;  %v578_v54 = vld [vmem:[#allocation4 + $0xc20] sm:$0xff]  ;;  %v645_v43 = vld [vmem:[#allocation4 + $0xe38] sm:$0xff] }
 0x11c   :  { %1843 = vmatprep.subr.bf16.mxu0 %v897_v34  ;;  %v914_v25 = vpack.c.bf16 %v584_v58, %v578_v54  ;;  %v938_v34 = vpack.c.bf16 %v632_v32, %v626_v27  ;;  %v662_v54 = vld [vmem:[#allocation4 + $0xec0] sm:$0xff]  ;;  %v668_v58 = vld [vmem:[#allocation4 + $0xef0] sm:$0xff] }
 0x11d   :  { %v956_v12 = vpack.c.bf16 %v668_v58, %v662_v54  ;;  %v698_v32 = vld [vmem:[#allocation4 + $0xfe0] sm:$0xff] }
 0x11f   :  { %1844 = vmatpush1.bf16.msra.mxu0 %v896_v41  ;;  %v657_v41 = vld [vmem:[#allocation4 + $0xe98] sm:$0xff] }
 0x120   :  { %1845 = vmatprep.subr.bf16.mxu0 %v903_v45  ;;  %v944_v45 = vpack.c.bf16 %v644_v37, %v638_v36  ;;  %v951_v50 = vpack.c.bf16 %v657_v41, %v651_v23  ;;  %v716_v36 = vld [vmem:[#allocation4 + $0x1070] sm:$0xf] }
 0x121   :  { %1581 = vmatmul.mubr.bf16.gmra.mrb[60].mxu1 %v4089_v20 }
 0x122   :  { %1807 = vmatmul.mubr.bf16.gmra.mrb[60].mxu0 %v4087_v18  ;;  %3607 = vmatprep.mubr.msk.bf16.mxu1 %vm982_vm1, %v4091_v28  ;;  %v609_v18 = vld [vmem:[#allocation4 + $0xd18] sm:$0xff] }
 0x123   :  { %1846 = vmatpush1.bf16.msra.mxu0 %v902_v61  ;;  %1849 = vmatprep.mubr.bf16.mxu0 %v3997_v24  ;;  %v927_v24 = vpack.c.bf16 %v609_v18, %v603_v17  ;;  %v674_v18 = vld [vmem:[#allocation4 + $0xf20] sm:$0xff] }
 0x124   :  { %1847 = vmatprep.subr.bf16.mxu0 %v909_v53  ;;  %v663_v53 = vld [vmem:[#allocation4 + $0xec8] sm:$0xff] }
 0x127   :  { %1848 = vmatpush1.bf16.msra.mxu0 %v908_v38  ;;  %v957_v38 = vpack.c.bf16 %v669_v57, %v663_v53 }
 0x128   :  { %1930 = vmatprep.subr.bf16.mxu0 %v915_v49  ;;  %v639_v49 = vld [vmem:[#allocation4 + $0xe08] sm:$0xff] }
 0x129   :  { %1624 = vmatmul.mubr.bf16.vlgmr.msra.gmra.mrb[32].mxu1 %v4098_v62 }
 0x12a   :  { %1850 = vmatmul.mubr.bf16.vlgmr.msra.gmra.mrb[32].mxu0 %v4003_v29  ;;  %3636 = vmatpush1.bf16.msra.mxu1 %v914_v25  ;;  %v614_v29 = vld [vmem:[#allocation4 + $0xd40] sm:$0xff] }
 0x12b   :  { %1931 = vmatpush1.bf16.msra.mxu0 %v914_v25  ;;  %3625 = vmatprep.subr.bf16.mxu1 %v921_v8  ;;  %v932_v30 = vpack.c.bf16 %v620_v35, %v614_v29  ;;  %v681_v25 = vld [vmem:[#allocation4 + $0xf58] sm:$0xff]  ;;  %v692_v29 = vld [vmem:[#allocation4 + $0xfb0] sm:$0xff]  ;;  %v5426_v35 = vld [vmem:[#allocation13_spill] sm:$0xff] }
 0x12c   :  { %1932 = vmatprep.subr.bf16.mxu0 %v921_v8  ;;  %3608 = vmatprep.mubr.msk.bf16.mxu1 %vm982_vm1, %v4100_v16  ;;  %v5425_v8 = vld [vmem:[#allocation12_spill] sm:$0xff]  ;;  %v963_v17 = vpack.c.bf16 %v681_v25, %v675_v2 }
 0x12d   :  { %1859 = vmatprep.mubr.bf16.mxu0 %v4008_v44  ;;  %v5421_v44 = vld [vmem:[#allocation8_spill] sm:$0xff] }
 0x12e   :  { %3637 = vmatpush1.bf16.msra.mxu1 %v920_v15 }
 0x12f   :  { %1933 = vmatpush1.bf16.msra.mxu0 %v920_v15  ;;  %3626 = vmatprep.subr.bf16.mxu1 %v927_v24  ;;  %v680_v15 = vld [vmem:[#allocation4 + $0xf50] sm:$0xff] }
 0x130   :  { %1934 = vmatprep.subr.bf16.mxu0 %v927_v24 }
 0x131   :  { %1634 = vmatmul.mubr.bf16.gmra.mrb[36].mxu1 %v4107_v59 }
 0x132   :  { %1860 = vmatmul.mubr.bf16.gmra.mrb[36].mxu0 %v4015_v1  ;;  %3638 = vmatpush1.bf16.msra.mxu1 %v926_v22  ;;  %v945_v1 = vpack.c.bf16 %v645_v43, %v639_v49  ;;  %v704_v49 = vld [vmem:[#allocation4 + $0x1010] sm:$0xff]  ;;  %v711_v43 = vld [vmem:[#allocation4 + $0x1048] sm:$0xff] }
 0x133   :  { %1935 = vmatpush1.bf16.msra.mxu0 %v926_v22  ;;  %3609 = vmatprep.mubr.msk.bf16.mxu1 %vm982_vm1, %v5421_v44  ;;  %v686_v22 = vld [vmem:[#allocation4 + $0xf80] sm:$0xff] }
 0x134   :  { %1869 = vmatprep.mubr.bf16.mxu0 %v4019_v11  ;;  %1936 = vmatprep.subr.bf16.mxu0 %v933_v26  ;;  %v5423_v11 = vld [vmem:[#allocation10_spill] sm:$0xff] }
 0x135   :  { %3627 = vmatprep.subr.bf16.mxu1 %v933_v26  ;;  %v699_v26 = vld [vmem:[#allocation4 + $0xfe8] sm:$0xff] }
 0x136   :  { %3639 = vmatpush1.bf16.msra.mxu1 %v932_v30  ;;  %v975_v27 = vpack.c.bf16 %v705_v39, %v699_v26 }
 0x137   :  { %1937 = vmatpush1.bf16.msra.mxu0 %v932_v30  ;;  %3628 = vmatprep.subr.bf16.mxu1 %v939_v9  ;;  %v968_v30 = vpack.c.bf16 %v692_v29, %v686_v22 }
 0x138   :  { %1938 = vmatprep.subr.bf16.mxu0 %v939_v9 }
 0x139   :  { %1644 = vmatmul.mubr.bf16.gmra.mrb[40].mxu1 %v5422_v4 }
 0x13a   :  { %1870 = vmatmul.mubr.bf16.gmra.mrb[40].mxu0 %v4027_v42  ;;  %3610 = vmatprep.mubr.msk.bf16.mxu1 %vm982_vm1, %v5423_v11 }
 0x13b   :  { %1879 = vmatprep.mubr.bf16.mxu0 %v4031_v51  ;;  %1939 = vmatpush1.bf16.msra.mxu0 %v938_v34  ;;  %v950_v51 = vpack.c.bf16 %v656_v52, %v650_v48  ;;  %v5429_v48 = vld [vmem:[#allocation16_spill] sm:$0xff] }
 0x13c   :  { %v4217_v47 = vpop.f32.mrb[0].mxu1  ;;  %3640 = vmatpush1.bf16.msra.mxu1 %v938_v34  ;;  %1940 = vmatprep.subr.bf16.mxu0 %v945_v1 }
 0x13d   :  { %v4219_v61 = vpop.f32.mrb[1].mxu1  ;;  %3629 = vmatprep.subr.bf16.mxu1 %v945_v1  ;;  %v717_v1 = vld [vmem:[#allocation4 + $0x1078] sm:$0xf] }
 0x13e   :  { %v4221_v42 = vpop.f32.mrb[2].mxu1  ;;  %v981_v41 = vpack.c.bf16 %v717_v1, %v711_v43 }
 0x13f   :  { %v4223_v60 = vpop.f32.mrb[3].mxu1  ;;  %1941 = vmatpush1.bf16.msra.mxu0 %v944_v45 }
 0x140   :  { %3641 = vmatpush1.bf16.msra.mxu1 %v944_v45  ;;  %1942 = vmatprep.subr.bf16.mxu0 %v951_v50 }
 0x141   :  { %1654 = vmatmul.mubr.bf16.gmra.mrb[44].mxu1 %v5424_v63  ;;  %3630 = vmatprep.subr.bf16.mxu1 %v951_v50  ;;  %v5428_v50 = vld [vmem:[#allocation15_spill] sm:$0xff] }
 0x142   :  { %1880 = vmatmul.mubr.bf16.gmra.mrb[44].mxu0 %v4039_v19  ;;  %3611 = vmatprep.mubr.msk.bf16.mxu1 %vm982_vm1, %v5425_v8 }
 0x143   :  { %1889 = vmatprep.mubr.bf16.mxu0 %v4043_v31  ;;  %1943 = vmatpush1.bf16.msra.mxu0 %v950_v51  ;;  %v962_v31 = vpack.c.bf16 %v680_v15, %v674_v18 }
 0x144   :  { %v4230_v10 = vpop.f32.mrb[4].mxu1  ;;  %3642 = vmatpush1.bf16.msra.mxu1 %v950_v51  ;;  %1944 = vmatprep.subr.bf16.mxu0 %v957_v38 }
 0x145   :  { %v4232_v24 = vpop.f32.mrb[5].mxu1  ;;  %3631 = vmatprep.subr.bf16.mxu1 %v957_v38 }
 0x146   :  { %v4234_v19 = vpop.f32.mrb[6].mxu1 }
 0x147   :  { %v4236_v6 = vpop.f32.mrb[7].mxu1  ;;  %1945 = vmatpush1.bf16.msra.mxu0 %v956_v12 }
 0x148   :  { %3643 = vmatpush1.bf16.msra.mxu1 %v956_v12  ;;  %1946 = vmatprep.subr.bf16.mxu0 %v963_v17 }
 0x149   :  { %1664 = vmatmul.mubr.bf16.gmra.mrb[48].mxu1 %v5426_v35  ;;  %3632 = vmatprep.subr.bf16.mxu1 %v963_v17 }
 0x14a   :  { %1890 = vmatmul.mubr.bf16.gmra.mrb[48].mxu0 %v4051_v3  ;;  %3612 = vmatprep.mubr.msk.bf16.mxu1 %vm982_vm1, %v5427_v40  ;;  %v710_v3 = vld [vmem:[#allocation4 + $0x1040] sm:$0xff] }
 0x14b   :  { %1899 = vmatprep.mubr.bf16.mxu0 %v4055_v13  ;;  %1947 = vmatpush1.bf16.msra.mxu0 %v962_v31  ;;  %v974_v13 = vpack.c.bf16 %v704_v49, %v698_v32  ;;  %v980_v45 = vpack.c.bf16 %v716_v36, %v710_v3 }
 0x14c   :  { %v4243_v9 = vpop.f32.mrb[8].mxu1  ;;  %3644 = vmatpush1.bf16.msra.mxu1 %v962_v31  ;;  %1948 = vmatprep.subr.bf16.mxu0 %v969_v14 }
 0x14d   :  { %v4245_v34 = vpop.f32.mrb[9].mxu1  ;;  %3633 = vmatprep.subr.bf16.mxu1 %v969_v14  ;;  %v1021_v53 = vsel %vm1007_vm0, %v980_v45, 0 }
 0x14e   :  { %v4247_v37 = vpop.f32.mrb[10].mxu1 }
 0x14f   :  { %v4249_v23 = vpop.f32.mrb[11].mxu1  ;;  %1949 = vmatpush1.bf16.msra.mxu0 %v968_v30 }
 0x150   :  { %3645 = vmatpush1.bf16.msra.mxu1 %v968_v30  ;;  %1950 = vmatprep.subr.bf16.mxu0 %v975_v27 }
 0x151   :  { %1674 = vmatmul.mubr.bf16.gmra.mrb[52].mxu1 %v5428_v50  ;;  %3634 = vmatprep.subr.bf16.mxu1 %v975_v27 }
 0x152   :  { %1900 = vmatmul.mubr.bf16.gmra.mrb[52].mxu0 %v4063_v56  ;;  %3613 = vmatprep.mubr.msk.bf16.mxu1 %vm982_vm1, %v5429_v48 }
 0x153   :  { %1909 = vmatprep.mubr.bf16.mxu0 %v4067_v5  ;;  %1951 = vmatpush1.bf16.msra.mxu0 %v974_v13  ;;  %v5430_v5 = vld [vmem:[#allocation17_spill] sm:$0xff] }
 0x154   :  { %v4256_v52 = vpop.f32.mrb[12].mxu1  ;;  %3646 = vmatpush1.bf16.msra.mxu1 %v974_v13  ;;  %3615 = vmatprep.subr.msk.bf16.mxu0 %vm1007_vm0, %v981_v41 }
 0x155   :  { %v4260_v57 = vpop.f32.mrb[13].mxu1  ;;  %3635 = vmatprep.subr.msk.bf16.mxu1 %vm1007_vm0, %v981_v41 }
 0x156   :  { %v4263_v51 = vpop.f32.mrb[14].mxu1 }
 0x157   :  { %v4265_v56 = vpop.f32.mrb[15].mxu1  ;;  %1953 = vmatpush1.bf16.msra.mxu0 %v1021_v53 }
 0x158   :  { %3647 = vmatpush1.bf16.msra.mxu1 %v1021_v53 }
 0x159   :  { %1684 = vmatmul.mubr.bf16.gmra.mrb[56].mxu1 %v4152_v33 }
 0x15a   :  { %1910 = vmatmul.mubr.bf16.gmra.mrb[56].mxu0 %v4077_v46  ;;  %3614 = vmatprep.mubr.msk.bf16.mxu1 %vm982_vm1, %v5430_v5 }
 0x15b   :  { %1919 = vmatprep.mubr.bf16.mxu0 %v4081_v55 }
 0x15c   :  { %v4272_v38 = vpop.f32.mrb[16].mxu1 }
 0x15d   :  { %v4274_v54 = vpop.f32.mrb[17].mxu1 }
 0x15e   :  { %v4276_v58 = vpop.f32.mrb[18].mxu1 }
 0x15f   :  { %v4278_v2 = vpop.f32.mrb[19].mxu1 }
 0x161   :  { %1694 = vmatmul.mubr.bf16.gmra.mrb[60].mxu1 %v4161_v7 }
 0x162   :  { %1920 = vmatmul.mubr.bf16.gmra.mrb[60].mxu0 %v4089_v20  ;;  %3620 = vmatprep.mubr.msk.bf16.mxu1 %vm982_vm1, %v5425_v8 }
 0x163   :  { %3616 = vmatprep.mubr.msk.bf16.mxu0 %vm982_vm1, %v4091_v28 }
 0x164   :  { %v4286_v46 = vpop.f32.mrb[20].mxu1 }
 0x165   :  { %v4288_v55 = vpop.f32.mrb[21].mxu1 }
 0x166   :  { %v4290_v25 = vpop.f32.mrb[22].mxu1 }
 0x167   :  { %v4292_v12 = vpop.f32.mrb[23].mxu1 }
 0x169   :  { %2003 = vmatmul.mubr.bf16.vlgmr.msra.gmra.mrb[64].mxu1 %v5426_v35 }
 0x16a   :  { %1963 = vmatmul.mubr.bf16.vlgmr.msra.gmra.mrb[32].mxu0 %v4098_v62  ;;  %3621 = vmatprep.mubr.msk.bf16.mxu1 %vm982_vm1, %v5427_v40 }
 0x16b   :  { %3617 = vmatprep.mubr.msk.bf16.mxu0 %vm982_vm1, %v4100_v16 }
 0x16c   :  { %v4300_v20 = vpop.f32.mrb[24].mxu1 }
 0x16d   :  { %v4302_v28 = vpop.f32.mrb[25].mxu1 }
 0x16e   :  { %v4304_v8 = vpop.f32.mrb[26].mxu1 }
 0x16f   :  { %v4306_v17 = vpop.f32.mrb[27].mxu1 }
 0x171   :  { %2013 = vmatmul.mubr.bf16.gmra.mrb[68].mxu1 %v5428_v50 }
 0x172   :  { %1973 = vmatmul.mubr.bf16.gmra.mrb[36].mxu0 %v4107_v59  ;;  %3622 = vmatprep.mubr.msk.bf16.mxu1 %vm982_vm1, %v5429_v48 }
 0x173   :  { %3618 = vmatprep.mubr.msk.bf16.mxu0 %vm982_vm1, %v5421_v44 }
 0x174   :  { %v4314_v62 = vpop.f32.mrb[28].mxu1 }
 0x175   :  { %v4316_v16 = vpop.f32.mrb[29].mxu1 }
 0x176   :  { %v4318_v18 = vpop.f32.mrb[30].mxu1 }
 0x177   :  { %v4320_v15 = vpop.f32.mrb[31].mxu1 }
 0x179   :  { %2023 = vmatmul.mubr.bf16.gmra.mrb[72].mxu1 %v4152_v33 }
 0x17a   :  { %1983 = vmatmul.mubr.bf16.gmra.mrb[40].mxu0 %v5422_v4  ;;  %3623 = vmatprep.mubr.msk.bf16.mxu1 %vm982_vm1, %v5430_v5 }
 0x17b   :  { %3619 = vmatprep.mubr.msk.bf16.mxu0 %vm982_vm1, %v5423_v11 }
 0x17d   :  { %v1286_v59 = vpop.f32.mrb[0].mxu0 }
 0x17e   :  { %v4329_v44 = vadd.f32 %v1286_v59, %v4217_v47  ;;  %v1288_v0 = vpop.f32.mrb[1].mxu0 }
 0x17f   :  { %v4332_v21 = vadd.f32 %v1288_v0, %v4219_v61  ;;  %v1290_v31 = vpop.f32.mrb[2].mxu0 }
 0x180   :  { %v4335_v14 = vadd.f32 %v1290_v31, %v4221_v42  ;;  %v1292_v33 = vpop.f32.mrb[3].mxu0 }
 0x181   :  { %5431 = vst [vmem:[#allocation8_spill] sm:$0xff] %v4332_v21  ;;  %v4338_v4 = vadd.f32 %v1292_v33, %v4223_v60  ;;  %2033 = vmatmul.mubr.bf16.gmra.mrb[76].mxu1 %v4161_v7 }
 0x182   :  { %5432 = vst [vmem:[#allocation9_spill] sm:$0xff] %v4335_v14  ;;  %1993 = vmatmul.mubr.bf16.gmra.mrb[44].mxu0 %v5424_v63 }
 0x183   :  { %5433 = vst [vmem:[#allocation10_spill] sm:$0xff] %v4338_v4 }
 0x185   :  { %v1296_v11 = vpop.f32.mrb[4].mxu0 }
 0x186   :  { %v4343_v47 = vadd.f32 %v1296_v11, %v4230_v10  ;;  %v1298_v22 = vpop.f32.mrb[5].mxu0 }
 0x187   :  { %v4346_v61 = vadd.f32 %v1298_v22, %v4232_v24  ;;  %v1300_v29 = vpop.f32.mrb[6].mxu0  ;;  %v5320_v22 = vlaneseq }
 0x188   :  { %5434 = vst [vmem:[#allocation11_spill] sm:$0xff] %v4343_v47  ;;  %v4349_v42 = vadd.f32 %v1300_v29, %v4234_v19  ;;  %v1302_v35 = vpop.f32.mrb[7].mxu0 }
 0x189   :  { %5435 = vst [vmem:[#allocation12_spill] sm:$0xff] %v4346_v61  ;;  %v4352_v60 = vadd.f32 %v1302_v35, %v4236_v6 }
 0x18a   :  { %5436 = vst [vmem:[#allocation13_spill] sm:$0xff] %v4349_v42 }
 0x18b   :  { %5437 = vst [vmem:[#allocation14_spill] sm:$0xff] %v4352_v60 }
 0x18d   :  { %v1306_v26 = vpop.f32.mrb[8].mxu0 }
 0x18e   :  { %v4355_v7 = vadd.f32 %v1306_v26, %v4243_v9  ;;  %v1308_v63 = vpop.f32.mrb[9].mxu0 }
 0x18f   :  { %v4358_v10 = vadd.f32 %v1308_v63, %v4245_v34  ;;  %v1310_v39 = vpop.f32.mrb[10].mxu0 }
 0x190   :  { %5438 = vst [vmem:[#allocation15_spill] sm:$0xff] %v4355_v7  ;;  %v4361_v24 = vadd.f32 %v1310_v39, %v4247_v37  ;;  %v1312_v40 = vpop.f32.mrb[11].mxu0 }
 0x191   :  { %5439 = vst [vmem:[#allocation16_spill] sm:$0xff] %v4358_v10  ;;  %v4364_v19 = vadd.f32 %v1312_v40, %v4249_v23 }
 0x192   :  { %5440 = vst [vmem:[#allocation17_spill] sm:$0xff] %v4361_v24 }
 0x193   :  { %5441 = vst [vmem:[#allocation18_spill] sm:$0xff] %v4364_v19 }
 0x195   :  { %v1316_v30 = vpop.f32.mrb[12].mxu0 }
 0x196   :  { %v4367_v6 = vadd.f32 %v1316_v30, %v4256_v52  ;;  %v1318_v27 = vpop.f32.mrb[13].mxu0  ;;  %v4457_v30 = vld [vmem:[%s5297_s2 + $0x6] sm:$0x3f] }
 0x197   :  { %v4370_v9 = vadd.f32 %v1318_v27, %v4260_v57  ;;  %v1320_v32 = vpop.f32.mrb[14].mxu0 }
 0x198   :  { %5442 = vst [vmem:[#allocation19_spill] sm:$0xff] %v4367_v6  ;;  %v4373_v49 = vadd.f32 %v1320_v32, %v4263_v51  ;;  %v1322_v43 = vpop.f32.mrb[15].mxu0 }
 0x199   :  { %5443 = vst [vmem:[#allocation20_spill] sm:$0xff] %v4370_v9  ;;  %v4376_v34 = vadd.f32 %v1322_v43, %v4265_v56 }
 0x19a   :  { %5444 = vst [vmem:[#allocation21_spill] sm:$0xff] %v4373_v49 }
 0x19b   :  { %5445 = vst [vmem:[#allocation22_spill] sm:$0xff] %v4376_v34 }
 0x19d   :  { %v1326_v1 = vpop.f32.mrb[16].mxu0 }
 0x19e   :  { %v4379_v3 = vadd.f32 %v1326_v1, %v4272_v38  ;;  %v1328_v36 = vpop.f32.mrb[17].mxu0 }
 0x19f   :  { %v4382_v37 = vadd.f32 %v1328_v36, %v4274_v54  ;;  %v1330_v23 = vpop.f32.mrb[18].mxu0 }
 0x1a0   :  { %5446 = vst [vmem:[#allocation23_spill] sm:$0xff] %v4379_v3  ;;  %v4385_v13 = vadd.f32 %v1330_v23, %v4276_v58  ;;  %v1332_v41 = vpop.f32.mrb[19].mxu0 }
 0x1a1   :  { %5447 = vst [vmem:[#allocation24_spill] sm:$0xff] %v4382_v37  ;;  %v4388_v45 = vadd.f32 %v1332_v41, %v4278_v2 }
 0x1a2   :  { %5448 = vst [vmem:[#allocation25_spill] sm:$0xff] %v4385_v13 }
 0x1a3   :  { %5449 = vst [vmem:[#allocation26_spill] sm:$0xff] %v4388_v45 }
 0x1a5   :  { %v1336_v50 = vpop.f32.mrb[20].mxu0 }
 0x1a6   :  { %v4391_v48 = vadd.f32 %v1336_v50, %v4286_v46  ;;  %v1338_v52 = vpop.f32.mrb[21].mxu0 }
 0x1a7   :  { %v4394_v53 = vadd.f32 %v1338_v52, %v4288_v55  ;;  %v1340_v57 = vpop.f32.mrb[22].mxu0 }
 0x1a8   :  { %5450 = vst [vmem:[#allocation27_spill] sm:$0xff] %v4391_v48  ;;  %v4397_v51 = vadd.f32 %v1340_v57, %v4290_v25  ;;  %v1342_v56 = vpop.f32.mrb[23].mxu0 }
 0x1a9   :  { %5451 = vst [vmem:[#allocation28_spill] sm:$0xff] %v4394_v53  ;;  %v4400_v5 = vadd.f32 %v1342_v56, %v4292_v12 }
 0x1aa   :  { %5452 = vst [vmem:[#allocation29_spill] sm:$0xff] %v4397_v51 }
 0x1ab   :  { %5453 = vst [vmem:[#allocation30_spill] sm:$0xff] %v4400_v5 }
 0x1ad   :  { %v1346_v38 = vpop.f32.mrb[24].mxu0 }
 0x1ae   :  { %v4403_v54 = vadd.f32 %v1346_v38, %v4300_v20  ;;  %v1348_v58 = vpop.f32.mrb[25].mxu0 }
 0x1af   :  { %v4406_v2 = vadd.f32 %v1348_v58, %v4302_v28  ;;  %v1350_v46 = vpop.f32.mrb[26].mxu0 }
 0x1b0   :  { %5454 = vst [vmem:[#allocation31_spill] sm:$0xff] %v4403_v54  ;;  %v4409_v55 = vadd.f32 %v1350_v46, %v4304_v8  ;;  %v1352_v59 = vpop.f32.mrb[27].mxu0 }
 0x1b1   :  { %5455 = vst [vmem:[#allocation32_spill] sm:$0xff] %v4406_v2  ;;  %v4412_v25 = vadd.f32 %v1352_v59, %v4306_v17  ;;  %v4427_v17 = vshrl.u32 %v5320_v22, 7 }
 0x1b2   :  { %5456 = vst [vmem:[#allocation33_spill] sm:$0xff] %v4409_v55 }
 0x1b3   :  { %5457 = vst [vmem:[#allocation34_spill] sm:$0xff] %v4412_v25  ;;  %v4430_v29 = vsub.s32 0, %v4427_v17  ;;  %v4445_v35 = vsub.s32 2, %v4427_v17  ;;  %v4448_v26 = vsub.s32 3, %v4427_v17 }
 0x1b5   :  { %v1356_v0 = vpop.f32.mrb[28].mxu0  ;;  %v2086_v23 = vrot.slane %v4457_v30, %v4430_v29 }
 0x1b6   :  { %v4415_v12 = vadd.f32 %v1356_v0, %v4314_v62  ;;  %v1358_v31 = vpop.f32.mrb[29].mxu0  ;;  %v4433_v62 = vsub.s32 1, %v4427_v17 }
 0x1b7   :  { %v4418_v20 = vadd.f32 %v1358_v31, %v4316_v16  ;;  %v1360_v33 = vpop.f32.mrb[30].mxu0  ;;  %v4438_v16 = vld [vmem:[%s5297_s2] sm:$0x3f]  ;;  %v2094_v31 = vrot.slane %v4457_v30, %v4445_v35 }
 0x1b8   :  { %5458 = vst [vmem:[#allocation35_spill] sm:$0xff] %v4415_v12  ;;  %v4421_v28 = vadd.f32 %v1360_v33, %v4318_v18  ;;  %v1362_v11 = vpop.f32.mrb[31].mxu0  ;;  %v2062_v18 = vrot.slane %v4438_v16, %v4430_v29  ;;  %v2070_v40 = vrot.slane %v4438_v16, %v4445_v35  ;;  %v2074_v27 = vrot.slane %v4438_v16, %v4448_v26 }
 0x1b9   :  { %5459 = vst [vmem:[#allocation36_spill] sm:$0xff] %v4418_v20  ;;  %v4424_v8 = vadd.f32 %v1362_v11, %v4320_v15  ;;  %v2066_v15 = vrot.slane %v4438_v16, %v4433_v62  ;;  %v2090_v41 = vrot.slane %v4457_v30, %v4433_v62  ;;  %v2311_v33 = vmul.f32 %v4343_v47, %v2086_v23 }
 0x1ba   :  { %5460 = vst [vmem:[#allocation37_spill] sm:$0xff] %v4421_v28  ;;  %v2299_v63 = vmul.f32 %v4329_v44, %v2062_v18  ;;  %v2305_v32 = vmul.f32 %v4335_v14, %v2062_v18 }
 0x1bb   :  { %5461 = vst [vmem:[#allocation38_spill] sm:$0xff] %v4424_v8  ;;  %v2300_v39 = vmul.f32 %v4332_v21, %v2066_v15  ;;  %v2306_v43 = vmul.f32 %v4338_v4, %v2066_v15  ;;  %v2312_v11 = vmul.f32 %v4346_v61, %v2090_v41 }
 0x1bd   :  { %v2395_v36 = vadd.f32 %v2300_v39, %v2299_v63  ;;  %v2402_v38 = vadd.f32 %v2306_v43, %v2305_v32  ;;  %v4488_v63 = vld [vmem:[%s5297_s2 + $0xc] sm:$0x3f]  ;;  %v2098_v39 = vrot.slane %v4457_v30, %v4448_v26 }
 0x1fc   :  { %v4463_v1 = vpop.f32.mrb[32].mxu1 }
 0x1fd   :  { %5462 = vst [vmem:[#allocation39_spill] sm:$0xff] %v4463_v1  ;;  %v2301_v50 = vmul.f32 %v2070_v40, %v4463_v1  ;;  %v4470_v52 = vpop.f32.mrb[33].mxu1 }
 0x1fe   :  { %5463 = vst [vmem:[#allocation40_spill] sm:$0xff] %v4470_v52  ;;  %v2302_v57 = vmul.f32 %v2074_v27, %v4470_v52  ;;  %v4473_v56 = vpop.f32.mrb[34].mxu1 }
 0x1ff   :  { %5464 = vst [vmem:[#allocation41_spill] sm:$0xff] %v4473_v56  ;;  %v2396_v58 = vadd.f32 %v2395_v36, %v2301_v50  ;;  %v2307_v46 = vmul.f32 %v2070_v40, %v4473_v56  ;;  %v4476_v59 = vpop.f32.mrb[35].mxu1  ;;  %v2317_v40 = vmul.f32 %v4349_v42, %v2086_v23  ;;  %v2409_v36 = vadd.f32 %v2312_v11, %v2311_v33 }
 0x200   :  { %5465 = vst [vmem:[#allocation42_spill] sm:$0xff] %v4476_v59  ;;  %v2308_v0 = vmul.f32 %v2074_v27, %v4476_v59  ;;  %v2318_v27 = vmul.f32 %v4352_v60, %v2090_v41  ;;  %v2110_v50 = vrot.slane %v4488_v63, %v4430_v29  ;;  %v2118_v11 = vrot.slane %v4488_v63, %v4445_v35 }
 0x201   :  { %v4483_v18 = vadd.f32 %v2396_v58, %v2302_v57  ;;  %v2403_v15 = vadd.f32 %v2402_v38, %v2307_v46  ;;  %v2114_v57 = vrot.slane %v4488_v63, %v4433_v62 }
 0x202   :  { %v2416_v41 = vadd.f32 %v2318_v27, %v2317_v40  ;;  %v2323_v60 = vmul.f32 %v4355_v7, %v2110_v50  ;;  %v4521_v40 = vld [vmem:[%s5297_s2 + $0x12] sm:$0x3f] }
 0x203   :  { %v4494_v32 = vadd.f32 %v2403_v15, %v2308_v0  ;;  %v2324_v42 = vmul.f32 %v4358_v10, %v2114_v57  ;;  %v2330_v27 = vmul.f32 %v4364_v19, %v2114_v57 }
 0x204   :  { %v4496_v43 = vpop.f32.mrb[36].mxu1 }
 0x205   :  { %5466 = vst [vmem:[#allocation43_spill] sm:$0xff] %v4496_v43  ;;  %v2313_v38 = vmul.f32 %v2094_v31, %v4496_v43  ;;  %v4503_v58 = vpop.f32.mrb[37].mxu1  ;;  %v2423_v10 = vadd.f32 %v2324_v42, %v2323_v60  ;;  %v2142_v60 = vrot.slane %v4521_v40, %v4445_v35 }
 0x206   :  { %5467 = vst [vmem:[#allocation44_spill] sm:$0xff] %v4503_v58  ;;  %v2314_v46 = vmul.f32 %v2098_v39, %v4503_v58  ;;  %v4506_v23 = vpop.f32.mrb[38].mxu1 }
 0x207   :  { %5468 = vst [vmem:[#allocation45_spill] sm:$0xff] %v4506_v23  ;;  %v2410_v0 = vadd.f32 %v2409_v36, %v2313_v38  ;;  %v2319_v15 = vmul.f32 %v2094_v31, %v4506_v23  ;;  %v4509_v22 = vpop.f32.mrb[39].mxu1  ;;  %v2122_v31 = vrot.slane %v4488_v63, %v4448_v26 }
 0x208   :  { %5469 = vst [vmem:[#allocation46_spill] sm:$0xff] %v4509_v22  ;;  %v2320_v33 = vmul.f32 %v2098_v39, %v4509_v22  ;;  %v2329_v39 = vmul.f32 %v4361_v24, %v2110_v50 }
 0x209   :  { %v4516_v43 = vadd.f32 %v2410_v0, %v2314_v46  ;;  %v2417_v58 = vadd.f32 %v2416_v41, %v2319_v15  ;;  %v2134_v46 = vrot.slane %v4521_v40, %v4430_v29  ;;  %v2138_v41 = vrot.slane %v4521_v40, %v4433_v62 }
 0x20a   :  { %v2430_v57 = vadd.f32 %v2330_v27, %v2329_v39 }
 0x20b   :  { %v4527_v36 = vadd.f32 %v2417_v58, %v2320_v33  ;;  %v2335_v24 = vmul.f32 %v4367_v6, %v2134_v46  ;;  %v2342_v39 = vmul.f32 %v4376_v34, %v2138_v41 }
 0x20c   :  { %v4529_v38 = vpop.f32.mrb[40].mxu1 }
 0x20d   :  { %5470 = vst [vmem:[#allocation47_spill] sm:$0xff] %v4529_v38  ;;  %v2325_v0 = vmul.f32 %v2118_v11, %v4529_v38  ;;  %v4536_v15 = vpop.f32.mrb[41].mxu1  ;;  %v2336_v38 = vmul.f32 %v4370_v9, %v2138_v41 }
 0x20e   :  { %5471 = vst [vmem:[#allocation48_spill] sm:$0xff] %v4536_v15  ;;  %v2326_v7 = vmul.f32 %v2122_v31, %v4536_v15  ;;  %v4539_v50 = vpop.f32.mrb[42].mxu1 }
 0x20f   :  { %5472 = vst [vmem:[#allocation49_spill] sm:$0xff] %v4539_v50  ;;  %v2424_v58 = vadd.f32 %v2423_v10, %v2325_v0  ;;  %v2331_v33 = vmul.f32 %v2118_v11, %v4539_v50  ;;  %v4542_v19 = vpop.f32.mrb[43].mxu1  ;;  %v4554_v10 = vld [vmem:[%s5297_s2 + $0x18] sm:$0x3f]  ;;  %v2146_v11 = vrot.slane %v4521_v40, %v4448_v26  ;;  %v2437_v9 = vadd.f32 %v2336_v38, %v2335_v24 }
 0x210   :  { %5473 = vst [vmem:[#allocation50_spill] sm:$0xff] %v4542_v19  ;;  %v2332_v42 = vmul.f32 %v2122_v31, %v4542_v19  ;;  %v2341_v31 = vmul.f32 %v4373_v49, %v2134_v46  ;;  %v2166_v38 = vrot.slane %v4554_v10, %v4445_v35 }
 0x211   :  { %v4549_v22 = vadd.f32 %v2424_v58, %v2326_v7  ;;  %v2431_v15 = vadd.f32 %v2430_v57, %v2331_v33  ;;  %v2158_v7 = vrot.slane %v4554_v10, %v4430_v29  ;;  %v2162_v57 = vrot.slane %v4554_v10, %v4433_v62 }
 0x212   :  { %v2444_v41 = vadd.f32 %v2342_v39, %v2341_v31 }
 0x213   :  { %v4560_v27 = vadd.f32 %v2431_v15, %v2332_v42  ;;  %v2347_v49 = vmul.f32 %v4379_v3, %v2158_v7  ;;  %v2354_v31 = vmul.f32 %v4388_v45, %v2162_v57 }
 0x214   :  { %v4562_v0 = vpop.f32.mrb[44].mxu1 }
 0x215   :  { %5474 = vst [vmem:[#allocation51_spill] sm:$0xff] %v4562_v0  ;;  %v2337_v58 = vmul.f32 %v2142_v60, %v4562_v0  ;;  %v4569_v33 = vpop.f32.mrb[45].mxu1  ;;  %v2348_v0 = vmul.f32 %v4382_v37, %v2162_v57 }
 0x216   :  { %5475 = vst [vmem:[#allocation52_spill] sm:$0xff] %v4569_v33  ;;  %v2338_v6 = vmul.f32 %v2146_v11, %v4569_v33  ;;  %v4572_v46 = vpop.f32.mrb[46].mxu1 }
 0x217   :  { %5476 = vst [vmem:[#allocation53_spill] sm:$0xff] %v4572_v46  ;;  %v2438_v15 = vadd.f32 %v2437_v9, %v2337_v58  ;;  %v2343_v42 = vmul.f32 %v2142_v60, %v4572_v46  ;;  %v4575_v34 = vpop.f32.mrb[47].mxu1  ;;  %v4587_v9 = vld [vmem:[%s5297_s2 + $0x1e] sm:$0x3f]  ;;  %v2170_v60 = vrot.slane %v4554_v10, %v4448_v26 }
 0x218   :  { %5477 = vst [vmem:[#allocation54_spill] sm:$0xff] %v4575_v34  ;;  %v2344_v24 = vmul.f32 %v2146_v11, %v4575_v34  ;;  %v2353_v11 = vmul.f32 %v4385_v13, %v2158_v7  ;;  %v2451_v34 = vadd.f32 %v2348_v0, %v2347_v49  ;;  %v2190_v45 = vrot.slane %v4587_v9, %v4445_v35 }
 0x219   :  { %v4582_v19 = vadd.f32 %v2438_v15, %v2338_v6  ;;  %v2445_v33 = vadd.f32 %v2444_v41, %v2343_v42  ;;  %v2182_v6 = vrot.slane %v4587_v9, %v4430_v29  ;;  %v2186_v41 = vrot.slane %v4587_v9, %v4433_v62 }
 0x21b   :  { %v4593_v39 = vadd.f32 %v2445_v33, %v2344_v24  ;;  %v2458_v24 = vadd.f32 %v2354_v31, %v2353_v11  ;;  %v2359_v13 = vmul.f32 %v4391_v48, %v2182_v6  ;;  %v2365_v11 = vmul.f32 %v4397_v51, %v2182_v6 }
 0x21c   :  { %v4595_v58 = vpop.f32.mrb[48].mxu1  ;;  %v2366_v31 = vmul.f32 %v4400_v5, %v2186_v41 }
 0x21d   :  { %5478 = vst [vmem:[#allocation55_spill] sm:$0xff] %v4595_v58  ;;  %v2349_v15 = vmul.f32 %v2166_v38, %v4595_v58  ;;  %v4602_v42 = vpop.f32.mrb[48].mxu0  ;;  %v4604_v46 = vpop.f32.mrb[49].mxu1 }
 0x21e   :  { %5479 = vst [vmem:[#allocation56_spill] sm:$0xff] %v4604_v46  ;;  %v2350_v7 = vmul.f32 %v2170_v60, %v4604_v46  ;;  %v4607_v57 = vpop.f32.mrb[49].mxu0  ;;  %v4609_v33 = vpop.f32.mrb[50].mxu1  ;;  %v2360_v46 = vmul.f32 %v4394_v53, %v2186_v41 }
 0x21f   :  { %5480 = vst [vmem:[#allocation57_spill] sm:$0xff] %v4609_v33  ;;  %v2452_v49 = vadd.f32 %v2451_v34, %v2349_v15  ;;  %v2355_v0 = vmul.f32 %v2166_v38, %v4609_v33  ;;  %v4612_v50 = vpop.f32.mrb[50].mxu0  ;;  %v4614_v23 = vpop.f32.mrb[51].mxu1  ;;  %v4628_v38 = vld [vmem:[%s5297_s2 + $0x24] sm:$0x3f] }
 0x220   :  { %5481 = vst [vmem:[#allocation58_spill] sm:$0xff] %v4614_v23  ;;  %v2356_v61 = vmul.f32 %v2170_v60, %v4614_v23  ;;  %v4617_v47 = vpop.f32.mrb[51].mxu0  ;;  %v2194_v60 = vrot.slane %v4587_v9, %v4448_v26  ;;  %v2465_v53 = vadd.f32 %v2360_v46, %v2359_v13  ;;  %v2214_v37 = vrot.slane %v4628_v38, %v4445_v35 }
 0x221   :  { %v4623_v58 = vadd.f32 %v2452_v49, %v2350_v7  ;;  %v2459_v34 = vadd.f32 %v2458_v24, %v2355_v0  ;;  %v2206_v7 = vrot.slane %v4628_v38, %v4430_v29  ;;  %v2210_v24 = vrot.slane %v4628_v38, %v4433_v62 }
 0x223   :  { %v4634_v15 = vadd.f32 %v2459_v34, %v2356_v61  ;;  %v2472_v34 = vadd.f32 %v2366_v31, %v2365_v11  ;;  %v2372_v3 = vmul.f32 %v4406_v2, %v2210_v24  ;;  %v2377_v11 = vmul.f32 %v4409_v55, %v2206_v7 }
 0x224   :  { %v4636_v48 = vpop.f32.mrb[52].mxu1  ;;  %v2378_v31 = vmul.f32 %v4412_v25, %v2210_v24 }
 0x225   :  { %5482 = vst [vmem:[#allocation59_spill] sm:$0xff] %v4636_v48  ;;  %v2361_v49 = vmul.f32 %v2190_v45, %v4636_v48  ;;  %v4643_v0 = vpop.f32.mrb[52].mxu0  ;;  %v4645_v23 = vpop.f32.mrb[53].mxu1 }
 0x226   :  { %5483 = vst [vmem:[#allocation60_spill] sm:$0xff] %v4645_v23  ;;  %v2362_v6 = vmul.f32 %v2194_v60, %v4645_v23  ;;  %v4648_v41 = vpop.f32.mrb[53].mxu0  ;;  %v4650_v61 = vpop.f32.mrb[54].mxu1  ;;  %v2371_v23 = vmul.f32 %v4403_v54, %v2206_v7 }
 0x227   :  { %5484 = vst [vmem:[#allocation61_spill] sm:$0xff] %v4650_v61  ;;  %v2466_v13 = vadd.f32 %v2465_v53, %v2361_v49  ;;  %v2367_v46 = vmul.f32 %v2190_v45, %v4650_v61  ;;  %v4653_v5 = vpop.f32.mrb[54].mxu0  ;;  %v4655_v51 = vpop.f32.mrb[55].mxu1  ;;  %v4669_v45 = vld [vmem:[%s5297_s2 + $0x2a] sm:$0x3f] }
 0x228   :  { %5485 = vst [vmem:[#allocation62_spill] sm:$0xff] %v4655_v51  ;;  %v2368_v48 = vmul.f32 %v2194_v60, %v4655_v51  ;;  %v4658_v33 = vpop.f32.mrb[55].mxu0  ;;  %v2218_v60 = vrot.slane %v4628_v38, %v4448_v26  ;;  %v2479_v2 = vadd.f32 %v2372_v3, %v2371_v23  ;;  %v2238_v56 = vrot.slane %v4669_v45, %v4445_v35 }
 0x229   :  { %v4664_v59 = vadd.f32 %v2466_v13, %v2362_v6  ;;  %v2473_v53 = vadd.f32 %v2472_v34, %v2367_v46  ;;  %v2230_v6 = vrot.slane %v4669_v45, %v4430_v29  ;;  %v2234_v34 = vrot.slane %v4669_v45, %v4433_v62 }
 0x22b   :  { %v4675_v49 = vadd.f32 %v2473_v53, %v2368_v48  ;;  %v2486_v53 = vadd.f32 %v2378_v31, %v2377_v11  ;;  %v2384_v4 = vmul.f32 %v4418_v20, %v2234_v34  ;;  %v2389_v11 = vmul.f32 %v4421_v28, %v2230_v6 }
 0x22c   :  { %v4677_v54 = vpop.f32.mrb[56].mxu1  ;;  %v2390_v31 = vmul.f32 %v4424_v8, %v2234_v34 }
 0x22d   :  { %5486 = vst [vmem:[#allocation63_spill] sm:$0xff] %v4677_v54  ;;  %v2373_v13 = vmul.f32 %v2214_v37, %v4677_v54  ;;  %v4684_v46 = vpop.f32.mrb[56].mxu0  ;;  %v4686_v51 = vpop.f32.mrb[57].mxu1 }
 0x22e   :  { %5487 = vst [vmem:[#allocation64_spill] sm:$0xff] %v4686_v51  ;;  %v2374_v7 = vmul.f32 %v2218_v60, %v4686_v51  ;;  %v4689_v24 = vpop.f32.mrb[57].mxu0  ;;  %v4691_v48 = vpop.f32.mrb[58].mxu1  ;;  %v2383_v51 = vmul.f32 %v4415_v12, %v2230_v6  ;;  %v4726_v6 = vsub.s32 4, %v4427_v17 }
 0x22f   :  { %5488 = vst [vmem:[#allocation65_spill] sm:$0xff] %v4691_v48  ;;  %v2480_v3 = vadd.f32 %v2479_v2, %v2373_v13  ;;  %v2379_v23 = vmul.f32 %v2214_v37, %v4691_v48  ;;  %v4694_v25 = vpop.f32.mrb[58].mxu0  ;;  %v4696_v55 = vpop.f32.mrb[59].mxu1  ;;  %v2242_v37 = vrot.slane %v4669_v45, %v4448_v26 }
 0x230   :  { %5489 = vst [vmem:[#allocation66_spill] sm:$0xff] %v4696_v55  ;;  %v2380_v54 = vmul.f32 %v2218_v60, %v4696_v55  ;;  %v4699_v61 = vpop.f32.mrb[59].mxu0  ;;  %v2493_v55 = vadd.f32 %v2384_v4, %v2383_v51  ;;  %v2102_v21 = vrot.slane %v4457_v30, %v4726_v6 }
 0x231   :  { %v4705_v14 = vadd.f32 %v2480_v3, %v2374_v7  ;;  %v2487_v2 = vadd.f32 %v2486_v53, %v2379_v23 }
 0x233   :  { %v4711_v60 = vadd.f32 %v2487_v2, %v2380_v54  ;;  %v2500_v54 = vadd.f32 %v2390_v31, %v2389_v11  ;;  %v4734_v2 = vsub.s32 5, %v4427_v17  ;;  %v2078_v11 = vrot.slane %v4438_v16, %v4726_v6 }
 0x234   :  { %v4713_v13 = vpop.f32.mrb[60].mxu1 }
 0x235   :  { %5490 = vst [vmem:[#allocation67_spill] sm:$0xff] %v4713_v13  ;;  %v2385_v48 = vmul.f32 %v2238_v56, %v4713_v13  ;;  %v4716_v12 = vpop.f32.mrb[60].mxu0  ;;  %v4718_v20 = vpop.f32.mrb[61].mxu1 }
 0x236   :  { %5491 = vst [vmem:[#allocation68_spill] sm:$0xff] %v4718_v20  ;;  %v2386_v7 = vmul.f32 %v2242_v37, %v4718_v20  ;;  %v4721_v53 = vpop.f32.mrb[61].mxu0  ;;  %v4723_v3 = vpop.f32.mrb[62].mxu1 }
 0x237   :  { %5492 = vst [vmem:[#allocation69_spill] sm:$0xff] %v4723_v3  ;;  %v2494_v34 = vadd.f32 %v2493_v55, %v2385_v48  ;;  %v2391_v23 = vmul.f32 %v2238_v56, %v4723_v3  ;;  %v4729_v4 = vpop.f32.mrb[62].mxu0  ;;  %v4731_v51 = vpop.f32.mrb[63].mxu1  ;;  %v2082_v56 = vrot.slane %v4438_v16, %v4734_v2 }
 0x238   :  { %5493 = vst [vmem:[#allocation70_spill] sm:$0xff] %v4731_v51  ;;  %v2392_v8 = vmul.f32 %v2242_v37, %v4731_v51  ;;  %v4737_v28 = vpop.f32.mrb[63].mxu0  ;;  %v2174_v37 = vrot.slane %v4554_v10, %v4726_v6 }
 0x239   :  { %v4739_v20 = vadd.f32 %v2494_v34, %v2386_v7  ;;  %v2501_v13 = vadd.f32 %v2500_v54, %v2391_v23 }
 0x23b   :  { %v4743_v55 = vadd.f32 %v2501_v13, %v2392_v8 }
 0x23c   :  { %v2004_v48 = vpop.f32.mrb[64].mxu1 }
 0x23d   :  { %v4747_v31 = vpop.f32.mrb[32].mxu0  ;;  %v4750_v3 = vadd.f32 %v2004_v48, %v4602_v42  ;;  %v2006_v7 = vpop.f32.mrb[65].mxu1  ;;  %v2178_v48 = vrot.slane %v4554_v10, %v4734_v2 }
 0x23e   :  { %5494 = vst [vmem:[#allocation71_spill] sm:$0xff] %v4747_v31  ;;  %v2303_v54 = vmul.f32 %v2078_v11, %v4747_v31  ;;  %v4755_v34 = vpop.f32.mrb[33].mxu0  ;;  %v4758_v8 = vadd.f32 %v2006_v7, %v4607_v57  ;;  %v2008_v13 = vpop.f32.mrb[66].mxu1 }
 0x23f   :  { %5495 = vst [vmem:[#allocation72_spill] sm:$0xff] %v4755_v34  ;;  %v2304_v16 = vmul.f32 %v2082_v56, %v4755_v34  ;;  %v4761_v23 = vpop.f32.mrb[34].mxu0  ;;  %v4764_v51 = vadd.f32 %v2008_v13, %v4612_v50  ;;  %v2010_v42 = vpop.f32.mrb[67].mxu1  ;;  %v2351_v7 = vmul.f32 %v4750_v3, %v2174_v37 }
 0x240   :  { %v2309_v52 = vmul.f32 %v2078_v11, %v4761_v23  ;;  %v4769_v31 = vpop.f32.mrb[35].mxu0  ;;  %v4772_v1 = vadd.f32 %v2010_v42, %v4617_v47  ;;  %v2398_v57 = vadd.f32 %v4483_v18, %v2303_v54  ;;  %v2198_v47 = vrot.slane %v4587_v9, %v4726_v6 }
 0x241   :  { %5496 = vst [vmem:[#allocation73_spill] sm:$0xff] %v4764_v51  ;;  %v2357_v34 = vmul.f32 %v4764_v51, %v2174_v37  ;;  %v2310_v50 = vmul.f32 %v2082_v56, %v4769_v31  ;;  %v2106_v18 = vrot.slane %v4457_v30, %v4734_v2  ;;  %v2202_v56 = vrot.slane %v4587_v9, %v4734_v2 }
 0x242   :  { %5497 = vst [vmem:[#allocation74_spill] sm:$0xff] %v4772_v1  ;;  %v2399_v13 = vadd.f32 %v2398_v57, %v2304_v16  ;;  %v2405_v10 = vadd.f32 %v4494_v32, %v2309_v52  ;;  %v2358_v11 = vmul.f32 %v4772_v1, %v2178_v48  ;;  %v2352_v42 = vmul.f32 %v4758_v8, %v2178_v48 }
 0x243   :  { %v2461_v54 = vadd.f32 %v4634_v15, %v2357_v34  ;;  %v2454_v51 = vadd.f32 %v4623_v58, %v2351_v7 }
 0x244   :  { %2400 = vadd.xlane.f32.xlu0 %v2399_v13  ;;  %v2014_v37 = vpop.f32.mrb[68].mxu1  ;;  %v2406_v16 = vadd.f32 %v2405_v10, %v2310_v50 }
 0x245   :  { %v4790_v57 = vpop.f32.mrb[36].mxu0  ;;  %v4793_v52 = vadd.f32 %v2014_v37, %v4643_v0  ;;  %v2016_v32 = vpop.f32.mrb[69].mxu1  ;;  %v2462_v1 = vadd.f32 %v2461_v54, %v2358_v11 }
 0x246   :  { %v2315_v30 = vmul.f32 %v2102_v21, %v4790_v57  ;;  %v4797_v15 = vpop.f32.mrb[37].mxu0  ;;  %v4800_v34 = vadd.f32 %v2016_v32, %v4648_v41  ;;  %v2018_v9 = vpop.f32.mrb[70].mxu1  ;;  %v2455_v32 = vadd.f32 %v2454_v51, %v2352_v42 }
 0x247   :  { %v2363_v50 = vmul.f32 %v4793_v52, %v2198_v47  ;;  %v2316_v48 = vmul.f32 %v2106_v18, %v4797_v15  ;;  %v4804_v13 = vpop.f32.mrb[38].mxu0  ;;  %v4807_v0 = vadd.f32 %v2018_v9, %v4653_v5  ;;  %v2020_v10 = vpop.f32.mrb[71].mxu1  ;;  %2463 = vadd.xlane.f32.xlu1 %v2462_v1  ;;  %v2126_v5 = vrot.slane %v4488_v63, %v4726_v6 }
 0x248   :  { %v2321_v58 = vmul.f32 %v2102_v21, %v4804_v13  ;;  %v4810_v7 = vpop.f32.mrb[39].mxu0  ;;  %2407 = vadd.xlane.f32.xlu0 %v2406_v16  ;;  %v4813_v41 = vadd.f32 %v2020_v10, %v4658_v33  ;;  %v2412_v11 = vadd.f32 %v4516_v43, %v2315_v30  ;;  %v2364_v54 = vmul.f32 %v4800_v34, %v2202_v56 }
 0x249   :  { %v2322_v37 = vmul.f32 %v2106_v18, %v4810_v7  ;;  %v2369_v1 = vmul.f32 %v4807_v0, %v2198_v47  ;;  %v2468_v16 = vadd.f32 %v4664_v59, %v2363_v50  ;;  %v2222_v33 = vrot.slane %v4628_v38, %v4726_v6 }
 0x24a   :  { %5498 = vst [vmem:[#allocation75_spill] sm:$0xff] %v4813_v41  ;;  %v2413_v9 = vadd.f32 %v2412_v11, %v2316_v48  ;;  %v2419_v21 = vadd.f32 %v4527_v36, %v2321_v58  ;;  %v2130_v43 = vrot.slane %v4488_v63, %v4734_v2  ;;  %v2370_v42 = vmul.f32 %v4813_v41, %v2202_v56 }
 0x24b   :  { %v2469_v10 = vadd.f32 %v2468_v16, %v2364_v54  ;;  %v2475_v58 = vadd.f32 %v4675_v49, %v2369_v1 }
 0x24c   :  { %2414 = vadd.xlane.f32.xlu1 %v2413_v9  ;;  %2456 = vadd.xlane.f32.xlu0 %v2455_v32  ;;  %v2024_v18 = vpop.f32.mrb[72].mxu1  ;;  %v2420_v51 = vadd.f32 %v2419_v21, %v2322_v37 }
 0x24d   :  { %v4828_v30 = vpop.f32.mrb[40].mxu0  ;;  %v4831_v47 = vadd.f32 %v2024_v18, %v4684_v46  ;;  %v2026_v36 = vpop.f32.mrb[73].mxu1  ;;  %v2226_v46 = vrot.slane %v4628_v38, %v4734_v2  ;;  %v2150_v38 = vrot.slane %v4521_v40, %v4726_v6  ;;  %v2476_v16 = vadd.f32 %v2475_v58, %v2370_v42 }
 0x24e   :  { %5499 = vst [vmem:[#allocation76_spill] sm:$0xff] %v4828_v30  ;;  %v2327_v59 = vmul.f32 %v2126_v5, %v4828_v30  ;;  %v4834_v50 = vpop.f32.mrb[41].mxu0  ;;  %v4837_v48 = vadd.f32 %v2026_v36, %v4689_v24  ;;  %v2028_v63 = vpop.f32.mrb[74].mxu1 }
 0x24f   :  { %5500 = vst [vmem:[#allocation77_spill] sm:$0xff] %v4831_v47  ;;  %5501 = vst [vmem:[#allocation78_spill] sm:$0xff] %v4834_v50  ;;  %v2375_v11 = vmul.f32 %v4831_v47, %v2222_v33  ;;  %v2328_v56 = vmul.f32 %v2130_v43, %v4834_v50  ;;  %v4844_v37 = vpop.f32.mrb[42].mxu0  ;;  %v4847_v32 = vadd.f32 %v2028_v63, %v4694_v25  ;;  %v2030_v9 = vpop.f32.mrb[75].mxu1  ;;  %v5530_v47 = vld [vmem:[#allocation23_spill] sm:$0xff]  ;;  %v5535_v50 = vld [vmem:[#allocation26_spill] sm:$0xff] }
 0x250   :  { %5502 = vst [vmem:[#allocation79_spill] sm:$0xff] %v4837_v48  ;;  %5503 = vst [vmem:[#allocation80_spill] sm:$0xff] %v4844_v37  ;;  %v2333_v24 = vmul.f32 %v2126_v5, %v4844_v37  ;;  %v4850_v21 = vpop.f32.mrb[43].mxu0  ;;  %v4853_v54 = vadd.f32 %v2030_v9, %v4699_v61  ;;  %2421 = vadd.xlane.f32.xlu1 %v2420_v51  ;;  %2470 = vadd.xlane.f32.xlu0 %v2469_v10 }
 0x251   :  { %5504 = vst [vmem:[#allocation81_spill] sm:$0xff] %v4847_v32  ;;  %5505 = vst [vmem:[#allocation82_spill] sm:$0xff] %v4850_v21  ;;  %v2334_v49 = vmul.f32 %v2130_v43, %v4850_v21  ;;  %v2426_v1 = vadd.f32 %v4549_v22, %v2327_v59  ;;  %v2381_v25 = vmul.f32 %v4847_v32, %v2222_v33 }
 0x252   :  { %5506 = vst [vmem:[#allocation83_spill] sm:$0xff] %v4853_v54  ;;  %v2246_v5 = vrot.slane %v4669_v45, %v4726_v6  ;;  %v2433_v18 = vadd.f32 %v4560_v27, %v2333_v24  ;;  %v2376_v61 = vmul.f32 %v4837_v48, %v2226_v46  ;;  %v2154_v51 = vrot.slane %v4521_v40, %v4734_v2 }
 0x253   :  { %v2427_v36 = vadd.f32 %v2426_v1, %v2328_v56  ;;  %v2482_v43 = vadd.f32 %v4705_v14, %v2375_v11  ;;  %v2250_v27 = vrot.slane %v4669_v45, %v4734_v2  ;;  %v2382_v10 = vmul.f32 %v4853_v54, %v2226_v46 }
 0x254   :  { %2477 = vadd.xlane.f32.xlu1 %v2476_v16  ;;  %v2034_v22 = vpop.f32.mrb[76].mxu1  ;;  %v2434_v59 = vadd.f32 %v2433_v18, %v2334_v49  ;;  %v2489_v56 = vadd.f32 %v4711_v60, %v2381_v25 }
 0x255   :  { %2428 = vadd.xlane.f32.xlu0 %v2427_v36  ;;  %v4867_v63 = vpop.f32.mrb[44].mxu0  ;;  %v4870_v33 = vadd.f32 %v2034_v22, %v4716_v12  ;;  %v2036_v42 = vpop.f32.mrb[77].mxu1  ;;  %v2483_v49 = vadd.f32 %v2482_v43, %v2376_v61 }
 0x256   :  { %5507 = vst [vmem:[#allocation84_spill] sm:$0xff] %v4867_v63  ;;  %v2339_v58 = vmul.f32 %v2150_v38, %v4867_v63  ;;  %v4876_v40 = vpop.f32.mrb[45].mxu0  ;;  %v4879_v14 = vadd.f32 %v2036_v42, %v4721_v53  ;;  %v2038_v11 = vpop.f32.mrb[78].mxu1  ;;  %v2490_v36 = vadd.f32 %v2489_v56, %v2382_v10 }
 0x257   :  { %5508 = vst [vmem:[#allocation85_spill] sm:$0xff] %v4870_v33  ;;  %5509 = vst [vmem:[#allocation86_spill] sm:$0xff] %v4876_v40  ;;  %v2387_v9 = vmul.f32 %v4870_v33, %v2246_v5  ;;  %v2340_v12 = vmul.f32 %v2154_v51, %v4876_v40  ;;  %v4884_v24 = vpop.f32.mrb[46].mxu0  ;;  %v4887_v45 = vadd.f32 %v2038_v11, %v4729_v4  ;;  %v2040_v46 = vpop.f32.mrb[79].mxu1  ;;  %v5528_v40 = vld [vmem:[#allocation41_spill] sm:$0xff] }
 0x258   :  { %5510 = vst [vmem:[#allocation87_spill] sm:$0xff] %v4879_v14  ;;  %5511 = vst [vmem:[#allocation88_spill] sm:$0xff] %v4884_v24  ;;  %v2345_v1 = vmul.f32 %v2150_v38, %v4884_v24  ;;  %v4890_v16 = vpop.f32.mrb[47].mxu0  ;;  %v4893_v53 = vadd.f32 %v2040_v46, %v4737_v28  ;;  %2435 = vadd.xlane.f32.xlu1 %v2434_v59  ;;  %v2440_v60 = vadd.f32 %v4582_v19, %v2339_v58 }
 0x259   :  { %5512 = vst [vmem:[#allocation89_spill] sm:$0xff] %v4887_v45  ;;  %5513 = vst [vmem:[#allocation90_spill] sm:$0xff] %v4890_v16  ;;  %v2346_v25 = vmul.f32 %v2154_v51, %v4890_v16  ;;  %2484 = vadd.xlane.f32.xlu0 %v2483_v49  ;;  %v2393_v18 = vmul.f32 %v4887_v45, %v2246_v5  ;;  %v2388_v61 = vmul.f32 %v4879_v14, %v2250_v27 }
 0x25a   :  { %5514 = vst [vmem:[#allocation91_spill] sm:$0xff] %v4893_v53  ;;  %v2441_v4 = vadd.f32 %v2440_v60, %v2340_v12  ;;  %v2447_v22 = vadd.f32 %v4593_v39, %v2345_v1  ;;  %v2496_v38 = vadd.f32 %v4739_v20, %v2387_v9  ;;  %v2394_v28 = vmul.f32 %v4893_v53, %v2250_v27 }
 0x25b   :  { %v2503_v19 = vadd.f32 %v4743_v55, %v2393_v18 }
 0x25c   :  { %2491 = vadd.xlane.f32.xlu1 %v2490_v36  ;;  %v2448_v43 = vadd.f32 %v2447_v22, %v2346_v25  ;;  %v2497_v59 = vadd.f32 %v2496_v38, %v2388_v61 }
 0x25d   :  { %2442 = vadd.xlane.f32.xlu0 %v2441_v4  ;;  %v2504_v51 = vadd.f32 %v2503_v19, %v2394_v28 }
 0x260   :  { %2449 = vadd.xlane.f32.xlu1 %v2448_v43 }
 0x261   :  { %2498 = vadd.xlane.f32.xlu0 %v2497_v59 }
 0x264   :  { %2505 = vadd.xlane.f32.xlu1 %v2504_v51 }
 0x2d1   :  { %v2401_v5 = vpop.xlane.xlu0 %2400 }
 0x2d4   :  { %v2464_v42 = vpop.xlane.xlu1 %2463 }
 0x2d5   :  { %v2408_v10 = vpop.xlane.xlu0 %2407 }
 0x2d6   :  { %v2507_v39 = vmax.f32 %v2401_v5, %v2408_v10 }
 0x2d8   :  { %v2508_v58 = vrot.slane %v2507_v39, 4 }
 0x2d9   :  { %v2415_v11 = vpop.xlane.xlu1 %2414  ;;  %v2457_v56 = vpop.xlane.xlu0 %2456 }
 0x2da   :  { %v2509_v20 = vmax.f32 %v2507_v39, %v2508_v58  ;;  %v2535_v9 = vmax.f32 %v2457_v56, %v2464_v42 }
 0x2dc   :  { %v2510_v12 = vrot.slane %v2509_v20, 2  ;;  %v2536_v46 = vrot.slane %v2535_v9, 4 }
 0x2dd   :  { %v2422_v49 = vpop.xlane.xlu1 %2421  ;;  %v4903_v27 = vpop.xlane.xlu0 %2470 }
 0x2de   :  { %v2511_v55 = vmax.f32 %v2509_v20, %v2510_v12  ;;  %v2537_v1 = vmax.f32 %v2535_v9, %v2536_v46  ;;  %v2514_v60 = vmax.f32 %v2415_v11, %v2422_v49 }
 0x2e0   :  { %v2512_v25 = vrot.slane %v2511_v55, 1  ;;  %v2538_v18 = vrot.slane %v2537_v1, 2  ;;  %v2515_v36 = vrot.slane %v2514_v60, 4 }
 0x2e1   :  { %v4905_v4 = vpop.xlane.xlu1 %2477 }
 0x2e2   :  { %v2513_v22 = vmax.f32 %v2511_v55, %v2512_v25  ;;  %v2539_v61 = vmax.f32 %v2537_v1, %v2538_v18  ;;  %v2516_v38 = vmax.f32 %v2514_v60, %v2515_v36  ;;  %v2542_v43 = vmax.f32 %v4903_v27, %v4905_v4  ;;  %v4909_v28 = vpop.xlane.xlu0 %2428 }
 0x2e4   :  { %v2563_v19 = vsub.f32 %v2401_v5, %v2513_v22  ;;  %v2564_v59 = vsub.f32 %v2408_v10, %v2513_v22  ;;  %v2540_v51 = vrot.slane %v2539_v61, 1  ;;  %v2517_v39 = vrot.slane %v2516_v38, 2 }
 0x2e5   :  { %v2543_v58 = vrot.slane %v2542_v43, 4  ;;  %v4911_v20 = vpop.xlane.xlu1 %2435 }
 0x2e6   :  { %v2579_v9 = vmul.f32 1.442695, %v2563_v19  ;;  %v2581_v12 = vmul.f32 1.442695, %v2564_v59  ;;  %v2541_v46 = vmax.f32 %v2539_v61, %v2540_v51  ;;  %v2518_v53 = vmax.f32 %v2516_v38, %v2517_v39  ;;  %v4913_v45 = vpop.xlane.xlu0 %2484 }
 0x2e7   :  { %v2544_v55 = vmax.f32 %v2542_v43, %v2543_v58  ;;  %v2521_v1 = vmax.f32 %v4909_v28, %v4911_v20 }
 0x2e8   :  { %3845 = vpow2.f32 %v2579_v9  ;;  %v2571_v60 = vsub.f32 %v2457_v56, %v2541_v46  ;;  %v2572_v25 = vsub.f32 %v2464_v42, %v2541_v46  ;;  %v2519_v5 = vrot.slane %v2518_v53, 1 }
 0x2e9   :  { %3847 = vpow2.f32 %v2581_v12  ;;  %v2545_v10 = vrot.slane %v2544_v55, 2  ;;  %v2522_v18 = vrot.slane %v2521_v1, 4  ;;  %v4917_v36 = vpop.xlane.xlu1 %2491 }
 0x2ea   :  { %v2595_v22 = vmul.f32 1.442695, %v2571_v60  ;;  %v2597_v19 = vmul.f32 1.442695, %v2572_v25  ;;  %v2520_v59 = vmax.f32 %v2518_v53, %v2519_v5  ;;  %v2549_v61 = vmax.f32 %v4913_v45, %v4917_v36  ;;  %v4921_v51 = vpop.xlane.xlu0 %2442 }
 0x2eb   :  { %v2546_v38 = vmax.f32 %v2544_v55, %v2545_v10  ;;  %v2523_v43 = vmax.f32 %v2521_v1, %v2522_v18 }
 0x2ec   :  { %3849 = vpow2.f32 %v2595_v22  ;;  %v2565_v39 = vsub.f32 %v2415_v11, %v2520_v59  ;;  %v2566_v56 = vsub.f32 %v2422_v49, %v2520_v59  ;;  %v2550_v42 = vrot.slane %v2549_v61, 4 }
 0x2ed   :  { %3851 = vpow2.f32 %v2597_v19  ;;  %v2547_v58 = vrot.slane %v2546_v38, 1  ;;  %v2524_v9 = vrot.slane %v2523_v43, 2  ;;  %v4923_v12 = vpop.xlane.xlu1 %2449 }
 0x2ee   :  { %v2583_v46 = vmul.f32 1.442695, %v2565_v39  ;;  %v2585_v60 = vmul.f32 1.442695, %v2566_v56  ;;  %v2551_v25 = vmax.f32 %v2549_v61, %v2550_v42  ;;  %v2528_v53 = vmax.f32 %v4921_v51, %v4923_v12  ;;  %v4929_v22 = vpop.xlane.xlu0 %2498 }
 0x2ef   :  { %v2548_v5 = vmax.f32 %v2546_v38, %v2547_v58  ;;  %v2525_v55 = vmax.f32 %v2523_v43, %v2524_v9 }
 0x2f0   :  { %3853 = vpow2.f32 %v2583_v46  ;;  %v2552_v1 = vrot.slane %v2551_v25, 2  ;;  %v2529_v10 = vrot.slane %v2528_v53, 4 }
 0x2f1   :  { %3855 = vpow2.f32 %v2585_v60  ;;  %v2573_v11 = vsub.f32 %v4903_v27, %v2548_v5  ;;  %v2574_v49 = vsub.f32 %v4905_v4, %v2548_v5  ;;  %v2526_v18 = vrot.slane %v2525_v55, 1  ;;  %v4931_v19 = vpop.xlane.xlu1 %2505 }
 0x2f2   :  { %v4933_v59 = vpop.eup %3845  ;;  %v2553_v61 = vmax.f32 %v2551_v25, %v2552_v1  ;;  %v2530_v39 = vmax.f32 %v2528_v53, %v2529_v10  ;;  %v2556_v38 = vmax.f32 %v4929_v22, %v4931_v19 }
 0x2f3   :  { %v4937_v43 = vpop.eup %3847  ;;  %v2599_v56 = vmul.f32 1.442695, %v2573_v11  ;;  %v2601_v42 = vmul.f32 1.442695, %v2574_v49  ;;  %v2527_v58 = vmax.f32 %v2525_v55, %v2526_v18 }
 0x2f4   :  { %v2611_v27 = vadd.f32 %v4937_v43, %v4933_v59  ;;  %v2554_v4 = vrot.slane %v2553_v61, 1  ;;  %v2531_v9 = vrot.slane %v2530_v39, 2  ;;  %v2557_v46 = vrot.slane %v2556_v38, 4 }
 0x2f5   :  { %3857 = vpow2.f32 %v2599_v56  ;;  %v2567_v60 = vsub.f32 %v4909_v28, %v2527_v58  ;;  %v2568_v25 = vsub.f32 %v4911_v20, %v2527_v58 }
 0x2f6   :  { %v4943_v53 = vpop.eup %3849  ;;  %v2612_v5 = vrot.slane %v2611_v27, 4  ;;  %3859 = vpow2.f32 %v2601_v42  ;;  %v2555_v1 = vmax.f32 %v2553_v61, %v2554_v4  ;;  %v2532_v10 = vmax.f32 %v2530_v39, %v2531_v9 }
 0x2f7   :  { %v4945_v11 = vpop.eup %3851  ;;  %v2587_v55 = vmul.f32 1.442695, %v2567_v60  ;;  %v2589_v49 = vmul.f32 1.442695, %v2568_v25  ;;  %v2558_v18 = vmax.f32 %v2556_v38, %v2557_v46 }
 0x2f8   :  { %v2613_v14 = vadd.f32 %v2612_v5, %v2611_v27  ;;  %v2639_v33 = vadd.f32 %v4945_v11, %v4943_v53  ;;  %v2575_v56 = vsub.f32 %v4913_v45, %v2555_v1  ;;  %v2576_v28 = vsub.f32 %v4917_v36, %v2555_v1 }
 0x2f9   :  { %3861 = vpow2.f32 %v2587_v55  ;;  %v2533_v20 = vrot.slane %v2532_v10, 1  ;;  %v2559_v58 = vrot.slane %v2558_v18, 2 }
 0x2fa   :  { %v4951_v16 = vpop.eup %3853  ;;  %v2614_v61 = vrot.slane %v2613_v14, 2  ;;  %v2640_v39 = vrot.slane %v2639_v33, 4  ;;  %3863 = vpow2.f32 %v2589_v49  ;;  %v2603_v42 = vmul.f32 1.442695, %v2575_v56 }
 0x2fb   :  { %v4953_v4 = vpop.eup %3855  ;;  %v2605_v38 = vmul.f32 1.442695, %v2576_v28  ;;  %v2534_v27 = vmax.f32 %v2532_v10, %v2533_v20  ;;  %v2560_v9 = vmax.f32 %v2558_v18, %v2559_v58 }
 0x2fc   :  { %v2615_v46 = vadd.f32 %v2614_v61, %v2613_v14  ;;  %v2641_v60 = vadd.f32 %v2640_v39, %v2639_v33  ;;  %v2618_v45 = vadd.f32 %v4953_v4, %v4951_v16  ;;  %3865 = vpow2.f32 %v2603_v42 }
 0x2fd   :  { %3867 = vpow2.f32 %v2605_v38  ;;  %v2569_v36 = vsub.f32 %v4921_v51, %v2534_v27  ;;  %v2570_v25 = vsub.f32 %v4923_v12, %v2534_v27  ;;  %v2561_v5 = vrot.slane %v2560_v9, 1 }
 0x2fe   :  { %v2616_v1 = vrot.slane %v2615_v46, 1  ;;  %v2642_v55 = vrot.slane %v2641_v60, 2  ;;  %v2619_v49 = vrot.slane %v2618_v45, 4 }
 0x2ff   :  { %v4959_v56 = vpop.eup %3857  ;;  %v2591_v28 = vmul.f32 1.442695, %v2569_v36  ;;  %v2593_v10 = vmul.f32 1.442695, %v2570_v25  ;;  %v2562_v18 = vmax.f32 %v2560_v9, %v2561_v5 }
 0x300   :  { %v4961_v14 = vpop.eup %3859  ;;  %v2617_v33 = vadd.f32 %v2616_v1, %v2615_v46  ;;  %v2643_v20 = vadd.f32 %v2642_v55, %v2641_v60  ;;  %v2620_v58 = vadd.f32 %v2619_v49, %v2618_v45  ;;  %v3945_v60 = vmov 1966171168  }
 0x301   :  { %v2646_v61 = vadd.f32 %v4961_v14, %v4959_v56  ;;  %3869 = vpow2.f32 %v2591_v28  ;;  %v2577_v38 = vsub.f32 %v4929_v22, %v2562_v18  ;;  %v2578_v46 = vsub.f32 %v4931_v19, %v2562_v18  ;;  %v3123_v22 = vld [vmem:[%s5298_s3] sm:$0x3f] }
 0x302   :  { %3871 = vrcp.f32 %v2617_v33  ;;  %v2644_v51 = vrot.slane %v2643_v20, 1  ;;  %v2621_v12 = vrot.slane %v2620_v58, 2  ;;  %v3255_v45 = vunpack.c.l.s4 %v3945_v60 }
 0x303   :  { %v4965_v39 = vpop.eup %3861  ;;  %v2647_v42 = vrot.slane %v2646_v61, 4  ;;  %3873 = vpow2.f32 %v2593_v10  ;;  %v2607_v33 = vmul.f32 1.442695, %v2577_v38  ;;  %v2609_v18 = vmul.f32 1.442695, %v2578_v46 }
 0x304   :  { %5515 = vst [vmem:[#allocation92_spill] sm:$0xff] %v4965_v39  ;;  %v4968_v27 = vpop.eup %3863  ;;  %v2645_v9 = vadd.f32 %v2644_v51, %v2643_v20  ;;  %v2622_v36 = vadd.f32 %v2621_v12, %v2620_v58  ;;  %v3256_v20 = vunpack.c.0.s8 %v3255_v45  ;;  %v4983_v12 = vrot.slane %v3123_v22, %v4430_v29 }
 0x305   :  { %5516 = vst [vmem:[#allocation93_spill] sm:$0xff] %v4968_v27  ;;  %v2648_v25 = vadd.f32 %v2647_v42, %v2646_v61  ;;  %v2625_v5 = vadd.f32 %v4968_v27, %v4965_v39  ;;  %v4986_v42 = vrot.slane %v3123_v22, %v4433_v62  ;;  %v4994_v38 = vrot.slane %v3123_v22, %v4448_v26 }
 0x306   :  { %v4973_v1 = vpop.eup %3865  ;;  %3875 = vrcp.f32 %v2645_v9  ;;  %v2623_v55 = vrot.slane %v2622_v36, 1  ;;  %v4989_v9 = vrot.slane %v3123_v22, %v4445_v35  ;;  %v5000_v29 = vrot.slane %v3123_v22, %v4734_v2 }
 0x307   :  { %5517 = vst [vmem:[#allocation94_spill] sm:$0xff] %v4973_v1  ;;  %v4975_v49 = vpop.eup %3867  ;;  %v2649_v28 = vrot.slane %v2648_v25, 2  ;;  %v2626_v10 = vrot.slane %v2625_v5, 4  ;;  %3877 = vpow2.f32 %v2607_v33  ;;  %v5521_v33 = vld [vmem:[#allocation8_spill] sm:$0xff] }
 0x308   :  { %5518 = vst [vmem:[#allocation95_spill] sm:$0xff] %v4975_v49  ;;  %v2653_v19 = vadd.f32 %v4975_v49, %v4973_v1  ;;  %v2624_v58 = vadd.f32 %v2623_v55, %v2622_v36  ;;  %3879 = vpow2.f32 %v2609_v18  ;;  %v5531_v49 = vld [vmem:[#allocation24_spill] sm:$0xff] }
 0x309   :  { %v2650_v61 = vadd.f32 %v2649_v28, %v2648_v25  ;;  %v2627_v51 = vadd.f32 %v2626_v10, %v2625_v5  ;;  %v4997_v25 = vrot.slane %v3123_v22, %v4726_v6  ;;  %v5007_v5 = vsub.s32 %v3256_v20, %v4427_v17 }
 0x30a   :  { %v2654_v60 = vrot.slane %v2653_v19, 4  ;;  %3881 = vrcp.f32 %v2624_v58  ;;  %v5524_v58 = vld [vmem:[#allocation71_spill] sm:$0xff] }
 0x30b   :  { %v4991_v24 = vpop.eup %3869  ;;  %v2651_v46 = vrot.slane %v2650_v61, 1  ;;  %v2628_v45 = vrot.slane %v2627_v51, 2 }
 0x30c   :  { %5519 = vst [vmem:[#allocation96_spill] sm:$0xff] %v4991_v24  ;;  %v3872_v36 = vpop.eup %3871  ;;  %v5002_v62 = vadd.f32 %v2654_v60, %v2653_v19  ;;  %v5522_v19 = vld [vmem:[#allocation39_spill] sm:$0xff]  ;;  %v5525_v60 = vld [vmem:[#allocation72_spill] sm:$0xff] }
 0x30d   :  { %v5004_v35 = vpop.eup %3873  ;;  %v2668_v26 = vmul.f32 %v3872_v36, %v4933_v59  ;;  %v2669_v55 = vmul.f32 %v3872_v36, %v4937_v43  ;;  %v5011_v28 = vadd.f32 %v2651_v46, %v2650_v61  ;;  %v5013_v6 = vadd.f32 %v2628_v45, %v2627_v51  ;;  %v5523_v59 = vld [vmem:[#allocation40_spill] sm:$0xff]  ;;  %v5526_v46 = vld [vmem:[#allocation9_spill] sm:$0xff]  ;;  %v5527_v36 = vld [vmem:[#allocation10_spill] sm:$0xff] }
 0x30e   :  { %5520 = vst [vmem:[#allocation97_spill] sm:$0xff] %v5004_v35  ;;  %v5018_v22 = vadd.f32 %v5004_v35, %v4991_v24  ;;  %v5529_v35 = vld [vmem:[#allocation42_spill] sm:$0xff] }
 0x30f   :  { %v2691_v10 = vmul.f32 %v4329_v44, %v2668_v26  ;;  %v2692_v17 = vmul.f32 %v5521_v33, %v2668_v26  ;;  %v2693_v18 = vmul.f32 %v2668_v26, %v5522_v19  ;;  %v2694_v20 = vmul.f32 %v2668_v26, %v5523_v59 }
 0x310   :  { %v3876_v43 = vpop.eup %3875  ;;  %v2695_v61 = vmul.f32 %v2668_v26, %v5524_v58  ;;  %v2696_v51 = vmul.f32 %v2668_v26, %v5525_v60  ;;  %v2697_v45 = vmul.f32 %v5526_v46, %v2669_v55  ;;  %v2698_v2 = vmul.f32 %v5527_v36, %v2669_v55 }
 0x311   :  { %v2699_v63 = vmul.f32 %v2669_v55, %v5528_v40  ;;  %v2700_v24 = vmul.f32 %v2669_v55, %v5529_v35  ;;  %v2701_v44 = vmul.f32 %v2669_v55, %v4761_v23  ;;  %v2702_v33 = vmul.f32 %v2669_v55, %v4769_v31  ;;  %v5036_v1 = vpop.eup %3877 }
 0x312   :  { %v2787_v19 = vadd.f32 %v2697_v45, %v2691_v10  ;;  %v2794_v54 = vadd.f32 %v2698_v2, %v2692_v17  ;;  %v2680_v59 = vmul.f32 %v3876_v43, %v4943_v53  ;;  %v2681_v58 = vmul.f32 %v3876_v43, %v4945_v11  ;;  %v5038_v10 = vpop.eup %3879  ;;  %v5533_v17 = vld [vmem:[#allocation56_spill] sm:$0xff] }
 0x313   :  { %v2801_v32 = vadd.f32 %v2699_v63, %v2693_v18  ;;  %v2808_v26 = vadd.f32 %v2700_v24, %v2694_v20  ;;  %v2815_v60 = vadd.f32 %v2701_v44, %v2695_v61  ;;  %v2822_v46 = vadd.f32 %v2702_v33, %v2696_v51  ;;  %v5532_v63 = vld [vmem:[#allocation55_spill] sm:$0xff] }
 0x314   :  { %v2788_v48 = vrot.slane %v2787_v19, 4  ;;  %v2795_v36 = vrot.slane %v2794_v54, 4  ;;  %v2739_v40 = vmul.f32 %v5530_v47, %v2680_v59  ;;  %v2740_v35 = vmul.f32 %v5531_v49, %v2680_v59  ;;  %v5042_v20 = vpop.eup %3881 }
 0x315   :  { %v2802_v23 = vrot.slane %v2801_v32, 4  ;;  %v2809_v31 = vrot.slane %v2808_v26, 4  ;;  %v2816_v55 = vrot.slane %v2815_v60, 4  ;;  %v2823_v2 = vrot.slane %v2822_v46, 4 }
 0x316   :  { %v2789_v53 = vadd.f32 %v2788_v48, %v2787_v19  ;;  %v2796_v11 = vadd.f32 %v2795_v36, %v2794_v54  ;;  %v2741_v24 = vmul.f32 %v2680_v59, %v5532_v63  ;;  %v2742_v18 = vmul.f32 %v2680_v59, %v5533_v17  ;;  %v5534_v63 = vld [vmem:[#allocation25_spill] sm:$0xff] }
 0x317   :  { %v2803_v43 = vadd.f32 %v2802_v23, %v2801_v32  ;;  %v2810_v47 = vadd.f32 %v2809_v31, %v2808_v26  ;;  %v2817_v61 = vadd.f32 %v2816_v55, %v2815_v60  ;;  %v2824_v49 = vadd.f32 %v2823_v2, %v2822_v46  ;;  %v5536_v55 = vld [vmem:[#allocation57_spill] sm:$0xff]  ;;  %v5537_v2 = vld [vmem:[#allocation58_spill] sm:$0xff] }
 0x318   :  { %v2790_v51 = vrot.slane %v2789_v53, 2  ;;  %v2797_v45 = vrot.slane %v2796_v11, 2  ;;  %v2743_v44 = vmul.f32 %v4750_v3, %v2680_v59  ;;  %v2744_v33 = vmul.f32 %v4758_v8, %v2680_v59 }
 0x319   :  { %v2804_v21 = vrot.slane %v2803_v43, 2  ;;  %v2811_v37 = vrot.slane %v2810_v47, 2  ;;  %v2818_v48 = vrot.slane %v2817_v61, 2  ;;  %v2825_v54 = vrot.slane %v2824_v49, 2 }
 0x31a   :  { %v2791_v19 = vadd.f32 %v2790_v51, %v2789_v53  ;;  %v2798_v36 = vadd.f32 %v2797_v45, %v2796_v11  ;;  %v2745_v17 = vmul.f32 %v5534_v63, %v2681_v58  ;;  %v2746_v30 = vmul.f32 %v5535_v50, %v2681_v58  ;;  %v5538_v51 = vld [vmem:[#allocation73_spill] sm:$0xff]  ;;  %v5539_v63 = vld [vmem:[#allocation74_spill] sm:$0xff] }
 0x31b   :  { %v2805_v32 = vadd.f32 %v2804_v21, %v2803_v43  ;;  %v2812_v26 = vadd.f32 %v2811_v37, %v2810_v47  ;;  %v2819_v60 = vadd.f32 %v2818_v48, %v2817_v61  ;;  %v2826_v46 = vadd.f32 %v2825_v54, %v2824_v49 }
 0x31c   :  { %v2792_v23 = vrot.slane %v2791_v19, 1  ;;  %v2799_v31 = vrot.slane %v2798_v36, 1  ;;  %v2747_v3 = vmul.f32 %v2681_v58, %v5536_v55  ;;  %v2748_v8 = vmul.f32 %v2681_v58, %v5537_v2 }
 0x31d   :  { %v2806_v59 = vrot.slane %v2805_v32, 1  ;;  %v2813_v27 = vrot.slane %v2812_v26, 1  ;;  %v2820_v39 = vrot.slane %v2819_v60, 1  ;;  %v2827_v41 = vrot.slane %v2826_v46, 1 }
 0x31e   :  { %v2793_v53 = vadd.f32 %v2792_v23, %v2791_v19  ;;  %v2800_v11 = vadd.f32 %v2799_v31, %v2798_v36  ;;  %v2749_v45 = vmul.f32 %v5538_v51, %v2681_v58  ;;  %v2750_v50 = vmul.f32 %v5539_v63, %v2681_v58 }
 0x31f   :  { %v2807_v21 = vadd.f32 %v2806_v59, %v2805_v32  ;;  %v2814_v37 = vadd.f32 %v2813_v27, %v2812_v26  ;;  %v2821_v43 = vadd.f32 %v2820_v39, %v2819_v60  ;;  %v2828_v47 = vadd.f32 %v2827_v41, %v2826_v46 }
 0x320   :  { %v3155_v61 = vadd.f32 %v4983_v12, %v2793_v53  ;;  %v3156_v49 = vadd.f32 %v4986_v42, %v2800_v11  ;;  %v2955_v48 = vadd.f32 %v2745_v17, %v2739_v40  ;;  %v2962_v54 = vadd.f32 %v2746_v30, %v2740_v35 }
 0x321   :  { %v3157_v55 = vadd.f32 %v4989_v9, %v2807_v21  ;;  %v3158_v2 = vadd.f32 %v4994_v38, %v2814_v37  ;;  %v3159_v19 = vadd.f32 %v4997_v25, %v2821_v43  ;;  %v3160_v36 = vadd.f32 %v5000_v29, %v2828_v47 }
 0x322   :  { %v5540_v23 = vlaneseq  ;;  %v3251_v41 = vcombine.low %v3155_v61, %v3156_v49  ;;  %v2956_v39 = vrot.slane %v2955_v48, 4  ;;  %v2963_v27 = vrot.slane %v2962_v54, 4 }
 0x323   :  { %v2969_v32 = vadd.f32 %v2747_v3, %v2741_v24  ;;  %v3252_v26 = vcombine.low %v3157_v55, %v3158_v2  ;;  %v3253_v40 = vcombine.low %v3159_v19, %v3160_v36  ;;  %v2976_v30 = vadd.f32 %v2748_v8, %v2742_v18 }
 0x324   :  { %vm5059_vm2 = vcmp.lt.s32.totalorder %v5540_v23, 768  ;;  %v2983_v35 = vadd.f32 %v2749_v45, %v2743_v44  ;;  %v3260_v17 = vrot.slane %v3251_v41, %v5007_v5  ;;  %v2957_v60 = vadd.f32 %v2956_v39, %v2955_v48 }
 0x325   :  { %v2964_v46 = vadd.f32 %v2963_v27, %v2962_v54  ;;  %v2970_v31 = vrot.slane %v2969_v32, 4  ;;  %v3267_v59 = vrot.slane %v3252_v26, %v5007_v5  ;;  %v3274_v53 = vrot.slane %v3253_v40, %v5007_v5 }
 0x326   :  { %v2977_v11 = vrot.slane %v2976_v30, 4  ;;  %v2984_v51 = vrot.slane %v2983_v35, 4  ;;  %v2958_v63 = vrot.slane %v2957_v60, 2  ;;  %v2990_v43 = vadd.f32 %v2750_v50, %v2744_v33 }
 0x327   :  { %v2965_v21 = vrot.slane %v2964_v46, 2  ;;  %v2971_v37 = vadd.f32 %v2970_v31, %v2969_v32  ;;  %v3275_v24 = vcombine.low %v3260_v17, %v3267_v59  ;;  %v3289_v3 = vrot.slane %v3274_v53, %v5007_v5 }
 0x328   :  { %v2978_v18 = vadd.f32 %v2977_v11, %v2976_v30  ;;  %v2985_v44 = vadd.f32 %v2984_v51, %v2983_v35  ;;  %v2959_v8 = vadd.f32 %v2958_v63, %v2957_v60  ;;  %v2991_v61 = vrot.slane %v2990_v43, 4  ;;  %v5543_v35 = vld [vmem:[#allocation11_spill] sm:$0xff]  ;;  %v5544_v60 = vld [vmem:[#allocation12_spill] sm:$0xff] }
 0x329   :  { %v2966_v45 = vadd.f32 %v2965_v21, %v2964_v46  ;;  %v2972_v47 = vrot.slane %v2971_v37, 2  ;;  %v3282_v49 = vrot.slane %v3275_v24, %v5007_v5  ;;  %v2671_v55 = vmul.f32 %v5042_v20, %v4951_v16  ;;  %v5545_v51 = vld [vmem:[#allocation43_spill] sm:$0xff]  ;;  %v5546_v21 = vld [vmem:[#allocation44_spill] sm:$0xff] }
 0x32a   :  { %v2979_v48 = vrot.slane %v2978_v18, 2  ;;  %v2986_v54 = vrot.slane %v2985_v44, 2  ;;  %v2960_v2 = vrot.slane %v2959_v8, 1  ;;  %v2992_v33 = vadd.f32 %v2991_v61, %v2990_v43 }
 0x32b   :  { %v2967_v19 = vrot.slane %v2966_v45, 1  ;;  %v2973_v36 = vadd.f32 %v2972_v47, %v2971_v37  ;;  %v3290_v50 = vcombine.low %v3282_v49, %v3289_v3  ;;  %v2672_v39 = vmul.f32 %v5042_v20, %v4953_v4  ;;  %v5547_v47 = vld [vmem:[#allocation13_spill] sm:$0xff] }
 0x32c   :  { %v2980_v23 = vadd.f32 %v2979_v48, %v2978_v18  ;;  %v2987_v41 = vadd.f32 %v2986_v54, %v2985_v44  ;;  %v2961_v27 = vadd.f32 %v2960_v2, %v2959_v8  ;;  %v2993_v40 = vrot.slane %v2992_v33, 2  ;;  %v5548_v54 = vld [vmem:[#allocation14_spill] sm:$0xff] }
 0x32d   :  { %v2968_v32 = vadd.f32 %v2967_v19, %v2966_v45  ;;  %v2974_v26 = vrot.slane %v2973_v36, 1  ;;  %3583 = vst.msk [vmem:[%s5299_s4] sm:$0x3f] %vm5059_vm2, %v3290_v50  ;;  %v2703_v17 = vmul.f32 %v5543_v35, %v2671_v55  ;;  %v2704_v46 = vmul.f32 %v5544_v60, %v2671_v55  ;;  %v5549_v19 = vld [vmem:[#allocation45_spill] sm:$0xff]  ;;  %v5550_v50 = vld [vmem:[#allocation46_spill] sm:$0xff] }
 0x32e   :  { %v2981_v16 = vrot.slane %v2980_v23, 1  ;;  %v2988_v30 = vrot.slane %v2987_v41, 1  ;;  %v2994_v59 = vadd.f32 %v2993_v40, %v2992_v33  ;;  %v3179_v4 = vadd.f32 %v4983_v12, %v2961_v27 }
 0x32f   :  { %v2975_v31 = vadd.f32 %v2974_v26, %v2973_v36  ;;  %v3180_v20 = vadd.f32 %v4986_v42, %v2968_v32  ;;  %v2705_v63 = vmul.f32 %v2671_v55, %v5545_v51  ;;  %v2706_v37 = vmul.f32 %v2671_v55, %v5546_v21 }
 0x330   :  { %v2982_v53 = vadd.f32 %v2981_v16, %v2980_v23  ;;  %v2989_v11 = vadd.f32 %v2988_v30, %v2987_v41  ;;  %v2995_v43 = vrot.slane %v2994_v59, 1  ;;  %v2707_v18 = vmul.f32 %v2671_v55, %v4790_v57 }
 0x331   :  { %v3181_v24 = vadd.f32 %v4989_v9, %v2975_v31  ;;  %v3411_v3 = vcombine.low %v3179_v4, %v3180_v20  ;;  %v2708_v45 = vmul.f32 %v2671_v55, %v4797_v15  ;;  %v2709_v61 = vmul.f32 %v5547_v47, %v2672_v39 }
 0x332   :  { %v3182_v44 = vadd.f32 %v4994_v38, %v2982_v53  ;;  %v3183_v8 = vadd.f32 %v4997_v25, %v2989_v11  ;;  %v2996_v49 = vadd.f32 %v2995_v43, %v2994_v59  ;;  %v2710_v2 = vmul.f32 %v5548_v54, %v2672_v39 }
 0x333   :  { %v3420_v48 = vrot.slane %v3411_v3, %v5007_v5  ;;  %v2711_v36 = vmul.f32 %v2672_v39, %v5549_v19  ;;  %v2712_v23 = vmul.f32 %v2672_v39, %v5550_v50  ;;  %v2713_v57 = vmul.f32 %v2672_v39, %v4804_v13 }
 0x334   :  { %v3412_v33 = vcombine.low %v3181_v24, %v3182_v44  ;;  %v2714_v41 = vmul.f32 %v2672_v39, %v4810_v7  ;;  %v3184_v27 = vadd.f32 %v5000_v29, %v2996_v49  ;;  %v2829_v32 = vadd.f32 %v2709_v61, %v2703_v17 }
 0x335   :  { %v2836_v15 = vadd.f32 %v2710_v2, %v2704_v46  ;;  %v2843_v55 = vadd.f32 %v2711_v36, %v2705_v63  ;;  %v2850_v40 = vadd.f32 %v2712_v23, %v2706_v37  ;;  %v2857_v16 = vadd.f32 %v2713_v57, %v2707_v18 }
 0x336   :  { %v3427_v26 = vrot.slane %v3412_v33, %v5007_v5  ;;  %v2864_v30 = vadd.f32 %v2714_v41, %v2708_v45  ;;  %v3413_v35 = vcombine.low %v3183_v8, %v3184_v27  ;;  %v2830_v60 = vrot.slane %v2829_v32, 4 }
 0x337   :  { %v2837_v31 = vrot.slane %v2836_v15, 4  ;;  %v2844_v59 = vrot.slane %v2843_v55, 4  ;;  %v2851_v20 = vrot.slane %v2850_v40, 4  ;;  %v2858_v53 = vrot.slane %v2857_v16, 4 }
 0x338   :  { %v3435_v4 = vcombine.low %v3420_v48, %v3427_v26  ;;  %v2865_v13 = vrot.slane %v2864_v30, 4  ;;  %v3434_v7 = vrot.slane %v3413_v35, %v5007_v5  ;;  %v2831_v39 = vadd.f32 %v2830_v60, %v2829_v32 }
 0x339   :  { %v2838_v11 = vadd.f32 %v2837_v31, %v2836_v15  ;;  %v2845_v17 = vadd.f32 %v2844_v59, %v2843_v55  ;;  %v2852_v51 = vadd.f32 %v2851_v20, %v2850_v40  ;;  %v2859_v63 = vadd.f32 %v2858_v53, %v2857_v16 }
 0x33a   :  { %v3442_v46 = vrot.slane %v3435_v4, %v5007_v5  ;;  %v2866_v21 = vadd.f32 %v2865_v13, %v2864_v30  ;;  %v3449_v37 = vrot.slane %v3434_v7, %v5007_v5  ;;  %v2832_v43 = vrot.slane %v2831_v39, 2 }
 0x33b   :  { %v2839_v24 = vrot.slane %v2838_v11, 2  ;;  %v2846_v3 = vrot.slane %v2845_v17, 2  ;;  %v2853_v18 = vrot.slane %v2852_v51, 2  ;;  %v2860_v44 = vrot.slane %v2859_v63, 2 }
 0x33c   :  { %v2867_v8 = vrot.slane %v2866_v21, 2  ;;  %3883 = vrcp.f32 %v5011_v28  ;;  %v3450_v45 = vcombine.low %v3442_v46, %v3449_v37  ;;  %v2833_v47 = vadd.f32 %v2832_v43, %v2831_v39 }
 0x33d   :  { %v2840_v61 = vadd.f32 %v2839_v24, %v2838_v11  ;;  %v2847_v49 = vadd.f32 %v2846_v3, %v2845_v17  ;;  %v2854_v48 = vadd.f32 %v2853_v18, %v2852_v51  ;;  %v2861_v54 = vadd.f32 %v2860_v44, %v2859_v63  ;;  %v5552_v18 = vld [vmem:[#allocation27_spill] sm:$0xff] }
 0x33e   :  { %v2868_v2 = vadd.f32 %v2867_v8, %v2866_v21  ;;  %v2630_v19 = vrot.slane %v5013_v6, 1  ;;  %3587 = vst.msk [vmem:[%s5299_s4 + $0x18] sm:$0x3f] %vm5059_vm2, %v3450_v45  ;;  %v2834_v36 = vrot.slane %v2833_v47, 1  ;;  %v5551_v28 = vrot.slane %v5002_v62, 2  ;;  %v5553_v8 = vld [vmem:[#allocation28_spill] sm:$0xff] }
 0x33f   :  { %v2841_v33 = vrot.slane %v2840_v61, 1  ;;  %v2848_v50 = vrot.slane %v2847_v49, 1  ;;  %v2855_v57 = vrot.slane %v2854_v48, 1  ;;  %v2862_v41 = vrot.slane %v2861_v54, 1 }
 0x340   :  { %v2657_v23 = vadd.f32 %v5551_v28, %v5002_v62  ;;  %v2869_v27 = vrot.slane %v2868_v2, 1  ;;  %v2631_v32 = vadd.f32 %v2630_v19, %v5013_v6  ;;  %v2835_v15 = vadd.f32 %v2834_v36, %v2833_v47  ;;  %v5554_v47 = vld [vmem:[#allocation59_spill] sm:$0xff]  ;;  %v5557_v36 = vld [vmem:[#allocation30_spill] sm:$0xff] }
 0x341   :  { %v2842_v55 = vadd.f32 %v2841_v33, %v2840_v61  ;;  %v2849_v26 = vadd.f32 %v2848_v50, %v2847_v49  ;;  %v2856_v16 = vadd.f32 %v2855_v57, %v2854_v48  ;;  %v2863_v30 = vadd.f32 %v2862_v41, %v2861_v54  ;;  %v5555_v61 = vld [vmem:[#allocation60_spill] sm:$0xff]  ;;  %v5558_v50 = vld [vmem:[#allocation61_spill] sm:$0xff] }
 0x342   :  { %v2658_v40 = vrot.slane %v2657_v23, 1  ;;  %v2870_v35 = vadd.f32 %v2869_v27, %v2868_v2  ;;  %3885 = vrcp.f32 %v2631_v32  ;;  %v3161_v60 = vadd.f32 %v4983_v12, %v2835_v15  ;;  %v5556_v2 = vld [vmem:[#allocation29_spill] sm:$0xff]  ;;  %v5560_v15 = vld [vmem:[#allocation75_spill] sm:$0xff] }
 0x343   :  { %v3162_v31 = vadd.f32 %v4986_v42, %v2842_v55  ;;  %v3163_v59 = vadd.f32 %v4989_v9, %v2849_v26  ;;  %v3164_v4 = vadd.f32 %v4994_v38, %v2856_v16  ;;  %v3165_v20 = vadd.f32 %v4997_v25, %v2863_v30 }
 0x344   :  { %v2659_v62 = vadd.f32 %v2658_v40, %v2657_v23  ;;  %v3166_v6 = vadd.f32 %v5000_v29, %v2870_v35  ;;  %v2633_v53 = vrot.slane %v5018_v22, 4  ;;  %v5120_v7 = vadd.f32 %v5038_v10, %v5036_v1  ;;  %v5559_v23 = vld [vmem:[#allocation62_spill] sm:$0xff] }
 0x345   :  { %v3291_v13 = vcombine.low %v3161_v60, %v3162_v31  ;;  %v3292_v11 = vcombine.low %v3163_v59, %v3164_v4  ;;  %v5561_v31 = vld [vmem:[#allocation92_spill] sm:$0xff] }
 0x346   :  { %v3884_v39 = vpop.eup %3883  ;;  %v3293_v17 = vcombine.low %v3165_v20, %v3166_v6  ;;  %v2634_v46 = vadd.f32 %v2633_v53, %v5018_v22  ;;  %3887 = vrcp.f32 %v2659_v62  ;;  %v2661_v3 = vrot.slane %v5120_v7, 4 }
 0x347   :  { %v3300_v51 = vrot.slane %v3291_v13, %v5007_v5  ;;  %v2683_v63 = vmul.f32 %v3884_v39, %v4959_v56  ;;  %v2684_v21 = vmul.f32 %v3884_v39, %v4961_v14  ;;  %v3307_v37 = vrot.slane %v3292_v11, %v5007_v5  ;;  %v5562_v13 = vld [vmem:[#allocation93_spill] sm:$0xff]  ;;  %v5563_v11 = vld [vmem:[#allocation15_spill] sm:$0xff] }
 0x348   :  { %v3314_v43 = vrot.slane %v3293_v17, %v5007_v5  ;;  %v2635_v24 = vrot.slane %v2634_v46, 2 }
 0x349   :  { %v2751_v44 = vmul.f32 %v5552_v18, %v2683_v63  ;;  %v2752_v45 = vmul.f32 %v5553_v8, %v2683_v63  ;;  %v2753_v22 = vmul.f32 %v2683_v63, %v5554_v47  ;;  %v2754_v49 = vmul.f32 %v2683_v63, %v5555_v61  ;;  %v5564_v18 = vld [vmem:[#allocation16_spill] sm:$0xff]  ;;  %v5565_v8 = vld [vmem:[#allocation47_spill] sm:$0xff] }
 0x34a   :  { %v3315_v48 = vcombine.low %v3300_v51, %v3307_v37  ;;  %v3329_v56 = vrot.slane %v3314_v43, %v5007_v5  ;;  %v2755_v14 = vmul.f32 %v4793_v52, %v2683_v63  ;;  %v2756_v54 = vmul.f32 %v4800_v34, %v2683_v63 }
 0x34b   :  { %v2757_v19 = vmul.f32 %v5556_v2, %v2684_v21  ;;  %v2758_v33 = vmul.f32 %v5557_v36, %v2684_v21  ;;  %v2759_v28 = vmul.f32 %v2684_v21, %v5558_v50  ;;  %v2760_v57 = vmul.f32 %v2684_v21, %v5559_v23  ;;  %v5567_v2 = vld [vmem:[#allocation76_spill] sm:$0xff] }
 0x34c   :  { %v3886_v41 = vpop.eup %3885  ;;  %v3322_v27 = vrot.slane %v3315_v48, %v5007_v5  ;;  %v2761_v32 = vmul.f32 %v4807_v0, %v2684_v21  ;;  %v2762_v55 = vmul.f32 %v5560_v15, %v2684_v21  ;;  %v5143_v26 = vadd.f32 %v2635_v24, %v2634_v46 }
 0x34d   :  { %v2997_v52 = vadd.f32 %v2757_v19, %v2751_v44  ;;  %v3004_v40 = vadd.f32 %v2758_v33, %v2752_v45  ;;  %v3011_v34 = vadd.f32 %v2759_v28, %v2753_v22  ;;  %v3018_v16 = vadd.f32 %v2760_v57, %v2754_v49 }
 0x34e   :  { %v3330_v30 = vcombine.low %v3322_v27, %v3329_v56  ;;  %v3025_v35 = vadd.f32 %v2761_v32, %v2755_v14  ;;  %v3032_v60 = vadd.f32 %v2762_v55, %v2756_v54  ;;  %v2674_v59 = vmul.f32 %v3886_v41, %v5561_v31  ;;  %v5566_v14 = vld [vmem:[#allocation48_spill] sm:$0xff]  ;;  %v5569_v32 = vld [vmem:[#allocation17_spill] sm:$0xff] }
 0x34f   :  { %v2998_v62 = vrot.slane %v2997_v52, 4  ;;  %v3005_v4 = vrot.slane %v3004_v40, 4  ;;  %v3012_v20 = vrot.slane %v3011_v34, 4  ;;  %v3019_v6 = vrot.slane %v3018_v16, 4  ;;  %v5571_v31 = vld [vmem:[#allocation49_spill] sm:$0xff] }
 0x350   :  { %3584 = vst.msk [vmem:[%s5299_s4 + $0x6] sm:$0x3f] %vm5059_vm2, %v3330_v30  ;;  %v3026_v0 = vrot.slane %v3025_v35, 4  ;;  %v3033_v53 = vrot.slane %v3032_v60, 4  ;;  %v2675_v39 = vmul.f32 %v3886_v41, %v5562_v13  ;;  %v2715_v17 = vmul.f32 %v5563_v11, %v2674_v59  ;;  %v5153_v46 = vpop.eup %3887  ;;  %v5568_v41 = vld [vmem:[#allocation78_spill] sm:$0xff] }
 0x351   :  { %v2999_v51 = vadd.f32 %v2998_v62, %v2997_v52  ;;  %v3006_v63 = vadd.f32 %v3005_v4, %v3004_v40  ;;  %v3013_v21 = vadd.f32 %v3012_v20, %v3011_v34  ;;  %v3020_v37 = vadd.f32 %v3019_v6, %v3018_v16  ;;  %v5572_v11 = vld [vmem:[#allocation50_spill] sm:$0xff] }
 0x352   :  { %v3027_v43 = vadd.f32 %v3026_v0, %v3025_v35  ;;  %v3034_v24 = vadd.f32 %v3033_v53, %v3032_v60  ;;  %v2716_v44 = vmul.f32 %v5564_v18, %v2674_v59  ;;  %v2717_v45 = vmul.f32 %v2674_v59, %v5565_v8  ;;  %v5570_v35 = vld [vmem:[#allocation18_spill] sm:$0xff] }
 0x353   :  { %v3000_v47 = vrot.slane %v2999_v51, 2  ;;  %v3007_v22 = vrot.slane %v3006_v63, 2  ;;  %v3014_v61 = vrot.slane %v3013_v21, 2  ;;  %v3021_v49 = vrot.slane %v3020_v37, 2 }
 0x354   :  { %v3028_v48 = vrot.slane %v3027_v43, 2  ;;  %v3035_v56 = vrot.slane %v3034_v24, 2  ;;  %v2718_v54 = vmul.f32 %v2674_v59, %v5566_v14  ;;  %v2719_v19 = vmul.f32 %v2674_v59, %v5567_v2 }
 0x355   :  { %v3001_v36 = vadd.f32 %v3000_v47, %v2999_v51  ;;  %v3008_v33 = vadd.f32 %v3007_v22, %v3006_v63  ;;  %v3015_v50 = vadd.f32 %v3014_v61, %v3013_v21  ;;  %v3022_v28 = vadd.f32 %v3021_v49, %v3020_v37  ;;  %v5573_v51 = vld [vmem:[#allocation80_spill] sm:$0xff]  ;;  %v5574_v47 = vld [vmem:[#allocation82_spill] sm:$0xff] }
 0x356   :  { %v3029_v23 = vadd.f32 %v3028_v48, %v3027_v43  ;;  %v3036_v57 = vadd.f32 %v3035_v56, %v3034_v24  ;;  %v2720_v27 = vmul.f32 %v2674_v59, %v5568_v41  ;;  %v2721_v15 = vmul.f32 %v5569_v32, %v2675_v39 }
 0x357   :  { %v3002_v55 = vrot.slane %v3001_v36, 1  ;;  %v3009_v52 = vrot.slane %v3008_v33, 1  ;;  %v3016_v40 = vrot.slane %v3015_v50, 1  ;;  %v3023_v34 = vrot.slane %v3022_v28, 1 }
 0x358   :  { %v3030_v16 = vrot.slane %v3029_v23, 1  ;;  %v3037_v30 = vrot.slane %v3036_v57, 1  ;;  %v2722_v60 = vmul.f32 %v5570_v35, %v2675_v39  ;;  %v2723_v62 = vmul.f32 %v2675_v39, %v5571_v31 }
 0x359   :  { %v3003_v4 = vadd.f32 %v3002_v55, %v3001_v36  ;;  %v3010_v20 = vadd.f32 %v3009_v52, %v3008_v33  ;;  %v3017_v6 = vadd.f32 %v3016_v40, %v3015_v50  ;;  %v3024_v0 = vadd.f32 %v3023_v34, %v3022_v28 }
 0x35a   :  { %v3031_v53 = vadd.f32 %v3030_v16, %v3029_v23  ;;  %v3038_v13 = vadd.f32 %v3037_v30, %v3036_v57  ;;  %v2724_v59 = vmul.f32 %v2675_v39, %v5572_v11  ;;  %v2725_v63 = vmul.f32 %v2675_v39, %v5573_v51 }
 0x35b   :  { %v3185_v21 = vadd.f32 %v4983_v12, %v3003_v4  ;;  %v3186_v37 = vadd.f32 %v4986_v42, %v3010_v20  ;;  %v3187_v43 = vadd.f32 %v4989_v9, %v3017_v6  ;;  %v3188_v24 = vadd.f32 %v4994_v38, %v3024_v0  ;;  %v5575_v20 = vld [vmem:[#allocation94_spill] sm:$0xff] }
 0x35c   :  { %v3189_v18 = vadd.f32 %v4997_v25, %v3031_v53  ;;  %v3190_v8 = vadd.f32 %v5000_v29, %v3038_v13  ;;  %v2726_v22 = vmul.f32 %v2675_v39, %v5574_v47  ;;  %v2871_v61 = vadd.f32 %v2721_v15, %v2715_v17 }
 0x35d   :  { %v3451_v49 = vcombine.low %v3185_v21, %v3186_v37  ;;  %v3452_v48 = vcombine.low %v3187_v43, %v3188_v24  ;;  %v2878_v56 = vadd.f32 %v2722_v60, %v2716_v44  ;;  %v2885_v14 = vadd.f32 %v2723_v62, %v2717_v45 }
 0x35e   :  { %v3453_v2 = vcombine.low %v3189_v18, %v3190_v8  ;;  %v2872_v36 = vrot.slane %v2871_v61, 4  ;;  %v2892_v33 = vadd.f32 %v2724_v59, %v2718_v54  ;;  %v2899_v50 = vadd.f32 %v2725_v63, %v2719_v19  ;;  %v5576_v63 = vld [vmem:[#allocation95_spill] sm:$0xff] }
 0x35f   :  { %v3460_v28 = vrot.slane %v3451_v49, %v5007_v5  ;;  %v3467_v23 = vrot.slane %v3452_v48, %v5007_v5  ;;  %v2879_v57 = vrot.slane %v2878_v56, 4  ;;  %v2886_v41 = vrot.slane %v2885_v14, 4  ;;  %v5577_v18 = vld [vmem:[#allocation31_spill] sm:$0xff]  ;;  %v5578_v49 = vld [vmem:[#allocation32_spill] sm:$0xff] }
 0x360   :  { %v3474_v32 = vrot.slane %v3453_v2, %v5007_v5  ;;  %v2873_v55 = vadd.f32 %v2872_v36, %v2871_v61  ;;  %v2893_v52 = vrot.slane %v2892_v33, 4  ;;  %v2900_v39 = vrot.slane %v2899_v50, 4 }
 0x361   :  { %v3475_v17 = vcombine.low %v3460_v28, %v3467_v23  ;;  %v2880_v15 = vadd.f32 %v2879_v57, %v2878_v56  ;;  %v2887_v40 = vadd.f32 %v2886_v41, %v2885_v14  ;;  %v2906_v44 = vadd.f32 %v2726_v22, %v2720_v27  ;;  %v5580_v23 = vld [vmem:[#allocation64_spill] sm:$0xff] }
 0x362   :  { %v3489_v45 = vrot.slane %v3474_v32, %v5007_v5  ;;  %v2874_v34 = vrot.slane %v2873_v55, 2  ;;  %v2894_v54 = vadd.f32 %v2893_v52, %v2892_v33  ;;  %v2901_v19 = vadd.f32 %v2900_v39, %v2899_v50  ;;  %v5581_v52 = vld [vmem:[#allocation77_spill] sm:$0xff] }
 0x363   :  { %v3482_v16 = vrot.slane %v3475_v17, %v5007_v5  ;;  %v2881_v30 = vrot.slane %v2880_v15, 2  ;;  %v2888_v35 = vrot.slane %v2887_v40, 2  ;;  %v2907_v60 = vrot.slane %v2906_v44, 4 }
 0x364   :  { %v2875_v31 = vadd.f32 %v2874_v34, %v2873_v55  ;;  %v2895_v62 = vrot.slane %v2894_v54, 2  ;;  %v2902_v4 = vrot.slane %v2901_v19, 2  ;;  %v2686_v6 = vmul.f32 %v5153_v46, %v5575_v20  ;;  %v5587_v20 = vld [vmem:[#allocation81_spill] sm:$0xff] }
 0x365   :  { %v3490_v0 = vcombine.low %v3482_v16, %v3489_v45  ;;  %v2882_v53 = vadd.f32 %v2881_v30, %v2880_v15  ;;  %v2889_v13 = vadd.f32 %v2888_v35, %v2887_v40  ;;  %v2908_v27 = vadd.f32 %v2907_v60, %v2906_v44  ;;  %v5582_v40 = vld [vmem:[#allocation79_spill] sm:$0xff]  ;;  %v5583_v45 = vld [vmem:[#allocation33_spill] sm:$0xff]  ;;  %v5584_v16 = vld [vmem:[#allocation34_spill] sm:$0xff] }
 0x366   :  { %v2876_v11 = vrot.slane %v2875_v31, 1  ;;  %v2896_v59 = vadd.f32 %v2895_v62, %v2894_v54  ;;  %v2903_v51 = vadd.f32 %v2902_v4, %v2901_v19  ;;  %v2687_v21 = vmul.f32 %v5153_v46, %v5576_v63  ;;  %v5579_v46 = vld [vmem:[#allocation63_spill] sm:$0xff]  ;;  %v5585_v35 = vld [vmem:[#allocation65_spill] sm:$0xff]  ;;  %v5586_v62 = vld [vmem:[#allocation66_spill] sm:$0xff] }
 0x367   :  { %3588 = vst.msk [vmem:[%s5299_s4 + $0x1e] sm:$0x3f] %vm5059_vm2, %v3490_v0  ;;  %v2883_v37 = vrot.slane %v2882_v53, 1  ;;  %v2890_v43 = vrot.slane %v2889_v13, 1  ;;  %v2909_v24 = vrot.slane %v2908_v27, 2  ;;  %v2763_v8 = vmul.f32 %v5577_v18, %v2686_v6 }
 0x368   :  { %v2877_v47 = vadd.f32 %v2876_v11, %v2875_v31  ;;  %v2897_v22 = vrot.slane %v2896_v59, 1  ;;  %v2904_v61 = vrot.slane %v2903_v51, 1  ;;  %v2764_v48 = vmul.f32 %v5578_v49, %v2686_v6 }
 0x369   :  { %v2884_v56 = vadd.f32 %v2883_v37, %v2882_v53  ;;  %v2891_v14 = vadd.f32 %v2890_v43, %v2889_v13  ;;  %v2910_v2 = vadd.f32 %v2909_v24, %v2908_v27  ;;  %v2765_v36 = vmul.f32 %v2686_v6, %v5579_v46  ;;  %v5588_v53 = vld [vmem:[#allocation83_spill] sm:$0xff] }
 0x36a   :  { %v2898_v33 = vadd.f32 %v2897_v22, %v2896_v59  ;;  %v2905_v50 = vadd.f32 %v2904_v61, %v2903_v51  ;;  %v3167_v28 = vadd.f32 %v4983_v12, %v2877_v47  ;;  %v2766_v57 = vmul.f32 %v2686_v6, %v5580_v23 }
 0x36b   :  { %v2911_v41 = vrot.slane %v2910_v2, 1  ;;  %v3168_v32 = vadd.f32 %v4986_v42, %v2884_v56  ;;  %v3169_v55 = vadd.f32 %v4989_v9, %v2891_v14  ;;  %v2767_v39 = vmul.f32 %v5581_v52, %v2686_v6 }
 0x36c   :  { %v3170_v17 = vadd.f32 %v4994_v38, %v2898_v33  ;;  %v3171_v15 = vadd.f32 %v4997_v25, %v2905_v50  ;;  %v2768_v44 = vmul.f32 %v5582_v40, %v2686_v6  ;;  %v2769_v34 = vmul.f32 %v5583_v45, %v2687_v21 }
 0x36d   :  { %v2912_v54 = vadd.f32 %v2911_v41, %v2910_v2  ;;  %v3331_v19 = vcombine.low %v3167_v28, %v3168_v32  ;;  %v2770_v30 = vmul.f32 %v5584_v16, %v2687_v21  ;;  %v2771_v60 = vmul.f32 %v2687_v21, %v5585_v35 }
 0x36e   :  { %v3332_v31 = vcombine.low %v3169_v55, %v3170_v17  ;;  %v2772_v4 = vmul.f32 %v2687_v21, %v5586_v62  ;;  %v2773_v0 = vmul.f32 %v5587_v20, %v2687_v21  ;;  %v2774_v13 = vmul.f32 %v5588_v53, %v2687_v21 }
 0x36f   :  { %v3172_v27 = vadd.f32 %v5000_v29, %v2912_v54  ;;  %v3340_v11 = vrot.slane %v3331_v19, %v5007_v5  ;;  %v3039_v6 = vadd.f32 %v2769_v34, %v2763_v8  ;;  %v3046_v59 = vadd.f32 %v2770_v30, %v2764_v48 }
 0x370   :  { %v3347_v51 = vrot.slane %v3332_v31, %v5007_v5  ;;  %v3053_v63 = vadd.f32 %v2771_v60, %v2765_v36  ;;  %v3060_v37 = vadd.f32 %v2772_v4, %v2766_v57  ;;  %v3067_v43 = vadd.f32 %v2773_v0, %v2767_v39 }
 0x371   :  { %v3333_v24 = vcombine.low %v3171_v15, %v3172_v27  ;;  %v3040_v18 = vrot.slane %v3039_v6, 4  ;;  %v3047_v47 = vrot.slane %v3046_v59, 4  ;;  %v3074_v22 = vadd.f32 %v2774_v13, %v2768_v44 }
 0x372   :  { %v3355_v61 = vcombine.low %v3340_v11, %v3347_v51  ;;  %v3054_v49 = vrot.slane %v3053_v63, 4  ;;  %v3061_v56 = vrot.slane %v3060_v37, 4  ;;  %v3068_v14 = vrot.slane %v3067_v43, 4 }
 0x373   :  { %v3354_v21 = vrot.slane %v3333_v24, %v5007_v5  ;;  %v3041_v2 = vadd.f32 %v3040_v18, %v3039_v6  ;;  %v3048_v46 = vadd.f32 %v3047_v47, %v3046_v59  ;;  %v3075_v33 = vrot.slane %v3074_v22, 4 }
 0x374   :  { %v3362_v8 = vrot.slane %v3355_v61, %v5007_v5  ;;  %v3055_v48 = vadd.f32 %v3054_v49, %v3053_v63  ;;  %v3062_v50 = vadd.f32 %v3061_v56, %v3060_v37  ;;  %v3069_v36 = vadd.f32 %v3068_v14, %v3067_v43 }
 0x375   :  { %v3369_v28 = vrot.slane %v3354_v21, %v5007_v5  ;;  %v3042_v23 = vrot.slane %v3041_v2, 2  ;;  %v3049_v57 = vrot.slane %v3048_v46, 2  ;;  %v3076_v41 = vadd.f32 %v3075_v33, %v3074_v22 }
 0x376   :  { %v3056_v32 = vrot.slane %v3055_v48, 2  ;;  %v3063_v55 = vrot.slane %v3062_v50, 2  ;;  %v3070_v52 = vrot.slane %v3069_v36, 2  ;;  %v2637_v39 = vrot.slane %v5143_v26, 1 }
 0x377   :  { %v3370_v17 = vcombine.low %v3362_v8, %v3369_v28  ;;  %v3043_v15 = vadd.f32 %v3042_v23, %v3041_v2  ;;  %v3050_v40 = vadd.f32 %v3049_v57, %v3048_v46  ;;  %v3077_v44 = vrot.slane %v3076_v41, 2  ;;  %v5589_v46 = vld [vmem:[#allocation96_spill] sm:$0xff]  ;;  %v5590_v8 = vld [vmem:[#allocation97_spill] sm:$0xff]  ;;  %v5591_v28 = vld [vmem:[#allocation19_spill] sm:$0xff] }
 0x378   :  { %v3057_v45 = vadd.f32 %v3056_v32, %v3055_v48  ;;  %v3064_v34 = vadd.f32 %v3063_v55, %v3062_v50  ;;  %v3071_v54 = vadd.f32 %v3070_v52, %v3069_v36  ;;  %v2638_v19 = vadd.f32 %v2637_v39, %v5143_v26  ;;  %v5592_v57 = vld [vmem:[#allocation20_spill] sm:$0xff]  ;;  %v5593_v32 = vld [vmem:[#allocation51_spill] sm:$0xff] }
 0x379   :  { %3585 = vst.msk [vmem:[%s5299_s4 + $0xc] sm:$0x3f] %vm5059_vm2, %v3370_v17  ;;  %v3044_v16 = vrot.slane %v3043_v15, 1  ;;  %v3051_v30 = vrot.slane %v3050_v40, 1  ;;  %v3078_v35 = vadd.f32 %v3077_v44, %v3076_v41  ;;  %v2662_v60 = vadd.f32 %v2661_v3, %v5120_v7  ;;  %v5594_v52 = vld [vmem:[#allocation52_spill] sm:$0xff]  ;;  %v5596_v44 = vld [vmem:[#allocation86_spill] sm:$0xff] }
 0x37a   :  { %v3058_v31 = vrot.slane %v3057_v45, 1  ;;  %v3065_v62 = vrot.slane %v3064_v34, 1  ;;  %v3072_v4 = vrot.slane %v3071_v54, 1  ;;  %3889 = vrcp.f32 %v2638_v19  ;;  %v5598_v19 = vld [vmem:[#allocation22_spill] sm:$0xff] }
 0x37b   :  { %v3045_v20 = vadd.f32 %v3044_v16, %v3043_v15  ;;  %v3052_v0 = vadd.f32 %v3051_v30, %v3050_v40  ;;  %v3079_v26 = vrot.slane %v3078_v35, 1  ;;  %v2663_v53 = vrot.slane %v2662_v60, 2  ;;  %v5595_v15 = vld [vmem:[#allocation84_spill] sm:$0xff]  ;;  %v5599_v30 = vld [vmem:[#allocation53_spill] sm:$0xff] }
 0x37c   :  { %v3059_v13 = vadd.f32 %v3058_v31, %v3057_v45  ;;  %v3066_v27 = vadd.f32 %v3065_v62, %v3064_v34  ;;  %v3073_v11 = vadd.f32 %v3072_v4, %v3071_v54  ;;  %v5597_v34 = vld [vmem:[#allocation21_spill] sm:$0xff]  ;;  %v5601_v62 = vld [vmem:[#allocation88_spill] sm:$0xff] }
 0x37d   :  { %v3080_v6 = vadd.f32 %v3079_v26, %v3078_v35  ;;  %v3191_v59 = vadd.f32 %v4983_v12, %v3045_v20  ;;  %v3192_v51 = vadd.f32 %v4986_v42, %v3052_v0  ;;  %v2664_v63 = vadd.f32 %v2663_v53, %v2662_v60  ;;  %v5600_v60 = vld [vmem:[#allocation54_spill] sm:$0xff] }
 0x37e   :  { %v3193_v37 = vadd.f32 %v4989_v9, %v3059_v13  ;;  %v3194_v7 = vadd.f32 %v4994_v38, %v3066_v27  ;;  %v3195_v3 = vadd.f32 %v4997_v25, %v3073_v11  ;;  %v5602_v20 = vld [vmem:[#allocation90_spill] sm:$0xff] }
 0x37f   :  { %v3196_v43 = vadd.f32 %v5000_v29, %v3080_v6  ;;  %v3491_v24 = vcombine.low %v3191_v59, %v3192_v51  ;;  %v2665_v18 = vrot.slane %v2664_v63, 1 }
 0x380   :  { %v3492_v47 = vcombine.low %v3193_v37, %v3194_v7 }
 0x381   :  { %v3493_v22 = vcombine.low %v3195_v3, %v3196_v43  ;;  %v3500_v61 = vrot.slane %v3491_v24, %v5007_v5  ;;  %v2666_v49 = vadd.f32 %v2665_v18, %v2664_v63 }
 0x382   :  { %v3507_v56 = vrot.slane %v3492_v47, %v5007_v5 }
 0x383   :  { %v3514_v14 = vrot.slane %v3493_v22, %v5007_v5  ;;  %3891 = vrcp.f32 %v2666_v49 }
 0x384   :  { %v3890_v21 = vpop.eup %3889  ;;  %v3515_v2 = vcombine.low %v3500_v61, %v3507_v56 }
 0x385   :  { %v2677_v33 = vmul.f32 %v3890_v21, %v5589_v46  ;;  %v2678_v48 = vmul.f32 %v3890_v21, %v5590_v8  ;;  %v3529_v36 = vrot.slane %v3514_v14, %v5007_v5 }
 0x386   :  { %v3522_v50 = vrot.slane %v3515_v2, %v5007_v5  ;;  %v5603_v2 = vld [vmem:[#allocation35_spill] sm:$0xff] }
 0x387   :  { %v2727_v23 = vmul.f32 %v5591_v28, %v2677_v33  ;;  %v2728_v41 = vmul.f32 %v5592_v57, %v2677_v33  ;;  %v2729_v55 = vmul.f32 %v2677_v33, %v5593_v32  ;;  %v2730_v39 = vmul.f32 %v2677_v33, %v5594_v52  ;;  %v5606_v32 = vld [vmem:[#allocation68_spill] sm:$0xff] }
 0x388   :  { %v3530_v17 = vcombine.low %v3522_v50, %v3529_v36  ;;  %v2731_v40 = vmul.f32 %v2677_v33, %v5595_v15  ;;  %v2732_v45 = vmul.f32 %v2677_v33, %v5596_v44  ;;  %v2733_v54 = vmul.f32 %v5597_v34, %v2678_v48  ;;  %v5604_v33 = vld [vmem:[#allocation36_spill] sm:$0xff]  ;;  %v5607_v44 = vld [vmem:[#allocation85_spill] sm:$0xff]  ;;  %v5608_v34 = vld [vmem:[#allocation87_spill] sm:$0xff] }
 0x389   :  { %v2734_v16 = vmul.f32 %v5598_v19, %v2678_v48  ;;  %v2735_v35 = vmul.f32 %v2678_v48, %v5599_v30  ;;  %v2736_v31 = vmul.f32 %v2678_v48, %v5600_v60  ;;  %v2737_v4 = vmul.f32 %v2678_v48, %v5601_v62  ;;  %v5609_v62 = vld [vmem:[#allocation37_spill] sm:$0xff] }
 0x38a   :  { %3589 = vst.msk [vmem:[%s5299_s4 + $0x24] sm:$0x3f] %vm5059_vm2, %v3530_v17  ;;  %v2738_v0 = vmul.f32 %v2678_v48, %v5602_v20  ;;  %v2913_v26 = vadd.f32 %v2733_v54, %v2727_v23  ;;  %v5610_v20 = vld [vmem:[#allocation38_spill] sm:$0xff] }
 0x38b   :  { %v2920_v53 = vadd.f32 %v2734_v16, %v2728_v41  ;;  %v2927_v13 = vadd.f32 %v2735_v35, %v2729_v55  ;;  %v2934_v27 = vadd.f32 %v2736_v31, %v2730_v39  ;;  %v2941_v11 = vadd.f32 %v2737_v4, %v2731_v40  ;;  %v5605_v41 = vld [vmem:[#allocation67_spill] sm:$0xff] }
 0x38c   :  { %v2914_v6 = vrot.slane %v2913_v26, 4  ;;  %v2948_v59 = vadd.f32 %v2738_v0, %v2732_v45 }
 0x38d   :  { %v3892_v51 = vpop.eup %3891  ;;  %v2921_v63 = vrot.slane %v2920_v53, 4  ;;  %v2928_v37 = vrot.slane %v2927_v13, 4  ;;  %v2935_v7 = vrot.slane %v2934_v27, 4  ;;  %v2942_v3 = vrot.slane %v2941_v11, 4 }
 0x38e   :  { %v2915_v43 = vadd.f32 %v2914_v6, %v2913_v26  ;;  %v2949_v24 = vrot.slane %v2948_v59, 4  ;;  %v2689_v18 = vmul.f32 %v3892_v51, %v5036_v1  ;;  %v2690_v47 = vmul.f32 %v3892_v51, %v5038_v10 }
 0x38f   :  { %v2922_v22 = vadd.f32 %v2921_v63, %v2920_v53  ;;  %v2929_v61 = vadd.f32 %v2928_v37, %v2927_v13  ;;  %v2936_v49 = vadd.f32 %v2935_v7, %v2934_v27  ;;  %v2943_v56 = vadd.f32 %v2942_v3, %v2941_v11  ;;  %v5612_v63 = vld [vmem:[#allocation70_spill] sm:$0xff] }
 0x390   :  { %v2916_v14 = vrot.slane %v2915_v43, 2  ;;  %v2950_v21 = vadd.f32 %v2949_v24, %v2948_v59  ;;  %v2775_v46 = vmul.f32 %v5603_v2, %v2689_v18  ;;  %v2776_v8 = vmul.f32 %v5604_v33, %v2689_v18  ;;  %v5611_v59 = vld [vmem:[#allocation69_spill] sm:$0xff] }
 0x391   :  { %v2923_v48 = vrot.slane %v2922_v22, 2  ;;  %v2930_v50 = vrot.slane %v2929_v61, 2  ;;  %v2937_v36 = vrot.slane %v2936_v49, 2  ;;  %v2944_v28 = vrot.slane %v2943_v56, 2 }
 0x392   :  { %v2917_v23 = vadd.f32 %v2916_v14, %v2915_v43  ;;  %v2951_v57 = vrot.slane %v2950_v21, 2  ;;  %v2777_v1 = vmul.f32 %v2689_v18, %v5605_v41  ;;  %v2778_v10 = vmul.f32 %v2689_v18, %v5606_v32 }
 0x393   :  { %v2924_v55 = vadd.f32 %v2923_v48, %v2922_v22  ;;  %v2931_v52 = vadd.f32 %v2930_v50, %v2929_v61  ;;  %v2938_v39 = vadd.f32 %v2937_v36, %v2936_v49  ;;  %v2945_v17 = vadd.f32 %v2944_v28, %v2943_v56  ;;  %v5613_v22 = vld [vmem:[#allocation89_spill] sm:$0xff]  ;;  %v5614_v49 = vld [vmem:[#allocation91_spill] sm:$0xff] }
 0x394   :  { %v2918_v15 = vrot.slane %v2917_v23, 1  ;;  %v2952_v40 = vadd.f32 %v2951_v57, %v2950_v21  ;;  %v2779_v45 = vmul.f32 %v5607_v44, %v2689_v18  ;;  %v2780_v54 = vmul.f32 %v5608_v34, %v2689_v18 }
 0x395   :  { %v2925_v19 = vrot.slane %v2924_v55, 1  ;;  %v2932_v16 = vrot.slane %v2931_v52, 1  ;;  %v2939_v30 = vrot.slane %v2938_v39, 1  ;;  %v2946_v35 = vrot.slane %v2945_v17, 1 }
 0x396   :  { %v2919_v60 = vadd.f32 %v2918_v15, %v2917_v23  ;;  %v2953_v31 = vrot.slane %v2952_v40, 1  ;;  %v2781_v4 = vmul.f32 %v5609_v62, %v2690_v47  ;;  %v2782_v0 = vmul.f32 %v5610_v20, %v2690_v47 }
 0x397   :  { %v2926_v26 = vadd.f32 %v2925_v19, %v2924_v55  ;;  %v2933_v53 = vadd.f32 %v2932_v16, %v2931_v52  ;;  %v2940_v13 = vadd.f32 %v2939_v30, %v2938_v39  ;;  %v2947_v27 = vadd.f32 %v2946_v35, %v2945_v17 }
 0x398   :  { %v2954_v11 = vadd.f32 %v2953_v31, %v2952_v40  ;;  %v3173_v6 = vadd.f32 %v4983_v12, %v2919_v60  ;;  %v2783_v51 = vmul.f32 %v2690_v47, %v5611_v59  ;;  %v2784_v37 = vmul.f32 %v2690_v47, %v5612_v63 }
 0x399   :  { %v3174_v7 = vadd.f32 %v4986_v42, %v2926_v26  ;;  %v3175_v3 = vadd.f32 %v4989_v9, %v2933_v53  ;;  %v3176_v43 = vadd.f32 %v4994_v38, %v2940_v13  ;;  %v3177_v24 = vadd.f32 %v4997_v25, %v2947_v27 }
 0x39a   :  { %v3178_v18 = vadd.f32 %v5000_v29, %v2954_v11  ;;  %v2785_v61 = vmul.f32 %v5613_v22, %v2690_v47  ;;  %v2786_v56 = vmul.f32 %v5614_v49, %v2690_v47  ;;  %v3081_v14 = vadd.f32 %v2781_v4, %v2775_v46 }
 0x39b   :  { %v3371_v21 = vcombine.low %v3173_v6, %v3174_v7  ;;  %v3372_v2 = vcombine.low %v3175_v3, %v3176_v43  ;;  %v3088_v33 = vadd.f32 %v2782_v0, %v2776_v8  ;;  %v3095_v48 = vadd.f32 %v2783_v51, %v2777_v1 }
 0x39c   :  { %v3373_v50 = vcombine.low %v3177_v24, %v3178_v18  ;;  %v3082_v36 = vrot.slane %v3081_v14, 4  ;;  %v3102_v28 = vadd.f32 %v2784_v37, %v2778_v10  ;;  %v3109_v23 = vadd.f32 %v2785_v61, %v2779_v45 }
 0x39d   :  { %v3380_v57 = vrot.slane %v3371_v21, %v5007_v5  ;;  %v3387_v41 = vrot.slane %v3372_v2, %v5007_v5  ;;  %v3089_v32 = vrot.slane %v3088_v33, 4  ;;  %v3096_v55 = vrot.slane %v3095_v48, 4 }
 0x39e   :  { %v3394_v52 = vrot.slane %v3373_v50, %v5007_v5  ;;  %v3083_v39 = vadd.f32 %v3082_v36, %v3081_v14  ;;  %v3103_v17 = vrot.slane %v3102_v28, 4  ;;  %v3110_v47 = vrot.slane %v3109_v23, 4 }
 0x39f   :  { %v3395_v46 = vcombine.low %v3380_v57, %v3387_v41  ;;  %v3090_v15 = vadd.f32 %v3089_v32, %v3088_v33  ;;  %v3097_v40 = vadd.f32 %v3096_v55, %v3095_v48  ;;  %v3116_v8 = vadd.f32 %v2786_v56, %v2780_v54 }
 0x3a0   :  { %v3409_v1 = vrot.slane %v3394_v52, %v5007_v5  ;;  %v3084_v44 = vrot.slane %v3083_v39, 2  ;;  %v3104_v10 = vadd.f32 %v3103_v17, %v3102_v28  ;;  %v3111_v45 = vadd.f32 %v3110_v47, %v3109_v23 }
 0x3a1   :  { %v3402_v34 = vrot.slane %v3395_v46, %v5007_v5  ;;  %v3091_v19 = vrot.slane %v3090_v15, 2  ;;  %v3098_v16 = vrot.slane %v3097_v40, 2  ;;  %v3117_v30 = vrot.slane %v3116_v8, 4 }
 0x3a2   :  { %v3085_v35 = vadd.f32 %v3084_v44, %v3083_v39  ;;  %v3105_v60 = vrot.slane %v3104_v10, 2  ;;  %v3112_v31 = vrot.slane %v3111_v45, 2 }
 0x3a3   :  { %v3410_v62 = vcombine.low %v3402_v34, %v3409_v1  ;;  %v3092_v4 = vadd.f32 %v3091_v19, %v3090_v15  ;;  %v3099_v20 = vadd.f32 %v3098_v16, %v3097_v40  ;;  %v3118_v0 = vadd.f32 %v3117_v30, %v3116_v8 }
 0x3a4   :  { %v3086_v26 = vrot.slane %v3085_v35, 1  ;;  %v3106_v53 = vadd.f32 %v3105_v60, %v3104_v10  ;;  %v3113_v54 = vadd.f32 %v3112_v31, %v3111_v45 }
 0x3a5   :  { %3586 = vst.msk [vmem:[%s5299_s4 + $0x12] sm:$0x3f] %vm5059_vm2, %v3410_v62  ;;  %v3093_v13 = vrot.slane %v3092_v4, 1  ;;  %v3100_v27 = vrot.slane %v3099_v20, 1  ;;  %v3119_v11 = vrot.slane %v3118_v0, 2 }
 0x3a6   :  { %v3087_v6 = vadd.f32 %v3086_v26, %v3085_v35  ;;  %v3107_v59 = vrot.slane %v3106_v53, 1  ;;  %v3114_v51 = vrot.slane %v3113_v54, 1 }
 0x3a7   :  { %v3094_v63 = vadd.f32 %v3093_v13, %v3092_v4  ;;  %v3101_v37 = vadd.f32 %v3100_v27, %v3099_v20  ;;  %v3120_v7 = vadd.f32 %v3119_v11, %v3118_v0 }
 0x3a8   :  { %v3108_v3 = vadd.f32 %v3107_v59, %v3106_v53  ;;  %v3115_v43 = vadd.f32 %v3114_v51, %v3113_v54  ;;  %v3197_v24 = vadd.f32 %v4983_v12, %v3087_v6 }
 0x3a9   :  { %v3121_v18 = vrot.slane %v3120_v7, 1  ;;  %v3198_v22 = vadd.f32 %v4986_v42, %v3094_v63  ;;  %v3199_v61 = vadd.f32 %v4989_v9, %v3101_v37 }
 0x3aa   :  { %v3200_v49 = vadd.f32 %v4994_v38, %v3108_v3  ;;  %v3201_v14 = vadd.f32 %v4997_v25, %v3115_v43 }
 0x3ab   :  { %v3122_v56 = vadd.f32 %v3121_v18, %v3120_v7  ;;  %v3531_v21 = vcombine.low %v3197_v24, %v3198_v22 }
 0x3ac   :  { %v3532_v2 = vcombine.low %v3199_v61, %v3200_v49 }
 0x3ad   :  { %v3202_v33 = vadd.f32 %v5000_v29, %v3122_v56  ;;  %v3540_v48 = vrot.slane %v3531_v21, %v5007_v5 }
 0x3ae   :  { %v3547_v50 = vrot.slane %v3532_v2, %v5007_v5 }
 0x3af   :  { %v3533_v36 = vcombine.low %v3201_v14, %v3202_v33 }
 0x3b0   :  { %v3555_v12 = vcombine.low %v3540_v48, %v3547_v50 }
 0x3b1   :  { %v3554_v28 = vrot.slane %v3533_v36, %v5007_v5 }
 0x3b2   :  { %v3562_v42 = vrot.slane %v3555_v12, %v5007_v5 }
 0x3b3   :  { %v3569_v9 = vrot.slane %v3554_v28, %v5007_v5 }
 0x3b5   :  { %v3570_v38 = vcombine.low %v3562_v42, %v3569_v9 }
 0x3b7   :  { %3590 = vst.msk [vmem:[%s5299_s4 + $0x2a] sm:$0x3f] %vm5059_vm2, %v3570_v38 }
 0x3b8   :  { %3595 = vsyncpa [#allocation3], 1 }
 0x3b9   :  { %3596 = vsyncpa [#allocation5], 1 }

</bundles_post_ra>
